<compile_context>
chip_gen: v7x
topology: tpu7x:2x2x1
jax: 0.10.0
libtpu: 0.0.40
codegen_flags: <defaults>
</compile_context>

<pallas_src>
import jax
import jax.numpy as jnp
from jax.experimental import pallas as pl
from jax.experimental.pallas import tpu as pltpu


def _pick_strip_h(H, target=8):
    """Largest strip height <= target that divides H (falls back to 1 / H)."""
    if H <= target:
        return H
    for th in range(target, 0, -1):
        if H % th == 0:
            return th
    return H


def _fold_bn(w_hwio, bn, eps):
    """Fold eval-mode BatchNorm into the (bias-free) conv: w*scale, beta - mean*scale."""
    scale = bn["gamma"] / jnp.sqrt(bn["var"] + eps)              # (Cout,)
    w = (w_hwio * scale).astype(jnp.float32)                     # broadcast over Cout
    b = (bn["beta"] - bn["mean"] * scale).astype(jnp.float32)
    return w, b


def _make_kernel(TH, W, cin, planes, proj, cdt):
    """One (batch image, row strip) per grid step; NHWC, channels on the lane axis."""

    def kernel(x_ref, w1_ref, b1_ref, w2_ref, b2_ref, *rest):
        if proj:
            ws_ref, bs_ref, out_ref, col1_ref, h1_ref, col2_ref = rest
        else:
            out_ref, col1_ref, h1_ref, col2_ref = rest

        s = pl.program_id(1)
        s_last = pl.num_programs(1) - 1

        # ---- conv1 (+ folded bn1) + relu on TH+2 rows (1-row halo for conv2).
        # im2col into VMEM, then a single K=9*cin MXU matmul (bf16 in, f32 acc).
        for dy in range(3):
            for dx in range(3):
                k = dy * 3 + dx
                col1_ref[:, :, k * cin:(k + 1) * cin] = \
                    x_ref[dy:dy + TH + 2, dx:dx + W, :]
        h1 = jnp.dot(col1_ref[...].reshape((TH + 2) * W, 9 * cin), w1_ref[...],
                     preferred_element_type=jnp.float32)
        h1 = jnp.maximum(h1 + b1_ref[...], 0.0)
        h1_ref[:, 1:W + 1, :] = h1.reshape(TH + 2, W, planes).astype(cdt)

        # ---- border-only halo zeroing (O(perimeter), not O(area)).
        h1_ref[:, 0:1, :] = jnp.zeros((TH + 2, 1, planes), cdt)
        h1_ref[:, W + 1:W + 2, :] = jnp.zeros((TH + 2, 1, planes), cdt)

        @pl.when(s == 0)                       # image top edge
        def _():
            h1_ref[0:1, :, :] = jnp.zeros((1, W + 2, planes), cdt)

        @pl.when(s == s_last)                  # image bottom edge
        def _():
            h1_ref[TH + 1:TH + 2, :, :] = jnp.zeros((1, W + 2, planes), cdt)

        # ---- conv2 (+ folded bn2): im2col, single K=9*planes MXU matmul.
        for dy in range(3):
            for dx in range(3):
                k = dy * 3 + dx
                col2_ref[:, :, k * planes:(k + 1) * planes] = \
                    h1_ref[dy:dy + TH, dx:dx + W, :]
        y = jnp.dot(col2_ref[...].reshape(TH * W, 9 * planes), w2_ref[...],
                    preferred_element_type=jnp.float32)
        y = y + b2_ref[...]

        # ---- shortcut (identity, or folded 1x1 conv + BN) and final relu.
        xs = x_ref[2:2 + TH, 1:1 + W, :]                         # (TH, W, cin)
        if proj:
            sc = jnp.dot(xs.reshape(TH * W, cin), ws_ref[...],
                         preferred_element_type=jnp.float32) + bs_ref[...]
        else:                                                    # cin == planes
            sc = xs.reshape(TH * W, cin).astype(jnp.float32)
        y = jnp.maximum(y + sc, 0.0)
        out_ref[...] = y.reshape(TH, W, planes).astype(out_ref.dtype)

    return kernel


def basic_block_forward(x_nhwc, params, stride=1, eps=1e-5,
                        compute_dtype=jnp.bfloat16, strip_h=None):
    """x_nhwc: (B, H, W, Cin) f32 -> (B, H, W, planes) f32.  Eval-mode BN folded."""
    if stride != 1:
        # TODO(synk): strided conv1 / downsampling shortcut not implemented.
        raise NotImplementedError("stride != 1 not supported by this kernel")

    B, H, W, cin = x_nhwc.shape
    planes = params["conv1_w"].shape[-1]
    proj = (stride != 1) or (cin != planes)
    cdt = compute_dtype

    TH = strip_h if strip_h is not None else _pick_strip_h(H)
    assert H % TH == 0, "strip height must divide H"
    n_strips = H // TH

    # Fold BN (f32), reshape HWIO -> (9*Cin, Cout) to match the im2col K-order,
    # then cast to the MXU operand dtype.
    w1, b1 = _fold_bn(params["conv1_w"], params["bn1"], eps)
    w2, b2 = _fold_bn(params["conv2_w"], params["bn2"], eps)
    w1 = w1.reshape(9 * cin, planes).astype(cdt)
    w2 = w2.reshape(9 * planes, planes).astype(cdt)
    b1 = b1.reshape(1, planes)
    b2 = b2.reshape(1, planes)

    # Overlapping row-strip windows with the 3x3 conv halo (2 rows / 1 col of zero
    # pad) baked in, so the kernel does zero input-halo work and the BlockSpec can
    # auto-pipeline the strip loads.
    xp = jnp.pad(x_nhwc.astype(cdt), ((0, 0), (2, 2), (1, 1), (0, 0)))
    rows = jnp.arange(n_strips)[:, None] * TH + jnp.arange(TH + 4)[None, :]
    x_strips = xp[:, rows]                     # (B, n_strips, TH+4, W+2, cin)

    const = dict(pipeline_mode=pl.Buffered(1))  # resident weights: 1 VMEM buffer
    inputs = [x_strips, w1, b1, w2, b2]
    in_specs = [
        pl.BlockSpec((None, None, TH + 4, W + 2, cin),
                     lambda b, s: (b, s, 0, 0, 0)),
        pl.BlockSpec((9 * cin, planes), lambda b, s: (0, 0), **const),
        pl.BlockSpec((1, planes), lambda b, s: (0, 0), **const),
        pl.BlockSpec((9 * planes, planes), lambda b, s: (0, 0), **const),
        pl.BlockSpec((1, planes), lambda b, s: (0, 0), **const),
    ]
    if proj:
        ws, bs = _fold_bn(params["sc_w"], params["bns"], eps)
        inputs += [ws.reshape(cin, planes).astype(cdt), bs.reshape(1, planes)]
        in_specs += [
            pl.BlockSpec((cin, planes), lambda b, s: (0, 0), **const),
            pl.BlockSpec((1, planes), lambda b, s: (0, 0), **const),
        ]

    kernel = _make_kernel(TH, W, cin, planes, proj, cdt)

    # Explicit VMEM budget (review: v7x has 64 MiB physical / 32 MiB scoped default).
    bpe = jnp.dtype(cdt).itemsize
    scratch_bytes = ((TH + 2) * W * 9 * cin + (TH + 2) * (W + 2) * planes
                     + TH * W * 9 * planes) * bpe
    block_bytes = (2 * (TH + 4) * (W + 2) * cin * bpe          # x strip, 2 buffers
                   + 2 * TH * W * planes * 4                   # out tile, 2 buffers
                   + (9 * cin + 9 * planes + (cin if proj else 0)) * planes * bpe
                   + 3 * planes * 4)                           # biases
    vmem_limit = int(min(64 * 2 ** 20,
                         max(32 * 2 ** 20, 2 * (scratch_bytes + block_bytes))))

    flops = 2 * B * H * W * 9 * planes * (cin + planes)
    if proj:
        flops += 2 * B * H * W * cin * planes
    bytes_accessed = (int(x_strips.size) * bpe
                      + sum(int(a.size) * jnp.dtype(a.dtype).itemsize for a in inputs[1:])
                      + B * H * W * planes * 4)

    return pl.pallas_call(
        kernel,
        out_shape=jax.ShapeDtypeStruct((B, H, W, planes), jnp.float32),
        grid_spec=pltpu.PrefetchScalarGridSpec(
            num_scalar_prefetch=0,
            grid=(B, n_strips),
            in_specs=in_specs,
            out_specs=pl.BlockSpec((None, TH, W, planes),
                                   lambda b, s: (b, s, 0, 0)),
            scratch_shapes=[
                pltpu.VMEM((TH + 2, W, 9 * cin), cdt),       # conv1 im2col
                pltpu.VMEM((TH + 2, W + 2, planes), cdt),    # h1 + conv2 halo
                pltpu.VMEM((TH, W, 9 * planes), cdt),        # conv2 im2col
            ],
        ),
        compiler_params=pltpu.CompilerParams(
            dimension_semantics=("parallel", "parallel"),
            vmem_limit_bytes=vmem_limit),
        cost_estimate=pl.CostEstimate(flops=int(flops), transcendentals=0,
                                      bytes_accessed=int(bytes_accessed)),
    )(*inputs)


def ref_basic_block(x, params, stride=1, eps=1e-5):
    """Plain-JAX reference (unfolded BN, lax.conv, HIGHEST precision)."""
    dn = ("NHWC", "HWIO", "NHWC")
    hp = jax.lax.Precision.HIGHEST

    def bn(y, p):
        return (y - p["mean"]) * (p["gamma"] / jnp.sqrt(p["var"] + eps)) + p["beta"]

    out = jax.lax.conv_general_dilated(x, params["conv1_w"], (stride, stride),
                                       "SAME", dimension_numbers=dn, precision=hp)
    out = jax.nn.relu(bn(out, params["bn1"]))
    out = jax.lax.conv_general_dilated(out, params["conv2_w"], (1, 1),
                                       "SAME", dimension_numbers=dn, precision=hp)
    out = bn(out, params["bn2"])
    cin, planes = x.shape[-1], params["conv1_w"].shape[-1]
    if stride != 1 or cin != planes:
        sc = jax.lax.conv_general_dilated(x, params["sc_w"], (stride, stride),
                                          "SAME", dimension_numbers=dn, precision=hp)
        sc = bn(sc, params["bns"])
    else:
        sc = x
    return jax.nn.relu(out + sc)


if __name__ == "__main__":
    def bn_params(k, n):
        k1, k2, k3, k4 = jax.random.split(k, 4)
        return dict(
            gamma=jax.random.uniform(k1, (n,), jnp.float32, 0.5, 1.5),
            beta=jax.random.normal(k2, (n,), jnp.float32) * 0.1,
            mean=jax.random.normal(k3, (n,), jnp.float32) * 0.1,
            var=jax.random.uniform(k4, (n,), jnp.float32, 0.5, 1.5),
        )

    def make_case(key, B, H, W, cin, planes):
        ks = jax.random.split(key, 7)
        s1 = 1.0 / (9 * cin) ** 0.5
        s2 = 1.0 / (9 * planes) ** 0.5
        params = {
            "conv1_w": jax.random.normal(ks[0], (3, 3, cin, planes), jnp.float32) * s1,
            "bn1": bn_params(ks[1], planes),
            "conv2_w": jax.random.normal(ks[2], (3, 3, planes, planes), jnp.float32) * s2,
            "bn2": bn_params(ks[3], planes),
        }
        if cin != planes:
            params["sc_w"] = (jax.random.normal(ks[4], (1, 1, cin, planes), jnp.float32)
                              * (1.0 / cin ** 0.5))
            params["bns"] = bn_params(ks[5], planes)
        x = jax.random.normal(ks[6], (B, H, W, cin), jnp.float32)
        return x, params

    k1, k2 = jax.random.split(jax.random.PRNGKey(0))

    # Case 1: projection shortcut (cin != planes), small channels, 2 row strips.
    x1, p1 = make_case(k1, B=2, H=16, W=16, cin=4, planes=8)
    ref1 = ref_basic_block(x1, p1)

    out_f32 = basic_block_forward(x1, p1, compute_dtype=jnp.float32)
    jax.block_until_ready(out_f32)
    assert out_f32.shape == ref1.shape
    assert jnp.allclose(out_f32, ref1, atol=1e-3, rtol=1e-3), \
        float(jnp.max(jnp.abs(out_f32 - ref1)))

    out_bf16 = basic_block_forward(x1, p1, compute_dtype=jnp.bfloat16)
    jax.block_until_ready(out_bf16)
    assert jnp.allclose(out_bf16, ref1, atol=1e-1, rtol=5e-2), \
        float(jnp.max(jnp.abs(out_bf16 - ref1)))

    # Case 2: identity shortcut (cin == planes), MXU-relevant channel count.
    x2, p2 = make_case(k2, B=2, H=16, W=16, cin=64, planes=64)
    ref2 = ref_basic_block(x2, p2)
    out2 = basic_block_forward(x2, p2, compute_dtype=jnp.bfloat16)
    jax.block_until_ready(out2)
    assert out2.shape == ref2.shape
    assert jnp.allclose(out2, ref2, atol=1e-1, rtol=5e-2), \
        float(jnp.max(jnp.abs(out2 - ref2)))

    print("KERNEL_OK")
</pallas_src>

<mosaic_0001>
module attributes {stable_mosaic.version = 11 : i64} {
  func.func @kernel(%arg0: i32, %arg1: i32, %arg2: memref<1x1x12x18x4xf32, #tpu.memory_space<vmem>>, %arg3: memref<36x8xf32, #tpu.memory_space<vmem>>, %arg4: memref<1x8xf32, #tpu.memory_space<vmem>>, %arg5: memref<72x8xf32, #tpu.memory_space<vmem>>, %arg6: memref<1x8xf32, #tpu.memory_space<vmem>>, %arg7: memref<4x8xf32, #tpu.memory_space<vmem>>, %arg8: memref<1x8xf32, #tpu.memory_space<vmem>>, %arg9: memref<1x8x16x8xf32, #tpu.memory_space<vmem>>, %arg10: memref<10x16x36xf32, #tpu.memory_space<vmem>>, %arg11: memref<10x18x8xf32, #tpu.memory_space<vmem>>, %arg12: memref<8x16x72xf32, #tpu.memory_space<vmem>>) attributes {dimension_semantics = [#tpu.dimension_semantics<parallel>, #tpu.dimension_semantics<parallel>], iteration_bounds = array<i64: 2, 2>, scalar_prefetch = 0 : i64, scratch_operands = 3 : i64, tpu.core_type = #tpu.core_type<tc>, window_params = [{transform_indices = @transform_0, window_bounds = array<i64: 1, 1, 12, 18, 4>}, {pipeline_mode = #tpu.pipeline_mode<synchronous>, transform_indices = @transform_1, window_bounds = array<i64: 36, 8>}, {pipeline_mode = #tpu.pipeline_mode<synchronous>, transform_indices = @transform_2, window_bounds = array<i64: 1, 8>}, {pipeline_mode = #tpu.pipeline_mode<synchronous>, transform_indices = @transform_3, window_bounds = array<i64: 72, 8>}, {pipeline_mode = #tpu.pipeline_mode<synchronous>, transform_indices = @transform_4, window_bounds = array<i64: 1, 8>}, {pipeline_mode = #tpu.pipeline_mode<synchronous>, transform_indices = @transform_5, window_bounds = array<i64: 4, 8>}, {pipeline_mode = #tpu.pipeline_mode<synchronous>, transform_indices = @transform_6, window_bounds = array<i64: 1, 8>}, {transform_indices = @transform_7, window_bounds = array<i64: 1, 8, 16, 8>}]} {
    %c0 = arith.constant 0 : index
    %c0_0 = arith.constant 0 : index
    %c0_1 = arith.constant 0 : index
    %c0_2 = arith.constant 0 : index
    %c0_3 = arith.constant 0 : index
    %0 = vector.load %arg2[%c0, %c0_0, %c0_1, %c0_2, %c0_3] : memref<1x1x12x18x4xf32, #tpu.memory_space<vmem>>, vector<1x1x10x16x4xf32>
    %1 = vector.shape_cast %0 : vector<1x1x10x16x4xf32> to vector<10x16x4xf32>
    %c0_4 = arith.constant 0 : index
    %c0_5 = arith.constant 0 : index
    %c0_6 = arith.constant 0 : index
    %2 = vector.load %arg10[%c0_4, %c0_5, %c0_6] : memref<10x16x36xf32, #tpu.memory_space<vmem>>, vector<10x16x4xf32>
    tpu.vector_store %arg10[%c0_4, %c0_5, %c0_6], %1 {strides = array<i32>} : memref<10x16x36xf32, #tpu.memory_space<vmem>>, vector<10x16x4xf32>,
    %c0_7 = arith.constant 0 : index
    %c0_8 = arith.constant 0 : index
    %c0_9 = arith.constant 0 : index
    %c1 = arith.constant 1 : index
    %c0_10 = arith.constant 0 : index
    %3 = vector.load %arg2[%c0_7, %c0_8, %c0_9, %c1, %c0_10] : memref<1x1x12x18x4xf32, #tpu.memory_space<vmem>>, vector<1x1x10x16x4xf32>
    %4 = vector.shape_cast %3 : vector<1x1x10x16x4xf32> to vector<10x16x4xf32>
    %c0_11 = arith.constant 0 : index
    %c0_12 = arith.constant 0 : index
    %c4 = arith.constant 4 : index
    %5 = vector.load %arg10[%c0_11, %c0_12, %c4] : memref<10x16x36xf32, #tpu.memory_space<vmem>>, vector<10x16x4xf32>
    tpu.vector_store %arg10[%c0_11, %c0_12, %c4], %4 {strides = array<i32>} : memref<10x16x36xf32, #tpu.memory_space<vmem>>, vector<10x16x4xf32>,
    %c0_13 = arith.constant 0 : index
    %c0_14 = arith.constant 0 : index
    %c0_15 = arith.constant 0 : index
    %c2 = arith.constant 2 : index
    %c0_16 = arith.constant 0 : index
    %6 = vector.load %arg2[%c0_13, %c0_14, %c0_15, %c2, %c0_16] : memref<1x1x12x18x4xf32, #tpu.memory_space<vmem>>, vector<1x1x10x16x4xf32>
    %7 = vector.shape_cast %6 : vector<1x1x10x16x4xf32> to vector<10x16x4xf32>
    %c0_17 = arith.constant 0 : index
    %c0_18 = arith.constant 0 : index
    %c8 = arith.constant 8 : index
    %8 = vector.load %arg10[%c0_17, %c0_18, %c8] : memref<10x16x36xf32, #tpu.memory_space<vmem>>, vector<10x16x4xf32>
    tpu.vector_store %arg10[%c0_17, %c0_18, %c8], %7 {strides = array<i32>} : memref<10x16x36xf32, #tpu.memory_space<vmem>>, vector<10x16x4xf32>,
    %c0_19 = arith.constant 0 : index
    %c0_20 = arith.constant 0 : index
    %c1_21 = arith.constant 1 : index
    %c0_22 = arith.constant 0 : index
    %c0_23 = arith.constant 0 : index
    %9 = vector.load %arg2[%c0_19, %c0_20, %c1_21, %c0_22, %c0_23] : memref<1x1x12x18x4xf32, #tpu.memory_space<vmem>>, vector<1x1x10x16x4xf32>
    %10 = vector.shape_cast %9 : vector<1x1x10x16x4xf32> to vector<10x16x4xf32>
    %c0_24 = arith.constant 0 : index
    %c0_25 = arith.constant 0 : index
    %c12 = arith.constant 12 : index
    %11 = vector.load %arg10[%c0_24, %c0_25, %c12] : memref<10x16x36xf32, #tpu.memory_space<vmem>>, vector<10x16x4xf32>
    tpu.vector_store %arg10[%c0_24, %c0_25, %c12], %10 {strides = array<i32>} : memref<10x16x36xf32, #tpu.memory_space<vmem>>, vector<10x16x4xf32>,
    %c0_26 = arith.constant 0 : index
    %c0_27 = arith.constant 0 : index
    %c1_28 = arith.constant 1 : index
    %c1_29 = arith.constant 1 : index
    %c0_30 = arith.constant 0 : index
    %12 = vector.load %arg2[%c0_26, %c0_27, %c1_28, %c1_29, %c0_30] : memref<1x1x12x18x4xf32, #tpu.memory_space<vmem>>, vector<1x1x10x16x4xf32>
    %13 = vector.shape_cast %12 : vector<1x1x10x16x4xf32> to vector<10x16x4xf32>
    %c0_31 = arith.constant 0 : index
    %c0_32 = arith.constant 0 : index
    %c16 = arith.constant 16 : index
    %14 = vector.load %arg10[%c0_31, %c0_32, %c16] : memref<10x16x36xf32, #tpu.memory_space<vmem>>, vector<10x16x4xf32>
    tpu.vector_store %arg10[%c0_31, %c0_32, %c16], %13 {strides = array<i32>} : memref<10x16x36xf32, #tpu.memory_space<vmem>>, vector<10x16x4xf32>,
    %c0_33 = arith.constant 0 : index
    %c0_34 = arith.constant 0 : index
    %c1_35 = arith.constant 1 : index
    %c2_36 = arith.constant 2 : index
    %c0_37 = arith.constant 0 : index
    %15 = vector.load %arg2[%c0_33, %c0_34, %c1_35, %c2_36, %c0_37] : memref<1x1x12x18x4xf32, #tpu.memory_space<vmem>>, vector<1x1x10x16x4xf32>
    %16 = vector.shape_cast %15 : vector<1x1x10x16x4xf32> to vector<10x16x4xf32>
    %c0_38 = arith.constant 0 : index
    %c0_39 = arith.constant 0 : index
    %c20 = arith.constant 20 : index
    %17 = vector.load %arg10[%c0_38, %c0_39, %c20] : memref<10x16x36xf32, #tpu.memory_space<vmem>>, vector<10x16x4xf32>
    tpu.vector_store %arg10[%c0_38, %c0_39, %c20], %16 {strides = array<i32>} : memref<10x16x36xf32, #tpu.memory_space<vmem>>, vector<10x16x4xf32>,
    %c0_40 = arith.constant 0 : index
    %c0_41 = arith.constant 0 : index
    %c2_42 = arith.constant 2 : index
    %c0_43 = arith.constant 0 : index
    %c0_44 = arith.constant 0 : index
    %18 = vector.load %arg2[%c0_40, %c0_41, %c2_42, %c0_43, %c0_44] : memref<1x1x12x18x4xf32, #tpu.memory_space<vmem>>, vector<1x1x10x16x4xf32>
    %19 = vector.shape_cast %18 : vector<1x1x10x16x4xf32> to vector<10x16x4xf32>
    %c0_45 = arith.constant 0 : index
    %c0_46 = arith.constant 0 : index
    %c24 = arith.constant 24 : index
    %20 = vector.load %arg10[%c0_45, %c0_46, %c24] : memref<10x16x36xf32, #tpu.memory_space<vmem>>, vector<10x16x4xf32>
    tpu.vector_store %arg10[%c0_45, %c0_46, %c24], %19 {strides = array<i32>} : memref<10x16x36xf32, #tpu.memory_space<vmem>>, vector<10x16x4xf32>,
    %c0_47 = arith.constant 0 : index
    %c0_48 = arith.constant 0 : index
    %c2_49 = arith.constant 2 : index
    %c1_50 = arith.constant 1 : index
    %c0_51 = arith.constant 0 : index
    %21 = vector.load %arg2[%c0_47, %c0_48, %c2_49, %c1_50, %c0_51] : memref<1x1x12x18x4xf32, #tpu.memory_space<vmem>>, vector<1x1x10x16x4xf32>
    %22 = vector.shape_cast %21 : vector<1x1x10x16x4xf32> to vector<10x16x4xf32>
    %c0_52 = arith.constant 0 : index
    %c0_53 = arith.constant 0 : index
    %c28 = arith.constant 28 : index
    %23 = vector.load %arg10[%c0_52, %c0_53, %c28] : memref<10x16x36xf32, #tpu.memory_space<vmem>>, vector<10x16x4xf32>
    tpu.vector_store %arg10[%c0_52, %c0_53, %c28], %22 {strides = array<i32>} : memref<10x16x36xf32, #tpu.memory_space<vmem>>, vector<10x16x4xf32>,
    %c0_54 = arith.constant 0 : index
    %c0_55 = arith.constant 0 : index
    %c2_56 = arith.constant 2 : index
    %c2_57 = arith.constant 2 : index
    %c0_58 = arith.constant 0 : index
    %24 = vector.load %arg2[%c0_54, %c0_55, %c2_56, %c2_57, %c0_58] : memref<1x1x12x18x4xf32, #tpu.memory_space<vmem>>, vector<1x1x10x16x4xf32>
    %25 = vector.shape_cast %24 : vector<1x1x10x16x4xf32> to vector<10x16x4xf32>
    %c0_59 = arith.constant 0 : index
    %c0_60 = arith.constant 0 : index
    %c32 = arith.constant 32 : index
    %26 = vector.load %arg10[%c0_59, %c0_60, %c32] : memref<10x16x36xf32, #tpu.memory_space<vmem>>, vector<10x16x4xf32>
    tpu.vector_store %arg10[%c0_59, %c0_60, %c32], %25 {strides = array<i32>} : memref<10x16x36xf32, #tpu.memory_space<vmem>>, vector<10x16x4xf32>,
    %c0_61 = arith.constant 0 : index
    %c0_62 = arith.constant 0 : index
    %c0_63 = arith.constant 0 : index
    %27 = vector.load %arg10[%c0_61, %c0_62, %c0_63] : memref<10x16x36xf32, #tpu.memory_space<vmem>>, vector<10x16x36xf32>
    %28 = vector.shape_cast %27 : vector<10x16x36xf32> to vector<160x36xf32>
    %c0_64 = arith.constant 0 : index
    %c0_65 = arith.constant 0 : index
    %29 = vector.load %arg3[%c0_64, %c0_65] : memref<36x8xf32, #tpu.memory_space<vmem>>, vector<36x8xf32>
    %cst = arith.constant dense<0.000000e+00> : vector<160x8xf32>
    %30 = tpu.matmul %28, %29, %cst {dimension_numbers = #tpu.dot_dimension_numbers<[1], [0], [0], [1], [0, 0, 1, 1], [], []>} : vector<160x36xf32>, vector<36x8xf32>, vector<160x8xf32> -> vector<160x8xf32>
    %c0_66 = arith.constant 0 : index
    %c0_67 = arith.constant 0 : index
    %31 = vector.load %arg4[%c0_66, %c0_67] : memref<1x8xf32, #tpu.memory_space<vmem>>, vector<1x8xf32>
    %32 = vector.broadcast %31 : vector<1x8xf32> to vector<160x8xf32>
    %33 = arith.addf %30, %32 : vector<160x8xf32>
    %cst_68 = arith.constant 0.000000e+00 : f32
    %34 = vector.broadcast %cst_68 : f32 to vector<160x8xf32>
    %35 = arith.maximumf %33, %34 : vector<160x8xf32>
    %36 = vector.shape_cast %35 : vector<160x8xf32> to vector<10x16x8xf32>
    %c0_69 = arith.constant 0 : index
    %c1_70 = arith.constant 1 : index
    %c0_71 = arith.constant 0 : index
    %37 = vector.load %arg11[%c0_69, %c1_70, %c0_71] : memref<10x18x8xf32, #tpu.memory_space<vmem>>, vector<10x16x8xf32>
    tpu.vector_store %arg11[%c0_69, %c1_70, %c0_71], %36 {strides = array<i32>} : memref<10x18x8xf32, #tpu.memory_space<vmem>>, vector<10x16x8xf32>,
    %cst_72 = arith.constant 0.000000e+00 : f32
    %38 = vector.broadcast %cst_72 : f32 to vector<10x1x8xf32>
    %c0_73 = arith.constant 0 : index
    %c0_74 = arith.constant 0 : index
    %c0_75 = arith.constant 0 : index
    %39 = vector.load %arg11[%c0_73, %c0_74, %c0_75] : memref<10x18x8xf32, #tpu.memory_space<vmem>>, vector<10x1x8xf32>
    tpu.vector_store %arg11[%c0_73, %c0_74, %c0_75], %38 {strides = array<i32>} : memref<10x18x8xf32, #tpu.memory_space<vmem>>, vector<10x1x8xf32>,
    %cst_76 = arith.constant 0.000000e+00 : f32
    %40 = vector.broadcast %cst_76 : f32 to vector<10x1x8xf32>
    %c0_77 = arith.constant 0 : index
    %c17 = arith.constant 17 : index
    %c0_78 = arith.constant 0 : index
    %41 = vector.load %arg11[%c0_77, %c17, %c0_78] : memref<10x18x8xf32, #tpu.memory_space<vmem>>, vector<10x1x8xf32>
    tpu.vector_store %arg11[%c0_77, %c17, %c0_78], %40 {strides = array<i32>} : memref<10x18x8xf32, #tpu.memory_space<vmem>>, vector<10x1x8xf32>,
    %c0_i32 = arith.constant 0 : i32
    %42 = arith.cmpi eq, %arg1, %c0_i32 : i32
    %43 = arith.extui %42 : i1 to i32
    %c0_i32_79 = arith.constant 0 : i32
    %44 = arith.cmpi ne, %43, %c0_i32_79 : i32
    scf.if %44 {
      %cst_154 = arith.constant 0.000000e+00 : f32
      %88 = vector.broadcast %cst_154 : f32 to vector<1x18x8xf32>
      %c0_155 = arith.constant 0 : index
      %c0_156 = arith.constant 0 : index
      %c0_157 = arith.constant 0 : index
      %89 = vector.load %arg11[%c0_155, %c0_156, %c0_157] : memref<10x18x8xf32, #tpu.memory_space<vmem>>, vector<1x18x8xf32>
      tpu.vector_store %arg11[%c0_155, %c0_156, %c0_157], %88 {strides = array<i32>} : memref<10x18x8xf32, #tpu.memory_space<vmem>>, vector<1x18x8xf32>,
    } else {
    }
    %c1_i32 = arith.constant 1 : i32
    %45 = arith.cmpi eq, %arg1, %c1_i32 : i32
    %46 = arith.extui %45 : i1 to i32
    %c0_i32_80 = arith.constant 0 : i32
    %47 = arith.cmpi ne, %46, %c0_i32_80 : i32
    scf.if %47 {
      %cst_154 = arith.constant 0.000000e+00 : f32
      %88 = vector.broadcast %cst_154 : f32 to vector<1x18x8xf32>
      %c9 = arith.constant 9 : index
      %c0_155 = arith.constant 0 : index
      %c0_156 = arith.constant 0 : index
      %89 = vector.load %arg11[%c9, %c0_155, %c0_156] : memref<10x18x8xf32, #tpu.memory_space<vmem>>, vector<1x18x8xf32>
      tpu.vector_store %arg11[%c9, %c0_155, %c0_156], %88 {strides = array<i32>} : memref<10x18x8xf32, #tpu.memory_space<vmem>>, vector<1x18x8xf32>,
    } else {
    }
    %c0_81 = arith.constant 0 : index
    %c0_82 = arith.constant 0 : index
    %c0_83 = arith.constant 0 : index
    %48 = vector.load %arg11[%c0_81, %c0_82, %c0_83] : memref<10x18x8xf32, #tpu.memory_space<vmem>>, vector<8x16x8xf32>
    %c0_84 = arith.constant 0 : index
    %c0_85 = arith.constant 0 : index
    %c0_86 = arith.constant 0 : index
    %49 = vector.load %arg12[%c0_84, %c0_85, %c0_86] : memref<8x16x72xf32, #tpu.memory_space<vmem>>, vector<8x16x8xf32>
    tpu.vector_store %arg12[%c0_84, %c0_85, %c0_86], %48 {strides = array<i32>} : memref<8x16x72xf32, #tpu.memory_space<vmem>>, vector<8x16x8xf32>,
    %c0_87 = arith.constant 0 : index
    %c1_88 = arith.constant 1 : index
    %c0_89 = arith.constant 0 : index
    %50 = vector.load %arg11[%c0_87, %c1_88, %c0_89] : memref<10x18x8xf32, #tpu.memory_space<vmem>>, vector<8x16x8xf32>
    %c0_90 = arith.constant 0 : index
    %c0_91 = arith.constant 0 : index
    %c8_92 = arith.constant 8 : index
    %51 = vector.load %arg12[%c0_90, %c0_91, %c8_92] : memref<8x16x72xf32, #tpu.memory_space<vmem>>, vector<8x16x8xf32>
    tpu.vector_store %arg12[%c0_90, %c0_91, %c8_92], %50 {strides = array<i32>} : memref<8x16x72xf32, #tpu.memory_space<vmem>>, vector<8x16x8xf32>,
    %c0_93 = arith.constant 0 : index
    %c2_94 = arith.constant 2 : index
    %c0_95 = arith.constant 0 : index
    %52 = vector.load %arg11[%c0_93, %c2_94, %c0_95] : memref<10x18x8xf32, #tpu.memory_space<vmem>>, vector<8x16x8xf32>
    %c0_96 = arith.constant 0 : index
    %c0_97 = arith.constant 0 : index
    %c16_98 = arith.constant 16 : index
    %53 = vector.load %arg12[%c0_96, %c0_97, %c16_98] : memref<8x16x72xf32, #tpu.memory_space<vmem>>, vector<8x16x8xf32>
    tpu.vector_store %arg12[%c0_96, %c0_97, %c16_98], %52 {strides = array<i32>} : memref<8x16x72xf32, #tpu.memory_space<vmem>>, vector<8x16x8xf32>,
    %c1_99 = arith.constant 1 : index
    %c0_100 = arith.constant 0 : index
    %c0_101 = arith.constant 0 : index
    %54 = vector.load %arg11[%c1_99, %c0_100, %c0_101] : memref<10x18x8xf32, #tpu.memory_space<vmem>>, vector<8x16x8xf32>
    %c0_102 = arith.constant 0 : index
    %c0_103 = arith.constant 0 : index
    %c24_104 = arith.constant 24 : index
    %55 = vector.load %arg12[%c0_102, %c0_103, %c24_104] : memref<8x16x72xf32, #tpu.memory_space<vmem>>, vector<8x16x8xf32>
    tpu.vector_store %arg12[%c0_102, %c0_103, %c24_104], %54 {strides = array<i32>} : memref<8x16x72xf32, #tpu.memory_space<vmem>>, vector<8x16x8xf32>,
    %c1_105 = arith.constant 1 : index
    %c1_106 = arith.constant 1 : index
    %c0_107 = arith.constant 0 : index
    %56 = vector.load %arg11[%c1_105, %c1_106, %c0_107] : memref<10x18x8xf32, #tpu.memory_space<vmem>>, vector<8x16x8xf32>
    %c0_108 = arith.constant 0 : index
    %c0_109 = arith.constant 0 : index
    %c32_110 = arith.constant 32 : index
    %57 = vector.load %arg12[%c0_108, %c0_109, %c32_110] : memref<8x16x72xf32, #tpu.memory_space<vmem>>, vector<8x16x8xf32>
    tpu.vector_store %arg12[%c0_108, %c0_109, %c32_110], %56 {strides = array<i32>} : memref<8x16x72xf32, #tpu.memory_space<vmem>>, vector<8x16x8xf32>,
    %c1_111 = arith.constant 1 : index
    %c2_112 = arith.constant 2 : index
    %c0_113 = arith.constant 0 : index
    %58 = vector.load %arg11[%c1_111, %c2_112, %c0_113] : memref<10x18x8xf32, #tpu.memory_space<vmem>>, vector<8x16x8xf32>
    %c0_114 = arith.constant 0 : index
    %c0_115 = arith.constant 0 : index
    %c40 = arith.constant 40 : index
    %59 = vector.load %arg12[%c0_114, %c0_115, %c40] : memref<8x16x72xf32, #tpu.memory_space<vmem>>, vector<8x16x8xf32>
    tpu.vector_store %arg12[%c0_114, %c0_115, %c40], %58 {strides = array<i32>} : memref<8x16x72xf32, #tpu.memory_space<vmem>>, vector<8x16x8xf32>,
    %c2_116 = arith.constant 2 : index
    %c0_117 = arith.constant 0 : index
    %c0_118 = arith.constant 0 : index
    %60 = vector.load %arg11[%c2_116, %c0_117, %c0_118] : memref<10x18x8xf32, #tpu.memory_space<vmem>>, vector<8x16x8xf32>
    %c0_119 = arith.constant 0 : index
    %c0_120 = arith.constant 0 : index
    %c48 = arith.constant 48 : index
    %61 = vector.load %arg12[%c0_119, %c0_120, %c48] : memref<8x16x72xf32, #tpu.memory_space<vmem>>, vector<8x16x8xf32>
    tpu.vector_store %arg12[%c0_119, %c0_120, %c48], %60 {strides = array<i32>} : memref<8x16x72xf32, #tpu.memory_space<vmem>>, vector<8x16x8xf32>,
    %c2_121 = arith.constant 2 : index
    %c1_122 = arith.constant 1 : index
    %c0_123 = arith.constant 0 : index
    %62 = vector.load %arg11[%c2_121, %c1_122, %c0_123] : memref<10x18x8xf32, #tpu.memory_space<vmem>>, vector<8x16x8xf32>
    %c0_124 = arith.constant 0 : index
    %c0_125 = arith.constant 0 : index
    %c56 = arith.constant 56 : index
    %63 = vector.load %arg12[%c0_124, %c0_125, %c56] : memref<8x16x72xf32, #tpu.memory_space<vmem>>, vector<8x16x8xf32>
    tpu.vector_store %arg12[%c0_124, %c0_125, %c56], %62 {strides = array<i32>} : memref<8x16x72xf32, #tpu.memory_space<vmem>>, vector<8x16x8xf32>,
    %c2_126 = arith.constant 2 : index
    %c2_127 = arith.constant 2 : index
    %c0_128 = arith.constant 0 : index
    %64 = vector.load %arg11[%c2_126, %c2_127, %c0_128] : memref<10x18x8xf32, #tpu.memory_space<vmem>>, vector<8x16x8xf32>
    %c0_129 = arith.constant 0 : index
    %c0_130 = arith.constant 0 : index
    %c64 = arith.constant 64 : index
    %65 = vector.load %arg12[%c0_129, %c0_130, %c64] : memref<8x16x72xf32, #tpu.memory_space<vmem>>, vector<8x16x8xf32>
    tpu.vector_store %arg12[%c0_129, %c0_130, %c64], %64 {strides = array<i32>} : memref<8x16x72xf32, #tpu.memory_space<vmem>>, vector<8x16x8xf32>,
    %c0_131 = arith.constant 0 : index
    %c0_132 = arith.constant 0 : index
    %c0_133 = arith.constant 0 : index
    %66 = vector.load %arg12[%c0_131, %c0_132, %c0_133] : memref<8x16x72xf32, #tpu.memory_space<vmem>>, vector<8x16x72xf32>
    %67 = vector.shape_cast %66 : vector<8x16x72xf32> to vector<128x72xf32>
    %c0_134 = arith.constant 0 : index
    %c0_135 = arith.constant 0 : index
    %68 = vector.load %arg5[%c0_134, %c0_135] : memref<72x8xf32, #tpu.memory_space<vmem>>, vector<72x8xf32>
    %cst_136 = arith.constant dense<0.000000e+00> : vector<128x8xf32>
    %69 = tpu.matmul %67, %68, %cst_136 {dimension_numbers = #tpu.dot_dimension_numbers<[1], [0], [0], [1], [0, 0, 1, 1], [], []>} : vector<128x72xf32>, vector<72x8xf32>, vector<128x8xf32> -> vector<128x8xf32>
    %c0_137 = arith.constant 0 : index
    %c0_138 = arith.constant 0 : index
    %70 = vector.load %arg6[%c0_137, %c0_138] : memref<1x8xf32, #tpu.memory_space<vmem>>, vector<1x8xf32>
    %71 = vector.broadcast %70 : vector<1x8xf32> to vector<128x8xf32>
    %72 = arith.addf %69, %71 : vector<128x8xf32>
    %c0_139 = arith.constant 0 : index
    %c0_140 = arith.constant 0 : index
    %c2_141 = arith.constant 2 : index
    %c1_142 = arith.constant 1 : index
    %c0_143 = arith.constant 0 : index
    %73 = vector.load %arg2[%c0_139, %c0_140, %c2_141, %c1_142, %c0_143] : memref<1x1x12x18x4xf32, #tpu.memory_space<vmem>>, vector<1x1x8x16x4xf32>
    %74 = vector.shape_cast %73 : vector<1x1x8x16x4xf32> to vector<8x16x4xf32>
    %75 = vector.shape_cast %74 : vector<8x16x4xf32> to vector<128x4xf32>
    %c0_144 = arith.constant 0 : index
    %c0_145 = arith.constant 0 : index
    %76 = vector.load %arg7[%c0_144, %c0_145] : memref<4x8xf32, #tpu.memory_space<vmem>>, vector<4x8xf32>
    %cst_146 = arith.constant dense<0.000000e+00> : vector<128x8xf32>
    %77 = tpu.matmul %75, %76, %cst_146 {dimension_numbers = #tpu.dot_dimension_numbers<[1], [0], [0], [1], [0, 0, 1, 1], [], []>} : vector<128x4xf32>, vector<4x8xf32>, vector<128x8xf32> -> vector<128x8xf32>
    %c0_147 = arith.constant 0 : index
    %c0_148 = arith.constant 0 : index
    %78 = vector.load %arg8[%c0_147, %c0_148] : memref<1x8xf32, #tpu.memory_space<vmem>>, vector<1x8xf32>
    %79 = vector.broadcast %78 : vector<1x8xf32> to vector<128x8xf32>
    %80 = arith.addf %77, %79 : vector<128x8xf32>
    %81 = arith.addf %72, %80 : vector<128x8xf32>
    %cst_149 = arith.constant 0.000000e+00 : f32
    %82 = vector.broadcast %cst_149 : f32 to vector<128x8xf32>
    %83 = arith.maximumf %81, %82 : vector<128x8xf32>
    %84 = vector.shape_cast %83 : vector<128x8xf32> to vector<8x16x8xf32>
    %c0_150 = arith.constant 0 : index
    %c0_151 = arith.constant 0 : index
    %c0_152 = arith.constant 0 : index
    %c0_153 = arith.constant 0 : index
    %85 = vector.load %arg9[%c0_150, %c0_151, %c0_152, %c0_153] : memref<1x8x16x8xf32, #tpu.memory_space<vmem>>, vector<1x8x16x8xf32>
    %86 = vector.shape_cast %85 : vector<1x8x16x8xf32> to vector<8x16x8xf32>
    %87 = vector.shape_cast %84 : vector<8x16x8xf32> to vector<1x8x16x8xf32>
    tpu.vector_store %arg9[%c0_150, %c0_151, %c0_152, %c0_153], %87 {strides = array<i32>} : memref<1x8x16x8xf32, #tpu.memory_space<vmem>>, vector<1x8x16x8xf32>,
    return
  }
  func.func @transform_0(%arg0: i32, %arg1: i32) -> (i32, i32, i32, i32, i32) {
    %c0_i32 = arith.constant 0 : i32
    %c0_i32_0 = arith.constant 0 : i32
    %c0_i32_1 = arith.constant 0 : i32
    %c0_i32_2 = arith.constant 0 : i32
    return %arg0, %arg1, %c0_i32, %c0_i32_0, %c0_i32_1 : i32, i32, i32, i32, i32
  }
  func.func @transform_1(%arg0: i32, %arg1: i32) -> (i32, i32) {
    %c0_i32 = arith.constant 0 : i32
    %c0_i32_0 = arith.constant 0 : i32
    %c0_i32_1 = arith.constant 0 : i32
    return %c0_i32, %c0_i32_0 : i32, i32
  }
  func.func @transform_2(%arg0: i32, %arg1: i32) -> (i32, i32) {
    %c0_i32 = arith.constant 0 : i32
    %c0_i32_0 = arith.constant 0 : i32
    %c0_i32_1 = arith.constant 0 : i32
    return %c0_i32, %c0_i32_0 : i32, i32
  }
  func.func @transform_3(%arg0: i32, %arg1: i32) -> (i32, i32) {
    %c0_i32 = arith.constant 0 : i32
    %c0_i32_0 = arith.constant 0 : i32
    %c0_i32_1 = arith.constant 0 : i32
    return %c0_i32, %c0_i32_0 : i32, i32
  }
  func.func @transform_4(%arg0: i32, %arg1: i32) -> (i32, i32) {
    %c0_i32 = arith.constant 0 : i32
    %c0_i32_0 = arith.constant 0 : i32
    %c0_i32_1 = arith.constant 0 : i32
    return %c0_i32, %c0_i32_0 : i32, i32
  }
  func.func @transform_5(%arg0: i32, %arg1: i32) -> (i32, i32) {
    %c0_i32 = arith.constant 0 : i32
    %c0_i32_0 = arith.constant 0 : i32
    %c0_i32_1 = arith.constant 0 : i32
    return %c0_i32, %c0_i32_0 : i32, i32
  }
  func.func @transform_6(%arg0: i32, %arg1: i32) -> (i32, i32) {
    %c0_i32 = arith.constant 0 : i32
    %c0_i32_0 = arith.constant 0 : i32
    %c0_i32_1 = arith.constant 0 : i32
    return %c0_i32, %c0_i32_0 : i32, i32
  }
  func.func @transform_7(%arg0: i32, %arg1: i32) -> (i32, i32, i32, i32) {
    %c0_i32 = arith.constant 0 : i32
    %c0_i32_0 = arith.constant 0 : i32
    %c0_i32_1 = arith.constant 0 : i32
    return %arg0, %arg1, %c0_i32, %c0_i32_0 : i32, i32, i32, i32
  }
}

</mosaic_0001>

<bundles_post_ra>
// kernel: tpu_custom_call.1
= control target key start
LH: loop header
LB: loop body
LE: loop exit
PB: predicated region body
PF: predicated region fallthrough
CT: control target
= control target key end

     0   :  { %s3689_s24 = smov 0   ;;  %s3691_s25 = smov 0   ;;  %s4870_s0 = inlined_call_operand.vmem [shape: f32[2,2,12,18,4], index: 0, kind: input, shape index: {}]   ;;  %s4871_s1 = inlined_call_operand.vmem [shape: f32[36,8], index: 1, kind: input, shape index: {}]   ;;  %s4872_s2 = inlined_call_operand.vmem [shape: f32[1,8], index: 2, kind: input, shape index: {}]   ;;  %s4873_s3 = inlined_call_operand.vmem [shape: f32[72,8], index: 3, kind: input, shape index: {}]   ;;  %s4874_s4 = inlined_call_operand.vmem [shape: f32[1,8], index: 4, kind: input, shape index: {}]   ;;  %s4875_s5 = inlined_call_operand.vmem [shape: f32[4,8], index: 5, kind: input, shape index: {}]   ;;  %s4876_s6 = inlined_call_operand.vmem [shape: f32[1,8], index: 6, kind: input, shape index: {}]   ;;  %s4877_s7 = inlined_call_operand.vmem [shape: f32[2,16,16,8], index: 7, kind: output, shape index: {}]  }
   0x1   :  { %s3693_s26 = smov 0   ;;  %s3695_s27 = smov 0  }
   0x2   :  { %s3697_s28 = smov 0  }
   0x3 LB: > { %s26_s29 = sadd.s32 1, %s3624_s26  ;;  %s29_s30 = sadd.s32 1, %s3628_s27  ;;  %s3632_s28 = sphi %s3697_s28, %s17_s28   ;;  %s3628_s27 = sphi %s3695_s27, %s4881_s27   ;;  %s3624_s26 = sphi %s3693_s26, %s4880_s26   ;;  %s3620_s25 = sphi %s3691_s25, %s4879_s25   ;;  %s3616_s24 = sphi %s3689_s24, %s4878_s24  }
   0x4   : > { %p27_p0 = scmp.ge.s32.totalorder %s26_s29, 2  ;;  %p3077_p1 = scmp.ge.s32.totalorder %s3632_s28, 1 }
   0x5   : > { %p257_p2 = scmp.lt.s32.totalorder %s3632_s28, 5 }
   0x6   : > { %s4883_s29 = smov (%p27_p0, %s26_s29), 0  ;;  %s4885_s30 = smov (!%p27_p0, %s29_s30), %s3628_s27 }
   0x7   : > { %p258_p3 = pnand %p3077_p1, %p257_p2  ;;  %p31_p4 = scmp.ge.s32.totalorder %s4885_s30, 2 }
   0x8   : > { %p298_p5 = scmp.lt.s32.totalorder (!%p258_p3), %s3620_s25, 1  ;;  %p300_p6 = scmp.lt.s32.totalorder (!%p258_p3), %s3616_s24, 1  ;;  %vm338_vm0 = vcmask (!%p258_p3), 31744   ;;  %v1349_v22 = vld [vmem:[%s4871_s1] sm:$0xff] (!%p258_p3)  ;;  %v1350_v23 = vld [vmem:[%s4871_s1 + $0x8] sm:$0xff] (!%p258_p3)  ;;  %v1351_v26 = vld [vmem:[%s4871_s1 + $0x10] sm:$0xff] (!%p258_p3) }
   0x9   : > { %s4887_s30 = smov (%p31_p4, %s4885_s30), 0  ;;  %261 = sbr.rel (%p258_p3) target bundleno = 1293 (0x50d), region = 48 }
   0xa   : > { %s3079_s8 = sshll.u32 (!%p258_p3), %s3616_s24, 3  ;;  %v3455_v25 = vpack.c.bf16 (!%p258_p3), %v1350_v23, %v1349_v22  ;;  %s3640_s17 = smov (!%p258_p3), 28   ;;  %v1352_v27 = vld [vmem:[%s4871_s1 + $0x18] sm:$0xff] (!%p258_p3)  ;;  %v1353_v31 = vld [vmem:[%s4871_s1 + $0x20] sm:$0xf] (!%p258_p3)  ;;  %vm1422_vm1 = vcmask (!%p258_p3), 1043456  }
   0xb   : > { %p310_p7 = scmp.lt.s32.totalorder (!%p258_p3), %s3079_s8, 15  ;;  %v3459_v28 = vpack.c.bf16 (!%p258_p3), %v1352_v27, %v1351_v26  ;;  %vm459_vm2 = vcmask (!%p258_p3), 64544   ;;  %vm580_vm3 = vcmask (!%p258_p3), 97344   ;;  %vm702_vm4 = vcmask (!%p258_p3), 130144   ;;  %p3225_p8 = scmp.ne.s32.totalorder (!%p258_p3), %s3616_s24, 0 }
   0xc   : > { %3456 = vmatprep.subr.bf16.mxu0 (!%p258_p3), %v3455_v25  ;;  %vm823_vm5 = vcmask (!%p258_p3), 162944   ;;  %vm944_vm6 = vcmask (!%p258_p3), 195744   ;;  %vm1066_vm7 = vcmask (!%p258_p3), 228544   ;;  %vm1187_vm8 = vcmask (!%p258_p3), 261344  }
   0xd   : > { %3458 = vmatpush3.bf16.msra.mxu0 (!%p258_p3), %v3455_v25  ;;  %vm1308_vm9 = vcmask (!%p258_p3), 294144   ;;  %vm1361_vm10 = vcmask (!%p258_p3), 293888   ;;  %vm1611_vm11 = vcmask (!%p258_p3), 64512   ;;  %vm1632_vm12 = vcmask (!%p258_p3), 57344  }
   0xe   : > { %3460 = vmatprep.subr.bf16.mxu0 (!%p258_p3), %v3459_v28 }
  0x10   : > { %s4889_s25 = smov (!%p298_p5, %s3620_s25), 1  ;;  %s4891_s8 = smov (!%p310_p7, %s3079_s8), 15 }
  0x11   : > { %s301_s9 = scalar_select %p300_p6, %s3616_s24, 1  ;;  %3462 = vmatpush3.bf16.msra.mxu0 %v3459_v28 }
  0x12   : > { %s3538_s10 = smul.u32 72, %s4889_s25  ;;  %s3081_s12 = sshll.u32 %s4889_s25, 5  ;;  %3355 = vmatprep.subr.msk.mxu0 %vm1422_vm1, %v1353_v31  ;;  %vm1659_vm13 = vcmask (!%p3225_p8), 58368  }
  0x13   : > { %s3537_s11 = smul.u32 36, %s301_s9  ;;  %s3080_s15 = sshll.u32 %s4891_s8, 1 }
  0x14   : > { %s314_s19 = sadd.s32 %s3081_s12, %s3080_s15  ;;  %s3634_s25 = smov 8  }
  0x15   : > { %s304_s13 = sadd.s32 %s3538_s10, %s3537_s11  ;;  %s3082_s20 = sshll.u32 %s314_s19, 3  ;;  %3356 = vmatpush3.msk.msra.mxu0 %vm1422_vm1, %v1353_v31 }
  0x16   : > { %s3078_s14 = sshll.u32 %s304_s13, 3  ;;  %s3734_s23 = scalar_lea.vmem %s4877_s7, %s3082_s20 }
  0x17   : > { %s3727_s18 = scalar_lea.vmem %s4870_s0, %s3078_s14  ;;  %s3635_s8 = smov 4  }
  0x18   : > { %v480_v0 = vld [vmem:[%s3727_s18 + $0x2] sm:$0xff]  ;;  %v481_v3 = vld [vmem:[%s3727_s18 + $0xa] sm:$0xff]  ;;  %v3083_v5 = vld [vmem:[%s3727_s18 + $0x18] sm:$0xff]  ;;  %s3636_s9 = smov 12   ;;  %s3637_s10 = smov 16  }
  0x19   : > { %v359_v1 = vld [vmem:[%s3727_s18 + $0x1] sm:$0xff]  ;;  %520 = vrot.lane.b32.xlu1 %v480_v0, %s3634_s25  ;;  %v360_v4 = vld [vmem:[%s3727_s18 + $0x9] sm:$0xff]  ;;  %341 = vst.msk [vmem:[#allocation2 + $0x10] sm:$0xff] %vm338_vm0, %v3083_v5  ;;  %v3144_v7 = vld [vmem:[%s3727_s18 + $0x38] sm:$0xff]  ;;  %s3638_s11 = smov 20   ;;  %s3639_s12 = smov 24  }
  0x1a   : > { %399 = vrot.lane.b32.xlu0 %v359_v1, %s3635_s8  ;;  %v3084_v2 = vld [vmem:[%s3727_s18 + $0x20] sm:$0xff]  ;;  %v3143_v6 = vld [vmem:[%s3727_s18 + $0x30] sm:$0xff]  ;;  %344 = vst.msk [vmem:[#allocation2 + $0x28] sm:$0xff] %vm338_vm0, %v3144_v7  ;;  %v3751_v8 = vld [vmem:[%s3727_s18 + $0x48] sm:$0xff]  ;;  %s3641_s13 = smov 32  }
  0x1b   : > { %342 = vst.msk [vmem:[#allocation2 + $0x18] sm:$0xff] %vm338_vm0, %v3084_v2  ;;  %343 = vst.msk [vmem:[#allocation2 + $0x20] sm:$0xff] %vm338_vm0, %v3143_v6  ;;  %v3754_v9 = vld [vmem:[%s3727_s18 + $0x50] sm:$0xff]  ;;  %v3761_v10 = vld [vmem:[%s3727_s18 + $0x60] sm:$0xff] }
  0x1c   : > { %345 = vst.msk [vmem:[#allocation2 + $0x30] sm:$0xff] %vm338_vm0, %v3751_v8  ;;  %346 = vst.msk [vmem:[#allocation2 + $0x38] sm:$0xff] %vm338_vm0, %v3754_v9  ;;  %v3764_v11 = vld [vmem:[%s3727_s18 + $0x68] sm:$0xff]  ;;  %v361_v12 = vld [vmem:[%s3727_s18 + $0x19] sm:$0xff] }
  0x1d   : > { %522 = vrot.lane.b32.xlu1 %v481_v3, %s3634_s25  ;;  %347 = vst.msk [vmem:[#allocation2 + $0x40] sm:$0xff] %vm338_vm0, %v3761_v10  ;;  %348 = vst.msk [vmem:[#allocation2 + $0x48] sm:$0xff] %vm338_vm0, %v3764_v11  ;;  %v318_v13 = vld [vmem:[%s3727_s18] sm:$0xff]  ;;  %v319_v14 = vld [vmem:[%s3727_s18 + $0x8] sm:$0xff] }
  0x1e   : > { %401 = vrot.lane.b32.xlu0 %v360_v4, %s3635_s8  ;;  %339 = vst.msk [vmem:[#allocation2] sm:$0xff] %vm338_vm0, %v318_v13  ;;  %340 = vst.msk [vmem:[#allocation2 + $0x8] sm:$0xff] %vm338_vm0, %v319_v14  ;;  %v3778_v15 = vld [vmem:[%s3727_s18 + $0x78] sm:$0xff]  ;;  %v3781_v16 = vld [vmem:[%s3727_s18 + $0x80] sm:$0xff] }
  0x1f   : > { %349 = vst.msk [vmem:[#allocation2 + $0x50] sm:$0xff] %vm338_vm0, %v3778_v15  ;;  %350 = vst.msk [vmem:[#allocation2 + $0x58] sm:$0xff] %vm338_vm0, %v3781_v16  ;;  %v3123_v17 = vld [vmem:[%s3727_s18 + $0x1a] sm:$0xff]  ;;  %v3124_v19 = vld [vmem:[%s3727_s18 + $0x22] sm:$0xff] }
  0x20   : > { %v3104_v18 = vld [vmem:[%s3727_s18 + $0x21] sm:$0xff]  ;;  %v3797_v20 = vld [vmem:[%s3727_s18 + $0x90] sm:$0xff]  ;;  %v3813_v24 = vld [vmem:[%s3727_s18 + $0x98] sm:$0xff] }
  0x21   : > { %644 = vrot.lane.b32.xlu1 %v3084_v2, %s3636_s9  ;;  %351 = vst.msk [vmem:[#allocation2 + $0x60] sm:$0xff] %vm338_vm0, %v3797_v20  ;;  %v3163_v21 = vld [vmem:[%s3727_s18 + $0x31] sm:$0xff]  ;;  %352 = vst.msk [vmem:[#allocation2 + $0x68] sm:$0xff] %vm338_vm0, %v3813_v24  ;;  %v3164_v30 = vld [vmem:[%s3727_s18 + $0x39] sm:$0xff] }
  0x22   : > { %642 = vrot.lane.b32.xlu0 %v3083_v5, %s3636_s9  ;;  %v3183_v29 = vld [vmem:[%s3727_s18 + $0x32] sm:$0xff]  ;;  %v3184_v32 = vld [vmem:[%s3727_s18 + $0x3a] sm:$0xff]  ;;  %v3844_v33 = vld [vmem:[%s3727_s18 + $0xa8] sm:$0xff] }
  0x23   : > { %353 = vst.msk [vmem:[#allocation2 + $0x70] sm:$0xff] %vm338_vm0, %v3844_v33  ;;  %v3165_v34 = vld [vmem:[%s3727_s18 + $0x49] sm:$0xff]  ;;  %v3166_v37 = vld [vmem:[%s3727_s18 + $0x51] sm:$0xff]  ;;  %v3878_v39 = vld [vmem:[%s3727_s18 + $0xc0] sm:$0xff] }
  0x24   : > { %v3856_v35 = vld [vmem:[%s3727_s18 + $0xb0] sm:$0xff]  ;;  %355 = vst.msk [vmem:[#allocation2 + $0x80] sm:$0xff] %vm338_vm0, %v3878_v39  ;;  %v3167_v40 = vld [vmem:[%s3727_s18 + $0x61] sm:$0xff]  ;;  %v3915_v49 = vld [vmem:[%s3727_s18 + $0xd8] sm:$0xff] }
  0x25   : > { %403 = vrot.lane.b32.xlu1 %v361_v12, %s3635_s8  ;;  %354 = vst.msk [vmem:[#allocation2 + $0x78] sm:$0xff] %vm338_vm0, %v3856_v35  ;;  %v3185_v36 = vld [vmem:[%s3727_s18 + $0x4a] sm:$0xff]  ;;  %v3186_v38 = vld [vmem:[%s3727_s18 + $0x52] sm:$0xff]  ;;  %v3187_v42 = vld [vmem:[%s3727_s18 + $0x62] sm:$0xff] }
  0x26   : > { %763 = vrot.lane.b32.xlu0 %v361_v12, %s3637_s10  ;;  %v3890_v41 = vld [vmem:[%s3727_s18 + $0xc8] sm:$0xff]  ;;  %357 = vst.msk [vmem:[#allocation2 + $0x90] sm:$0xff] %vm338_vm0, %v3915_v49  ;;  %v3169_v52 = vld [vmem:[%s3727_s18 + $0x79] sm:$0xff] }
  0x27   : > { %356 = vst.msk [vmem:[#allocation2 + $0x88] sm:$0xff] %vm338_vm0, %v3890_v41  ;;  %v3168_v43 = vld [vmem:[%s3727_s18 + $0x69] sm:$0xff]  ;;  %v3932_v55 = vld [vmem:[%s3727_s18 + $0xe0] sm:$0xff] }
  0x28   : > { %v3188_v44 = vld [vmem:[%s3727_s18 + $0x6a] sm:$0xff]  ;;  %358 = vst.msk [vmem:[#allocation2 + $0x98] sm:$0xff] %vm338_vm0, %v3932_v55  ;;  %v3189_v58 = vld [vmem:[%s3727_s18 + $0x7a] sm:$0xff]  ;;  %v3190_v0 = vld [vmem:[%s3727_s18 + $0x82] sm:$0xff] }
  0x29   : > { %884 = vrot.lane.b32.xlu1 %v3123_v17, %s3638_s11  ;;  %v3170_v59 = vld [vmem:[%s3727_s18 + $0x81] sm:$0xff]  ;;  %v3173_v31 = vld [vmem:[%s3727_s18 + $0xa9] sm:$0xff] }
  0x2a   : > { %765 = vrot.lane.b32.xlu0 %v3104_v18, %s3637_s10  ;;  %v3192_v22 = vld [vmem:[%s3727_s18 + $0x9a] sm:$0xff] }
  0x2d   : > { %524 = vrot.lane.b32.xlu1 %v3123_v17, %s3634_s25 }
  0x2e   : > { %405 = vrot.lane.b32.xlu0 %v3104_v18, %s3635_s8 }
  0x31   : > { %1006 = vrot.lane.b32.xlu1 %v3143_v6, %s3639_s12 }
  0x32   : > { %886 = vrot.lane.b32.xlu0 %v3124_v19, %s3638_s11 }
  0x35   : > { %646 = vrot.lane.b32.xlu1 %v3143_v6, %s3636_s9 }
  0x36   : > { %526 = vrot.lane.b32.xlu0 %v3124_v19, %s3634_s25 }
  0x39   : > { %1127 = vrot.lane.b32.xlu1 %v3163_v21, %s3640_s17 }
  0x3a   : > { %1008 = vrot.lane.b32.xlu0 %v3144_v7, %s3639_s12 }
  0x3d   : > { %767 = vrot.lane.b32.xlu1 %v3163_v21, %s3637_s10 }
  0x3e   : > { %648 = vrot.lane.b32.xlu0 %v3144_v7, %s3636_s9 }
  0x41   : > { %1248 = vrot.lane.b32.xlu1 %v3183_v29, %s3641_s13 }
  0x42   : > { %1129 = vrot.lane.b32.xlu0 %v3164_v30, %s3640_s17 }
  0x45   : > { %769 = vrot.lane.b32.xlu1 %v3164_v30, %s3637_s10 }
  0x46   : > { %407 = vrot.lane.b32.xlu0 %v3163_v21, %s3635_s8 }
  0x49   : > { %1250 = vrot.lane.b32.xlu1 %v3184_v32, %s3641_s13 }
  0x4a   : > { %888 = vrot.lane.b32.xlu0 %v3183_v29, %s3638_s11 }
  0x4d   : > { %528 = vrot.lane.b32.xlu1 %v3183_v29, %s3634_s25 }
  0x4e   : > { %409 = vrot.lane.b32.xlu0 %v3164_v30, %s3635_s8 }
  0x51   : > { %1010 = vrot.lane.b32.xlu1 %v3751_v8, %s3639_s12 }
  0x52   : > { %890 = vrot.lane.b32.xlu0 %v3184_v32, %s3638_s11 }
  0x55   : > { %650 = vrot.lane.b32.xlu1 %v3751_v8, %s3636_s9 }
  0x56   : > { %530 = vrot.lane.b32.xlu0 %v3184_v32, %s3634_s25 }
  0x59   : > { %1131 = vrot.lane.b32.xlu1 %v3165_v34, %s3640_s17 }
  0x5a   : > { %1012 = vrot.lane.b32.xlu0 %v3754_v9, %s3639_s12 }
  0x5d   : > { %771 = vrot.lane.b32.xlu1 %v3165_v34, %s3637_s10 }
  0x5e   : > { %652 = vrot.lane.b32.xlu0 %v3754_v9, %s3636_s9  ;;  %v3171_v9 = vld [vmem:[%s3727_s18 + $0x91] sm:$0xff] }
  0x61   : > { %1252 = vrot.lane.b32.xlu1 %v3185_v36, %s3641_s13 }
  0x62   : > { %1133 = vrot.lane.b32.xlu0 %v3166_v37, %s3640_s17 }
  0x65   : > { %773 = vrot.lane.b32.xlu1 %v3166_v37, %s3637_s10 }
  0x66   : > { %411 = vrot.lane.b32.xlu0 %v3165_v34, %s3635_s8 }
  0x69   : > { %1254 = vrot.lane.b32.xlu1 %v3186_v38, %s3641_s13 }
  0x6a   : > { %892 = vrot.lane.b32.xlu0 %v3185_v36, %s3638_s11 }
  0x6d   : > { %532 = vrot.lane.b32.xlu1 %v3185_v36, %s3634_s25 }
  0x6e   : > { %413 = vrot.lane.b32.xlu0 %v3166_v37, %s3635_s8 }
  0x71   : > { %1014 = vrot.lane.b32.xlu1 %v3761_v10, %s3639_s12 }
  0x72   : > { %894 = vrot.lane.b32.xlu0 %v3186_v38, %s3638_s11 }
  0x75   : > { %654 = vrot.lane.b32.xlu1 %v3761_v10, %s3636_s9 }
  0x76   : > { %534 = vrot.lane.b32.xlu0 %v3186_v38, %s3634_s25 }
  0x79   : > { %1135 = vrot.lane.b32.xlu1 %v3167_v40, %s3640_s17 }
  0x7a   : > { %1016 = vrot.lane.b32.xlu0 %v3764_v11, %s3639_s12 }
  0x7d   : > { %775 = vrot.lane.b32.xlu1 %v3167_v40, %s3637_s10 }
  0x7e   : > { %656 = vrot.lane.b32.xlu0 %v3764_v11, %s3636_s9 }
  0x81   : > { %1256 = vrot.lane.b32.xlu1 %v3187_v42, %s3641_s13 }
  0x82   : > { %1137 = vrot.lane.b32.xlu0 %v3168_v43, %s3640_s17 }
  0x85   : > { %777 = vrot.lane.b32.xlu1 %v3168_v43, %s3637_s10 }
  0x86   : > { %415 = vrot.lane.b32.xlu0 %v3167_v40, %s3635_s8  ;;  %v3174_v40 = vld [vmem:[%s3727_s18 + $0xb1] sm:$0xff] }
  0x89   : > { %1258 = vrot.lane.b32.xlu1 %v3188_v44, %s3641_s13 }
  0x8a   : > { %896 = vrot.lane.b32.xlu0 %v3187_v42, %s3638_s11 }
  0x8b   : > { %v521_v45 = vpop.permute.xlu1 %520 }
  0x8c   : > { %v400_v46 = vpop.permute.xlu0 %399 }
  0x8d   : > { %460 = vst.msk [vmem:[#allocation2] sm:$0xff] %vm459_vm2, %v400_v46  ;;  %536 = vrot.lane.b32.xlu1 %v3187_v42, %s3634_s25 }
  0x8e   : > { %417 = vrot.lane.b32.xlu0 %v3168_v43, %s3635_s8  ;;  %581 = vst.msk [vmem:[#allocation2] sm:$0xff] %vm580_vm3, %v521_v45 }
  0x8f   : > { %v523_v47 = vpop.permute.xlu1 %522 }
  0x90   : > { %v402_v48 = vpop.permute.xlu0 %401 }
  0x91   : > { %461 = vst.msk [vmem:[#allocation2 + $0x8] sm:$0xff] %vm459_vm2, %v402_v48  ;;  %1018 = vrot.lane.b32.xlu1 %v3778_v15, %s3639_s12 }
  0x92   : > { %898 = vrot.lane.b32.xlu0 %v3188_v44, %s3638_s11  ;;  %582 = vst.msk [vmem:[#allocation2 + $0x8] sm:$0xff] %vm580_vm3, %v523_v47 }
  0x93   : > { %v645_v50 = vpop.permute.xlu1 %644 }
  0x94   : > { %v643_v51 = vpop.permute.xlu0 %642  ;;  %704 = vst.msk [vmem:[#allocation2 + $0x8] sm:$0xff] %vm702_vm4, %v645_v50 }
  0x95   : > { %703 = vst.msk [vmem:[#allocation2] sm:$0xff] %vm702_vm4, %v643_v51  ;;  %658 = vrot.lane.b32.xlu1 %v3778_v15, %s3636_s9  ;;  %v3191_v15 = vld [vmem:[%s3727_s18 + $0x92] sm:$0xff] }
  0x96   : > { %538 = vrot.lane.b32.xlu0 %v3188_v44, %s3634_s25 }
  0x97   : > { %v404_v53 = vpop.permute.xlu1 %403 }
  0x98   : > { %v764_v54 = vpop.permute.xlu0 %763  ;;  %462 = vst.msk [vmem:[#allocation2 + $0x10] sm:$0xff] %vm459_vm2, %v404_v53 }
  0x99   : > { %824 = vst.msk [vmem:[#allocation2] sm:$0xff] %vm823_vm5, %v764_v54  ;;  %1139 = vrot.lane.b32.xlu1 %v3169_v52, %s3640_s17 }
  0x9a   : > { %1020 = vrot.lane.b32.xlu0 %v3781_v16, %s3639_s12 }
  0x9b   : > { %v885_v56 = vpop.permute.xlu1 %884 }
  0x9c   : > { %v766_v57 = vpop.permute.xlu0 %765  ;;  %945 = vst.msk [vmem:[#allocation2] sm:$0xff] %vm944_vm6, %v885_v56 }
  0x9d   : > { %825 = vst.msk [vmem:[#allocation2 + $0x8] sm:$0xff] %vm823_vm5, %v766_v57  ;;  %779 = vrot.lane.b32.xlu1 %v3169_v52, %s3637_s10  ;;  %v3175_v57 = vld [vmem:[%s3727_s18 + $0xc1] sm:$0xff] }
  0x9e   : > { %660 = vrot.lane.b32.xlu0 %v3781_v16, %s3636_s9  ;;  %v3172_v16 = vld [vmem:[%s3727_s18 + $0x99] sm:$0xff] }
  0x9f   : > { %v525_v60 = vpop.permute.xlu1 %524 }
  0xa0   : > { %v406_v61 = vpop.permute.xlu0 %405  ;;  %583 = vst.msk [vmem:[#allocation2 + $0x10] sm:$0xff] %vm580_vm3, %v525_v60 }
  0xa1   : > { %463 = vst.msk [vmem:[#allocation2 + $0x18] sm:$0xff] %vm459_vm2, %v406_v61  ;;  %1260 = vrot.lane.b32.xlu1 %v3189_v58, %s3641_s13 }
  0xa2   : > { %1141 = vrot.lane.b32.xlu0 %v3170_v59, %s3640_s17 }
  0xa3   : > { %v1007_v62 = vpop.permute.xlu1 %1006 }
  0xa4   : > { %v887_v63 = vpop.permute.xlu0 %886  ;;  %1067 = vst.msk [vmem:[#allocation2] sm:$0xff] %vm1066_vm7, %v1007_v62 }
  0xa5   : > { %946 = vst.msk [vmem:[#allocation2 + $0x8] sm:$0xff] %vm944_vm6, %v887_v63  ;;  %781 = vrot.lane.b32.xlu1 %v3170_v59, %s3637_s10  ;;  %v3176_v63 = vld [vmem:[%s3727_s18 + $0xc9] sm:$0xff] }
  0xa6   : > { %419 = vrot.lane.b32.xlu0 %v3169_v52, %s3635_s8 }
  0xa7   : > { %v647_v1 = vpop.permute.xlu1 %646 }
  0xa8   : > { %v527_v2 = vpop.permute.xlu0 %526  ;;  %705 = vst.msk [vmem:[#allocation2 + $0x10] sm:$0xff] %vm702_vm4, %v647_v1 }
  0xa9   : > { %584 = vst.msk [vmem:[#allocation2 + $0x18] sm:$0xff] %vm580_vm3, %v527_v2  ;;  %1262 = vrot.lane.b32.xlu1 %v3190_v0, %s3641_s13 }
  0xaa   : > { %900 = vrot.lane.b32.xlu0 %v3189_v58, %s3638_s11 }
  0xab   : > { %v1128_v3 = vpop.permute.xlu1 %1127 }
  0xac   : > { %v1009_v4 = vpop.permute.xlu0 %1008  ;;  %1188 = vst.msk [vmem:[#allocation2] sm:$0xff] %vm1187_vm8, %v1128_v3 }
  0xad   : > { %1068 = vst.msk [vmem:[#allocation2 + $0x8] sm:$0xff] %vm1066_vm7, %v1009_v4  ;;  %540 = vrot.lane.b32.xlu1 %v3189_v58, %s3634_s25 }
  0xae   : > { %421 = vrot.lane.b32.xlu0 %v3170_v59, %s3635_s8 }
  0xaf   : > { %v768_v5 = vpop.permute.xlu1 %767 }
  0xb0   : > { %v649_v6 = vpop.permute.xlu0 %648  ;;  %826 = vst.msk [vmem:[#allocation2 + $0x10] sm:$0xff] %vm823_vm5, %v768_v5 }
  0xb1   : > { %706 = vst.msk [vmem:[#allocation2 + $0x18] sm:$0xff] %vm702_vm4, %v649_v6  ;;  %1022 = vrot.lane.b32.xlu1 %v3797_v20, %s3639_s12 }
  0xb2   : > { %902 = vrot.lane.b32.xlu0 %v3190_v0, %s3638_s11 }
  0xb3   : > { %v1249_v7 = vpop.permute.xlu1 %1248 }
  0xb4   : > { %v1130_v8 = vpop.permute.xlu0 %1129  ;;  %1309 = vst.msk [vmem:[#allocation2] sm:$0xff] %vm1308_vm9, %v1249_v7 }
  0xb5   : > { %1189 = vst.msk [vmem:[#allocation2 + $0x8] sm:$0xff] %vm1187_vm8, %v1130_v8  ;;  %662 = vrot.lane.b32.xlu1 %v3797_v20, %s3636_s9 }
  0xb6   : > { %542 = vrot.lane.b32.xlu0 %v3190_v0, %s3634_s25 }
  0xb7   : > { %v770_v10 = vpop.permute.xlu1 %769 }
  0xb8   : > { %v408_v11 = vpop.permute.xlu0 %407  ;;  %827 = vst.msk [vmem:[#allocation2 + $0x18] sm:$0xff] %vm823_vm5, %v770_v10 }
  0xb9   : > { %464 = vst.msk [vmem:[#allocation2 + $0x20] sm:$0xff] %vm459_vm2, %v408_v11  ;;  %1143 = vrot.lane.b32.xlu1 %v3171_v9, %s3640_s17 }
  0xba   : > { %1024 = vrot.lane.b32.xlu0 %v3813_v24, %s3639_s12 }
  0xbb   : > { %v1251_v12 = vpop.permute.xlu1 %1250  ;;  %v1329_v14 = vld [vmem:[#allocation2] sm:$0xff] }
  0xbc   : > { %v889_v13 = vpop.permute.xlu0 %888  ;;  %1310 = vst.msk [vmem:[#allocation2 + $0x8] sm:$0xff] %vm1308_vm9, %v1251_v12  ;;  %3357 = vmatprep.mubr.msk.f32.mxu0 %vm1361_vm10, %v1329_v14 }
  0xbd   : > { %947 = vst.msk [vmem:[#allocation2 + $0x10] sm:$0xff] %vm944_vm6, %v889_v13  ;;  %783 = vrot.lane.b32.xlu1 %v3171_v9, %s3637_s10  ;;  %v3177_v13 = vld [vmem:[%s3727_s18 + $0xd9] sm:$0xff] }
  0xbe   : > { %664 = vrot.lane.b32.xlu0 %v3813_v24, %s3636_s9 }
  0xbf   : > { %v529_v17 = vpop.permute.xlu1 %528 }
  0xc0   : > { %v410_v18 = vpop.permute.xlu0 %409  ;;  %585 = vst.msk [vmem:[#allocation2 + $0x20] sm:$0xff] %vm580_vm3, %v529_v17 }
  0xc1   : > { %465 = vst.msk [vmem:[#allocation2 + $0x28] sm:$0xff] %vm459_vm2, %v410_v18  ;;  %1264 = vrot.lane.b32.xlu1 %v3191_v15, %s3641_s13 }
  0xc2   : > { %1145 = vrot.lane.b32.xlu0 %v3172_v16, %s3640_s17 }
  0xc3   : > { %v1011_v19 = vpop.permute.xlu1 %1010  ;;  %v1330_v21 = vld [vmem:[#allocation2 + $0x8] sm:$0xff] }
  0xc4   : > { %v891_v20 = vpop.permute.xlu0 %890  ;;  %1069 = vst.msk [vmem:[#allocation2 + $0x10] sm:$0xff] %vm1066_vm7, %v1011_v19  ;;  %3358 = vmatmul.mubr.msk.f32.vlgmr.msra.gmra.mrb[0].mxu0 %vm1361_vm10, %v1330_v21  ;;  %v3178_v19 = vld [vmem:[%s3727_s18 + $0xe1] sm:$0xff] }
  0xc5   : > { %948 = vst.msk [vmem:[#allocation2 + $0x18] sm:$0xff] %vm944_vm6, %v891_v20  ;;  %785 = vrot.lane.b32.xlu1 %v3172_v16, %s3637_s10 }
  0xc6   : > { %423 = vrot.lane.b32.xlu0 %v3171_v9, %s3635_s8 }
  0xc7   : > { %v651_v23 = vpop.permute.xlu1 %650 }
  0xc8   : > { %v531_v24 = vpop.permute.xlu0 %530  ;;  %707 = vst.msk [vmem:[#allocation2 + $0x20] sm:$0xff] %vm702_vm4, %v651_v23 }
  0xc9   : > { %586 = vst.msk [vmem:[#allocation2 + $0x28] sm:$0xff] %vm580_vm3, %v531_v24  ;;  %1266 = vrot.lane.b32.xlu1 %v3192_v22, %s3641_s13 }
  0xca   : > { %904 = vrot.lane.b32.xlu0 %v3191_v15, %s3638_s11 }
  0xcb   : > { %v1132_v25 = vpop.permute.xlu1 %1131 }
  0xcc   : > { %v1013_v26 = vpop.permute.xlu0 %1012  ;;  %1190 = vst.msk [vmem:[#allocation2 + $0x10] sm:$0xff] %vm1187_vm8, %v1132_v25 }
  0xcd   : > { %1070 = vst.msk [vmem:[#allocation2 + $0x18] sm:$0xff] %vm1066_vm7, %v1013_v26  ;;  %544 = vrot.lane.b32.xlu1 %v3191_v15, %s3634_s25 }
  0xce   : > { %425 = vrot.lane.b32.xlu0 %v3172_v16, %s3635_s8 }
  0xcf   : > { %v772_v27 = vpop.permute.xlu1 %771 }
  0xd0   : > { %v653_v28 = vpop.permute.xlu0 %652  ;;  %828 = vst.msk [vmem:[#allocation2 + $0x20] sm:$0xff] %vm823_vm5, %v772_v27 }
  0xd1   : > { %708 = vst.msk [vmem:[#allocation2 + $0x28] sm:$0xff] %vm702_vm4, %v653_v28  ;;  %1026 = vrot.lane.b32.xlu1 %v3844_v33, %s3639_s12 }
  0xd2   : > { %906 = vrot.lane.b32.xlu0 %v3192_v22, %s3638_s11 }
  0xd3   : > { %v1253_v29 = vpop.permute.xlu1 %1252 }
  0xd4   : > { %v1134_v30 = vpop.permute.xlu0 %1133  ;;  %1311 = vst.msk [vmem:[#allocation2 + $0x10] sm:$0xff] %vm1308_vm9, %v1253_v29  ;;  %v3159_v29 = vld [vmem:[%s3727_s18 + $0xf0] sm:$0xff] }
  0xd5   : > { %1191 = vst.msk [vmem:[#allocation2 + $0x18] sm:$0xff] %vm1187_vm8, %v1134_v30  ;;  %666 = vrot.lane.b32.xlu1 %v3844_v33, %s3636_s9  ;;  %v3193_v33 = vld [vmem:[%s3727_s18 + $0xaa] sm:$0xff] }
  0xd6   : > { %546 = vrot.lane.b32.xlu0 %v3192_v22, %s3634_s25 }
  0xd7   : > { %v774_v32 = vpop.permute.xlu1 %773 }
  0xd8   : > { %v412_v34 = vpop.permute.xlu0 %411  ;;  %829 = vst.msk [vmem:[#allocation2 + $0x28] sm:$0xff] %vm823_vm5, %v774_v32 }
  0xd9   : > { %466 = vst.msk [vmem:[#allocation2 + $0x30] sm:$0xff] %vm459_vm2, %v412_v34  ;;  %1147 = vrot.lane.b32.xlu1 %v3173_v31, %s3640_s17 }
  0xda   : > { %1028 = vrot.lane.b32.xlu0 %v3856_v35, %s3639_s12 }
  0xdb   : > { %v1255_v36 = vpop.permute.xlu1 %1254  ;;  %v1331_v38 = vld [vmem:[#allocation2 + $0x10] sm:$0xff] }
  0xdc   : > { %v893_v37 = vpop.permute.xlu0 %892  ;;  %1312 = vst.msk [vmem:[#allocation2 + $0x18] sm:$0xff] %vm1308_vm9, %v1255_v36  ;;  %3360 = vmatprep.mubr.msk.f32.mxu0 %vm1361_vm10, %v1331_v38  ;;  %v3160_v36 = vld [vmem:[%s3727_s18 + $0xf8] sm:$0xff] }
  0xdd   : > { %949 = vst.msk [vmem:[#allocation2 + $0x20] sm:$0xff] %vm944_vm6, %v893_v37  ;;  %787 = vrot.lane.b32.xlu1 %v3173_v31, %s3637_s10  ;;  %v3179_v37 = vld [vmem:[%s3727_s18 + $0xf1] sm:$0xff] }
  0xde   : > { %668 = vrot.lane.b32.xlu0 %v3856_v35, %s3636_s9  ;;  %v3194_v35 = vld [vmem:[%s3727_s18 + $0xb2] sm:$0xff] }
  0xdf   : > { %v533_v42 = vpop.permute.xlu1 %532 }
  0xe0   : > { %v414_v43 = vpop.permute.xlu0 %413  ;;  %587 = vst.msk [vmem:[#allocation2 + $0x30] sm:$0xff] %vm580_vm3, %v533_v42 }
  0xe1   : > { %467 = vst.msk [vmem:[#allocation2 + $0x38] sm:$0xff] %vm459_vm2, %v414_v43  ;;  %1268 = vrot.lane.b32.xlu1 %v3193_v33, %s3641_s13 }
  0xe2   : > { %1149 = vrot.lane.b32.xlu0 %v3174_v40, %s3640_s17 }
  0xe3   : > { %v1015_v44 = vpop.permute.xlu1 %1014  ;;  %v1332_v46 = vld [vmem:[#allocation2 + $0x18] sm:$0xff] }
  0xe4   : > { %v895_v45 = vpop.permute.xlu0 %894  ;;  %1071 = vst.msk [vmem:[#allocation2 + $0x20] sm:$0xff] %vm1066_vm7, %v1015_v44  ;;  %3361 = vmatmul.mubr.msk.f32.gmra.mrb[2].mxu0 %vm1361_vm10, %v1332_v46  ;;  %v3180_v44 = vld [vmem:[%s3727_s18 + $0xf9] sm:$0xff] }
  0xe5   : > { %950 = vst.msk [vmem:[#allocation2 + $0x28] sm:$0xff] %vm944_vm6, %v895_v45  ;;  %789 = vrot.lane.b32.xlu1 %v3174_v40, %s3637_s10  ;;  %v3199_v45 = vld [vmem:[%s3727_s18 + $0xf2] sm:$0xff] }
  0xe6   : > { %427 = vrot.lane.b32.xlu0 %v3173_v31, %s3635_s8 }
  0xe7   : > { %v655_v47 = vpop.permute.xlu1 %654 }
  0xe8   : > { %v535_v48 = vpop.permute.xlu0 %534  ;;  %709 = vst.msk [vmem:[#allocation2 + $0x30] sm:$0xff] %vm702_vm4, %v655_v47 }
  0xe9   : > { %588 = vst.msk [vmem:[#allocation2 + $0x38] sm:$0xff] %vm580_vm3, %v535_v48  ;;  %1270 = vrot.lane.b32.xlu1 %v3194_v35, %s3641_s13 }
  0xea   : > { %908 = vrot.lane.b32.xlu0 %v3193_v33, %s3638_s11 }
  0xeb   : > { %v1136_v50 = vpop.permute.xlu1 %1135 }
  0xec   : > { %v1017_v51 = vpop.permute.xlu0 %1016  ;;  %1192 = vst.msk [vmem:[#allocation2 + $0x20] sm:$0xff] %vm1187_vm8, %v1136_v50 }
  0xed   : > { %1072 = vst.msk [vmem:[#allocation2 + $0x28] sm:$0xff] %vm1066_vm7, %v1017_v51  ;;  %548 = vrot.lane.b32.xlu1 %v3193_v33, %s3634_s25  ;;  %v3200_v51 = vld [vmem:[%s3727_s18 + $0xfa] sm:$0xff] }
  0xee   : > { %429 = vrot.lane.b32.xlu0 %v3174_v40, %s3635_s8 }
  0xef   : > { %v776_v52 = vpop.permute.xlu1 %775 }
  0xf0   : > { %v657_v53 = vpop.permute.xlu0 %656  ;;  %830 = vst.msk [vmem:[#allocation2 + $0x30] sm:$0xff] %vm823_vm5, %v776_v52 }
  0xf1   : > { %710 = vst.msk [vmem:[#allocation2 + $0x38] sm:$0xff] %vm702_vm4, %v657_v53  ;;  %1030 = vrot.lane.b32.xlu1 %v3878_v39, %s3639_s12 }
  0xf2   : > { %910 = vrot.lane.b32.xlu0 %v3194_v35, %s3638_s11 }
  0xf3   : > { %v1257_v54 = vpop.permute.xlu1 %1256 }
  0xf4   : > { %v1138_v56 = vpop.permute.xlu0 %1137  ;;  %1313 = vst.msk [vmem:[#allocation2 + $0x20] sm:$0xff] %vm1308_vm9, %v1257_v54  ;;  %v3161_v54 = vld [vmem:[%s3727_s18 + $0x108] sm:$0xff] }
  0xf5   : > { %1193 = vst.msk [vmem:[#allocation2 + $0x28] sm:$0xff] %vm1187_vm8, %v1138_v56  ;;  %670 = vrot.lane.b32.xlu1 %v3878_v39, %s3636_s9  ;;  %v3195_v39 = vld [vmem:[%s3727_s18 + $0xc2] sm:$0xff]  ;;  %v3162_v56 = vld [vmem:[%s3727_s18 + $0x110] sm:$0xff] }
  0xf6   : > { %550 = vrot.lane.b32.xlu0 %v3194_v35, %s3634_s25 }
  0xf7   : > { %v778_v58 = vpop.permute.xlu1 %777 }
  0xf8   : > { %v416_v59 = vpop.permute.xlu0 %415  ;;  %831 = vst.msk [vmem:[#allocation2 + $0x38] sm:$0xff] %vm823_vm5, %v778_v58 }
  0xf9   : > { %468 = vst.msk [vmem:[#allocation2 + $0x40] sm:$0xff] %vm459_vm2, %v416_v59  ;;  %1151 = vrot.lane.b32.xlu1 %v3175_v57, %s3640_s17  ;;  %v3181_v59 = vld [vmem:[%s3727_s18 + $0x109] sm:$0xff] }
  0xfa   : > { %1032 = vrot.lane.b32.xlu0 %v3890_v41, %s3639_s12 }
  0xfb   : > { %v1259_v60 = vpop.permute.xlu1 %1258  ;;  %v1333_v62 = vld [vmem:[#allocation2 + $0x20] sm:$0xff] }
  0xfc   : > { %v897_v61 = vpop.permute.xlu0 %896  ;;  %1314 = vst.msk [vmem:[#allocation2 + $0x28] sm:$0xff] %vm1308_vm9, %v1259_v60  ;;  %3363 = vmatprep.mubr.msk.f32.mxu0 %vm1361_vm10, %v1333_v62  ;;  %v3182_v60 = vld [vmem:[%s3727_s18 + $0x111] sm:$0xff] }
  0xfd   : > { %951 = vst.msk [vmem:[#allocation2 + $0x30] sm:$0xff] %vm944_vm6, %v897_v61  ;;  %791 = vrot.lane.b32.xlu1 %v3175_v57, %s3637_s10 }
  0xfe   : > { %672 = vrot.lane.b32.xlu0 %v3890_v41, %s3636_s9  ;;  %v3196_v41 = vld [vmem:[%s3727_s18 + $0xca] sm:$0xff] }
  0xff   : > { %v537_v0 = vpop.permute.xlu1 %536 }
 0x100   : > { %v418_v1 = vpop.permute.xlu0 %417  ;;  %589 = vst.msk [vmem:[#allocation2 + $0x40] sm:$0xff] %vm580_vm3, %v537_v0 }
 0x101   : > { %469 = vst.msk [vmem:[#allocation2 + $0x48] sm:$0xff] %vm459_vm2, %v418_v1  ;;  %1272 = vrot.lane.b32.xlu1 %v3195_v39, %s3641_s13 }
 0x102   : > { %1153 = vrot.lane.b32.xlu0 %v3176_v63, %s3640_s17 }
 0x103   : > { %v1019_v2 = vpop.permute.xlu1 %1018  ;;  %v1334_v4 = vld [vmem:[#allocation2 + $0x28] sm:$0xff] }
 0x104   : > { %v899_v3 = vpop.permute.xlu0 %898  ;;  %1073 = vst.msk [vmem:[#allocation2 + $0x30] sm:$0xff] %vm1066_vm7, %v1019_v2  ;;  %3364 = vmatmul.mubr.msk.f32.gmra.mrb[4].mxu0 %vm1361_vm10, %v1334_v4 }
 0x105   : > { %952 = vst.msk [vmem:[#allocation2 + $0x38] sm:$0xff] %vm944_vm6, %v899_v3  ;;  %793 = vrot.lane.b32.xlu1 %v3176_v63, %s3637_s10 }
 0x106   : > { %431 = vrot.lane.b32.xlu0 %v3175_v57, %s3635_s8 }
 0x107   : > { %v659_v5 = vpop.permute.xlu1 %658 }
 0x108   : > { %v539_v6 = vpop.permute.xlu0 %538  ;;  %711 = vst.msk [vmem:[#allocation2 + $0x40] sm:$0xff] %vm702_vm4, %v659_v5 }
 0x109   : > { %590 = vst.msk [vmem:[#allocation2 + $0x48] sm:$0xff] %vm580_vm3, %v539_v6  ;;  %1274 = vrot.lane.b32.xlu1 %v3196_v41, %s3641_s13 }
 0x10a   : > { %912 = vrot.lane.b32.xlu0 %v3195_v39, %s3638_s11 }
 0x10b   : > { %v1140_v7 = vpop.permute.xlu1 %1139 }
 0x10c   : > { %v1021_v8 = vpop.permute.xlu0 %1020  ;;  %1194 = vst.msk [vmem:[#allocation2 + $0x30] sm:$0xff] %vm1187_vm8, %v1140_v7 }
 0x10d   : > { %1074 = vst.msk [vmem:[#allocation2 + $0x38] sm:$0xff] %vm1066_vm7, %v1021_v8  ;;  %552 = vrot.lane.b32.xlu1 %v3195_v39, %s3634_s25  ;;  %v3201_v39 = vld [vmem:[%s3727_s18 + $0x10a] sm:$0xff] }
 0x10e   : > { %433 = vrot.lane.b32.xlu0 %v3176_v63, %s3635_s8  ;;  %v3202_v63 = vld [vmem:[%s3727_s18 + $0x112] sm:$0xff] }
 0x10f   : > { %v780_v9 = vpop.permute.xlu1 %779 }
 0x110   : > { %v661_v10 = vpop.permute.xlu0 %660  ;;  %832 = vst.msk [vmem:[#allocation2 + $0x40] sm:$0xff] %vm823_vm5, %v780_v9 }
 0x111   : > { %712 = vst.msk [vmem:[#allocation2 + $0x48] sm:$0xff] %vm702_vm4, %v661_v10  ;;  %1034 = vrot.lane.b32.xlu1 %v3915_v49, %s3639_s12 }
 0x112   : > { %914 = vrot.lane.b32.xlu0 %v3196_v41, %s3638_s11 }
 0x113   : > { %v1261_v11 = vpop.permute.xlu1 %1260 }
 0x114   : > { %v1142_v12 = vpop.permute.xlu0 %1141  ;;  %1315 = vst.msk [vmem:[#allocation2 + $0x30] sm:$0xff] %vm1308_vm9, %v1261_v11 }
 0x115   : > { %1195 = vst.msk [vmem:[#allocation2 + $0x38] sm:$0xff] %vm1187_vm8, %v1142_v12  ;;  %674 = vrot.lane.b32.xlu1 %v3915_v49, %s3636_s9  ;;  %v3197_v49 = vld [vmem:[%s3727_s18 + $0xda] sm:$0xff] }
 0x116   : > { %554 = vrot.lane.b32.xlu0 %v3196_v41, %s3634_s25 }
 0x117   : > { %v782_v14 = vpop.permute.xlu1 %781 }
 0x118   : > { %v420_v15 = vpop.permute.xlu0 %419  ;;  %833 = vst.msk [vmem:[#allocation2 + $0x48] sm:$0xff] %vm823_vm5, %v782_v14 }
 0x119   : > { %470 = vst.msk [vmem:[#allocation2 + $0x50] sm:$0xff] %vm459_vm2, %v420_v15  ;;  %1155 = vrot.lane.b32.xlu1 %v3177_v13, %s3640_s17 }
 0x11a   : > { %1036 = vrot.lane.b32.xlu0 %v3932_v55, %s3639_s12 }
 0x11b   : > { %v1263_v16 = vpop.permute.xlu1 %1262  ;;  %v1335_v18 = vld [vmem:[#allocation2 + $0x30] sm:$0xff] }
 0x11c   : > { %v901_v17 = vpop.permute.xlu0 %900  ;;  %1316 = vst.msk [vmem:[#allocation2 + $0x38] sm:$0xff] %vm1308_vm9, %v1263_v16  ;;  %3366 = vmatprep.mubr.msk.f32.mxu0 %vm1361_vm10, %v1335_v18 }
 0x11d   : > { %953 = vst.msk [vmem:[#allocation2 + $0x40] sm:$0xff] %vm944_vm6, %v901_v17  ;;  %795 = vrot.lane.b32.xlu1 %v3177_v13, %s3637_s10 }
 0x11e   : > { %676 = vrot.lane.b32.xlu0 %v3932_v55, %s3636_s9  ;;  %v3198_v55 = vld [vmem:[%s3727_s18 + $0xe2] sm:$0xff] }
 0x11f   : > { %v541_v20 = vpop.permute.xlu1 %540 }
 0x120   : > { %v422_v21 = vpop.permute.xlu0 %421  ;;  %591 = vst.msk [vmem:[#allocation2 + $0x50] sm:$0xff] %vm580_vm3, %v541_v20 }
 0x121   : > { %471 = vst.msk [vmem:[#allocation2 + $0x58] sm:$0xff] %vm459_vm2, %v422_v21  ;;  %1276 = vrot.lane.b32.xlu1 %v3197_v49, %s3641_s13 }
 0x122   : > { %1157 = vrot.lane.b32.xlu0 %v3178_v19, %s3640_s17 }
 0x123   : > { %v1023_v22 = vpop.permute.xlu1 %1022  ;;  %v1336_v24 = vld [vmem:[#allocation2 + $0x38] sm:$0xff] }
 0x124   : > { %v903_v23 = vpop.permute.xlu0 %902  ;;  %1075 = vst.msk [vmem:[#allocation2 + $0x40] sm:$0xff] %vm1066_vm7, %v1023_v22  ;;  %3367 = vmatmul.mubr.msk.f32.gmra.mrb[6].mxu0 %vm1361_vm10, %v1336_v24 }
 0x125   : > { %954 = vst.msk [vmem:[#allocation2 + $0x48] sm:$0xff] %vm944_vm6, %v903_v23  ;;  %797 = vrot.lane.b32.xlu1 %v3178_v19, %s3637_s10 }
 0x126   : > { %435 = vrot.lane.b32.xlu0 %v3177_v13, %s3635_s8 }
 0x127   : > { %v663_v25 = vpop.permute.xlu1 %662 }
 0x128   : > { %v543_v26 = vpop.permute.xlu0 %542  ;;  %713 = vst.msk [vmem:[#allocation2 + $0x50] sm:$0xff] %vm702_vm4, %v663_v25 }
 0x129   : > { %592 = vst.msk [vmem:[#allocation2 + $0x58] sm:$0xff] %vm580_vm3, %v543_v26  ;;  %1278 = vrot.lane.b32.xlu1 %v3198_v55, %s3641_s13 }
 0x12a   : > { %916 = vrot.lane.b32.xlu0 %v3197_v49, %s3638_s11 }
 0x12b   : > { %v1144_v27 = vpop.permute.xlu1 %1143 }
 0x12c   : > { %v1025_v28 = vpop.permute.xlu0 %1024  ;;  %1196 = vst.msk [vmem:[#allocation2 + $0x40] sm:$0xff] %vm1187_vm8, %v1144_v27 }
 0x12d   : > { %1076 = vst.msk [vmem:[#allocation2 + $0x48] sm:$0xff] %vm1066_vm7, %v1025_v28  ;;  %556 = vrot.lane.b32.xlu1 %v3197_v49, %s3634_s25 }
 0x12e   : > { %437 = vrot.lane.b32.xlu0 %v3178_v19, %s3635_s8 }
 0x12f   : > { %v784_v30 = vpop.permute.xlu1 %783 }
 0x130   : > { %v665_v31 = vpop.permute.xlu0 %664  ;;  %834 = vst.msk [vmem:[#allocation2 + $0x50] sm:$0xff] %vm823_vm5, %v784_v30 }
 0x131   : > { %714 = vst.msk [vmem:[#allocation2 + $0x58] sm:$0xff] %vm702_vm4, %v665_v31  ;;  %1038 = vrot.lane.b32.xlu1 %v3159_v29, %s3639_s12 }
 0x132   : > { %918 = vrot.lane.b32.xlu0 %v3198_v55, %s3638_s11 }
 0x133   : > { %v1265_v32 = vpop.permute.xlu1 %1264 }
 0x134   : > { %v1146_v34 = vpop.permute.xlu0 %1145  ;;  %1317 = vst.msk [vmem:[#allocation2 + $0x40] sm:$0xff] %vm1308_vm9, %v1265_v32 }
 0x135   : > { %1197 = vst.msk [vmem:[#allocation2 + $0x48] sm:$0xff] %vm1187_vm8, %v1146_v34  ;;  %678 = vrot.lane.b32.xlu1 %v3159_v29, %s3636_s9 }
 0x136   : > { %558 = vrot.lane.b32.xlu0 %v3198_v55, %s3634_s25 }
 0x137   : > { %v786_v38 = vpop.permute.xlu1 %785 }
 0x138   : > { %v424_v33 = vpop.permute.xlu0 %423  ;;  %835 = vst.msk [vmem:[#allocation2 + $0x58] sm:$0xff] %vm823_vm5, %v786_v38 }
 0x139   : > { %472 = vst.msk [vmem:[#allocation2 + $0x60] sm:$0xff] %vm459_vm2, %v424_v33  ;;  %1159 = vrot.lane.b32.xlu1 %v3179_v37, %s3640_s17 }
 0x13a   : > { %1040 = vrot.lane.b32.xlu0 %v3160_v36, %s3639_s12 }
 0x13b   : > { %v1267_v40 = vpop.permute.xlu1 %1266  ;;  %v1337_v43 = vld [vmem:[#allocation2 + $0x40] sm:$0xff] }
 0x13c   : > { %v905_v42 = vpop.permute.xlu0 %904  ;;  %1318 = vst.msk [vmem:[#allocation2 + $0x48] sm:$0xff] %vm1308_vm9, %v1267_v40  ;;  %3369 = vmatprep.mubr.msk.f32.mxu0 %vm1361_vm10, %v1337_v43 }
 0x13d   : > { %955 = vst.msk [vmem:[#allocation2 + $0x50] sm:$0xff] %vm944_vm6, %v905_v42  ;;  %799 = vrot.lane.b32.xlu1 %v3179_v37, %s3637_s10  ;;  %v4224_v37 = vld [vmem:[%s4872_s2] ss:$0 sm:$0xff] }
 0x13e   : > { %680 = vrot.lane.b32.xlu0 %v3160_v36, %s3636_s9 }
 0x13f   : > { %v545_v46 = vpop.permute.xlu1 %544 }
 0x140   : > { %v426_v35 = vpop.permute.xlu0 %425  ;;  %593 = vst.msk [vmem:[#allocation2 + $0x60] sm:$0xff] %vm580_vm3, %v545_v46 }
 0x141   : > { %473 = vst.msk [vmem:[#allocation2 + $0x68] sm:$0xff] %vm459_vm2, %v426_v35  ;;  %1280 = vrot.lane.b32.xlu1 %v3199_v45, %s3641_s13 }
 0x142   : > { %1161 = vrot.lane.b32.xlu0 %v3180_v44, %s3640_s17 }
 0x143   : > { %v1027_v47 = vpop.permute.xlu1 %1026  ;;  %v1338_v50 = vld [vmem:[#allocation2 + $0x48] sm:$0xff] }
 0x144   : > { %v907_v48 = vpop.permute.xlu0 %906  ;;  %1077 = vst.msk [vmem:[#allocation2 + $0x50] sm:$0xff] %vm1066_vm7, %v1027_v47  ;;  %3370 = vmatmul.mubr.msk.f32.gmra.mrb[8].mxu0 %vm1361_vm10, %v1338_v50 }
 0x145   : > { %956 = vst.msk [vmem:[#allocation2 + $0x58] sm:$0xff] %vm944_vm6, %v907_v48  ;;  %920 = vrot.lane.b32.xlu1 %v3199_v45, %s3638_s11 }
 0x146   : > { %801 = vrot.lane.b32.xlu0 %v3180_v44, %s3637_s10 }
 0x147   : > { %v667_v52 = vpop.permute.xlu1 %666 }
 0x148   : > { %v547_v53 = vpop.permute.xlu0 %546  ;;  %715 = vst.msk [vmem:[#allocation2 + $0x60] sm:$0xff] %vm702_vm4, %v667_v52 }
 0x149   : > { %594 = vst.msk [vmem:[#allocation2 + $0x68] sm:$0xff] %vm580_vm3, %v547_v53  ;;  %922 = vrot.lane.b32.xlu1 %v3200_v51, %s3638_s11 }
 0x14a   : > { %1282 = vrot.lane.b32.xlu0 %v3200_v51, %s3641_s13 }
 0x14b   : > { %v1148_v57 = vpop.permute.xlu1 %1147 }
 0x14c   : > { %v1029_v58 = vpop.permute.xlu0 %1028  ;;  %1198 = vst.msk [vmem:[#allocation2 + $0x50] sm:$0xff] %vm1187_vm8, %v1148_v57 }
 0x14d   : > { %1078 = vst.msk [vmem:[#allocation2 + $0x58] sm:$0xff] %vm1066_vm7, %v1029_v58  ;;  %1044 = vrot.lane.b32.xlu1 %v3162_v56, %s3639_s12 }
 0x14e   : > { %1042 = vrot.lane.b32.xlu0 %v3161_v54, %s3639_s12 }
 0x14f   : > { %v788_v61 = vpop.permute.xlu1 %787 }
 0x150   : > { %v669_v62 = vpop.permute.xlu0 %668  ;;  %836 = vst.msk [vmem:[#allocation2 + $0x60] sm:$0xff] %vm823_vm5, %v788_v61 }
 0x151   : > { %716 = vst.msk [vmem:[#allocation2 + $0x68] sm:$0xff] %vm702_vm4, %v669_v62  ;;  %1165 = vrot.lane.b32.xlu1 %v3182_v60, %s3640_s17 }
 0x152   : > { %1163 = vrot.lane.b32.xlu0 %v3181_v59, %s3640_s17 }
 0x153   : > { %v1269_v0 = vpop.permute.xlu1 %1268 }
 0x154   : > { %v1150_v1 = vpop.permute.xlu0 %1149  ;;  %1319 = vst.msk [vmem:[#allocation2 + $0x50] sm:$0xff] %vm1308_vm9, %v1269_v0 }
 0x155   : > { %1199 = vst.msk [vmem:[#allocation2 + $0x58] sm:$0xff] %vm1187_vm8, %v1150_v1  ;;  %1286 = vrot.lane.b32.xlu1 %v3202_v63, %s3641_s13 }
 0x156   : > { %1284 = vrot.lane.b32.xlu0 %v3201_v39, %s3641_s13 }
 0x157   : > { %v790_v2 = vpop.permute.xlu1 %789 }
 0x158   : > { %v428_v3 = vpop.permute.xlu0 %427  ;;  %837 = vst.msk [vmem:[#allocation2 + $0x68] sm:$0xff] %vm823_vm5, %v790_v2 }
 0x159   : > { %474 = vst.msk [vmem:[#allocation2 + $0x70] sm:$0xff] %vm459_vm2, %v428_v3 }
 0x15b   : > { %v1271_v4 = vpop.permute.xlu1 %1270  ;;  %v1339_v5 = vld [vmem:[#allocation2 + $0x50] sm:$0xff] }
 0x15c   : > { %v909_v41 = vpop.permute.xlu0 %908  ;;  %1320 = vst.msk [vmem:[#allocation2 + $0x58] sm:$0xff] %vm1308_vm9, %v1271_v4  ;;  %3372 = vmatprep.mubr.msk.f32.mxu0 %vm1361_vm10, %v1339_v5 }
 0x15d   : > { %957 = vst.msk [vmem:[#allocation2 + $0x60] sm:$0xff] %vm944_vm6, %v909_v41 }
 0x15f   : > { %v549_v6 = vpop.permute.xlu1 %548 }
 0x160   : > { %v430_v7 = vpop.permute.xlu0 %429  ;;  %595 = vst.msk [vmem:[#allocation2 + $0x70] sm:$0xff] %vm580_vm3, %v549_v6 }
 0x161   : > { %475 = vst.msk [vmem:[#allocation2 + $0x78] sm:$0xff] %vm459_vm2, %v430_v7 }
 0x163   : > { %v1031_v8 = vpop.permute.xlu1 %1030  ;;  %v1340_v10 = vld [vmem:[#allocation2 + $0x58] sm:$0xff] }
 0x164   : > { %v911_v9 = vpop.permute.xlu0 %910  ;;  %1079 = vst.msk [vmem:[#allocation2 + $0x60] sm:$0xff] %vm1066_vm7, %v1031_v8  ;;  %3373 = vmatmul.mubr.msk.f32.gmra.mrb[10].mxu0 %vm1361_vm10, %v1340_v10 }
 0x165   : > { %958 = vst.msk [vmem:[#allocation2 + $0x68] sm:$0xff] %vm944_vm6, %v911_v9 }
 0x167   : > { %v671_v11 = vpop.permute.xlu1 %670 }
 0x168   : > { %v551_v12 = vpop.permute.xlu0 %550  ;;  %717 = vst.msk [vmem:[#allocation2 + $0x70] sm:$0xff] %vm702_vm4, %v671_v11 }
 0x169   : > { %596 = vst.msk [vmem:[#allocation2 + $0x78] sm:$0xff] %vm580_vm3, %v551_v12 }
 0x16b   : > { %v1152_v13 = vpop.permute.xlu1 %1151 }
 0x16c   : > { %v1033_v14 = vpop.permute.xlu0 %1032  ;;  %1200 = vst.msk [vmem:[#allocation2 + $0x60] sm:$0xff] %vm1187_vm8, %v1152_v13 }
 0x16d   : > { %1080 = vst.msk [vmem:[#allocation2 + $0x68] sm:$0xff] %vm1066_vm7, %v1033_v14 }
 0x16f   : > { %v792_v15 = vpop.permute.xlu1 %791 }
 0x170   : > { %v673_v16 = vpop.permute.xlu0 %672  ;;  %838 = vst.msk [vmem:[#allocation2 + $0x70] sm:$0xff] %vm823_vm5, %v792_v15 }
 0x171   : > { %718 = vst.msk [vmem:[#allocation2 + $0x78] sm:$0xff] %vm702_vm4, %v673_v16 }
 0x173   : > { %v1273_v17 = vpop.permute.xlu1 %1272 }
 0x174   : > { %v1154_v18 = vpop.permute.xlu0 %1153  ;;  %1321 = vst.msk [vmem:[#allocation2 + $0x60] sm:$0xff] %vm1308_vm9, %v1273_v17 }
 0x175   : > { %1201 = vst.msk [vmem:[#allocation2 + $0x68] sm:$0xff] %vm1187_vm8, %v1154_v18 }
 0x177   : > { %v794_v49 = vpop.permute.xlu1 %793 }
 0x178   : > { %v432_v19 = vpop.permute.xlu0 %431  ;;  %839 = vst.msk [vmem:[#allocation2 + $0x78] sm:$0xff] %vm823_vm5, %v794_v49 }
 0x179   : > { %476 = vst.msk [vmem:[#allocation2 + $0x80] sm:$0xff] %vm459_vm2, %v432_v19 }
 0x17b   : > { %v1275_v20 = vpop.permute.xlu1 %1274  ;;  %v1341_v22 = vld [vmem:[#allocation2 + $0x60] sm:$0xff] }
 0x17c   : > { %v913_v21 = vpop.permute.xlu0 %912  ;;  %1322 = vst.msk [vmem:[#allocation2 + $0x68] sm:$0xff] %vm1308_vm9, %v1275_v20  ;;  %3375 = vmatprep.mubr.msk.f32.mxu0 %vm1361_vm10, %v1341_v22 }
 0x17d   : > { %959 = vst.msk [vmem:[#allocation2 + $0x70] sm:$0xff] %vm944_vm6, %v913_v21 }
 0x17f   : > { %v553_v23 = vpop.permute.xlu1 %552 }
 0x180   : > { %v434_v24 = vpop.permute.xlu0 %433  ;;  %597 = vst.msk [vmem:[#allocation2 + $0x80] sm:$0xff] %vm580_vm3, %v553_v23 }
 0x181   : > { %477 = vst.msk [vmem:[#allocation2 + $0x88] sm:$0xff] %vm459_vm2, %v434_v24 }
 0x183   : > { %v1035_v55 = vpop.permute.xlu1 %1034  ;;  %v1342_v26 = vld [vmem:[#allocation2 + $0x68] sm:$0xff] }
 0x184   : > { %v915_v25 = vpop.permute.xlu0 %914  ;;  %1081 = vst.msk [vmem:[#allocation2 + $0x70] sm:$0xff] %vm1066_vm7, %v1035_v55  ;;  %3376 = vmatmul.mubr.msk.f32.gmra.mrb[12].mxu0 %vm1361_vm10, %v1342_v26 }
 0x185   : > { %960 = vst.msk [vmem:[#allocation2 + $0x78] sm:$0xff] %vm944_vm6, %v915_v25 }
 0x187   : > { %v675_v27 = vpop.permute.xlu1 %674 }
 0x188   : > { %v555_v28 = vpop.permute.xlu0 %554  ;;  %719 = vst.msk [vmem:[#allocation2 + $0x80] sm:$0xff] %vm702_vm4, %v675_v27 }
 0x189   : > { %598 = vst.msk [vmem:[#allocation2 + $0x88] sm:$0xff] %vm580_vm3, %v555_v28 }
 0x18b   : > { %v1156_v29 = vpop.permute.xlu1 %1155 }
 0x18c   : > { %v1037_v30 = vpop.permute.xlu0 %1036  ;;  %1202 = vst.msk [vmem:[#allocation2 + $0x70] sm:$0xff] %vm1187_vm8, %v1156_v29 }
 0x18d   : > { %1082 = vst.msk [vmem:[#allocation2 + $0x78] sm:$0xff] %vm1066_vm7, %v1037_v30 }
 0x18f   : > { %v796_v31 = vpop.permute.xlu1 %795 }
 0x190   : > { %v677_v32 = vpop.permute.xlu0 %676  ;;  %840 = vst.msk [vmem:[#allocation2 + $0x80] sm:$0xff] %vm823_vm5, %v796_v31 }
 0x191   : > { %720 = vst.msk [vmem:[#allocation2 + $0x88] sm:$0xff] %vm702_vm4, %v677_v32 }
 0x193   : > { %v1277_v34 = vpop.permute.xlu1 %1276 }
 0x194   : > { %v1158_v36 = vpop.permute.xlu0 %1157  ;;  %1323 = vst.msk [vmem:[#allocation2 + $0x70] sm:$0xff] %vm1308_vm9, %v1277_v34 }
 0x195   : > { %1203 = vst.msk [vmem:[#allocation2 + $0x78] sm:$0xff] %vm1187_vm8, %v1158_v36  ;;  %v3642_v36 = vmov 0.0  }
 0x196   : > { %1633 = vst.msk [vmem:[#allocation3] sm:$0x1] %vm1632_vm12, %v3642_v36  ;;  %1634 = vst.msk [vmem:[#allocation3 + $0x18] sm:$0x1] %vm1632_vm12, %v3642_v36 }
 0x197   : > { %v798_v38 = vpop.permute.xlu1 %797  ;;  %v3359_v40 = vpop.f32.mrb[0].mxu0  ;;  %1635 = vst.msk [vmem:[#allocation3 + $0x30] sm:$0x1] %vm1632_vm12, %v3642_v36  ;;  %1636 = vst.msk [vmem:[#allocation3 + $0x48] sm:$0x1] %vm1632_vm12, %v3642_v36 }
 0x198   : > { %v436_v33 = vpop.permute.xlu0 %435  ;;  %841 = vst.msk [vmem:[#allocation2 + $0x88] sm:$0xff] %vm823_vm5, %v798_v38  ;;  %v1498_v42 = vadd.f32 %v3359_v40, %v4224_v37  ;;  %v1492_v43 = vpop.f32.mrb[1].mxu0 }
 0x199   : > { %478 = vst.msk [vmem:[#allocation2 + $0x90] sm:$0xff] %vm459_vm2, %v436_v33  ;;  %v1493_v44 = vadd.f32 %v4224_v37, %v1492_v43 }
 0x19a   : > { %v1592_v45 = vmax.f32 %v1498_v42, 0.0  ;;  %1637 = vst.msk [vmem:[#allocation3 + $0x60] sm:$0x1] %vm1632_vm12, %v3642_v36  ;;  %1638 = vst.msk [vmem:[#allocation3 + $0x78] sm:$0x1] %vm1632_vm12, %v3642_v36 }
 0x19b   : > { %v1279_v46 = vpop.permute.xlu1 %1278  ;;  %v1343_v47 = vld [vmem:[#allocation2 + $0x70] sm:$0xff]  ;;  %v1591_v48 = vmax.f32 %v1493_v44, 0.0  ;;  %1639 = vst.msk [vmem:[#allocation3 + $0x90] sm:$0x1] %vm1632_vm12, %v3642_v36  ;;  %1640 = vst.msk [vmem:[#allocation3 + $0xa8] sm:$0x1] %vm1632_vm12, %v3642_v36 }
 0x19c   : > { %v917_v35 = vpop.permute.xlu0 %916  ;;  %1324 = vst.msk [vmem:[#allocation2 + $0x78] sm:$0xff] %vm1308_vm9, %v1279_v46  ;;  %3378 = vmatprep.mubr.msk.f32.mxu0 %vm1361_vm10, %v1343_v47 }
 0x19d   : > { %961 = vst.msk [vmem:[#allocation2 + $0x80] sm:$0xff] %vm944_vm6, %v917_v35 }
 0x19e   : > { %1613 = vst.msk [vmem:[#allocation3 + $0x9] sm:$0xff] %vm1611_vm11, %v1592_v45  ;;  %1612 = vst.msk [vmem:[#allocation3 + $0x1] sm:$0xff] %vm1611_vm11, %v1591_v48 }
 0x19f   : > { %v557_v51 = vpop.permute.xlu1 %556  ;;  %1641 = vst.msk [vmem:[#allocation3 + $0xc0] sm:$0x1] %vm1632_vm12, %v3642_v36  ;;  %1642 = vst.msk [vmem:[#allocation3 + $0xd8] sm:$0x1] %vm1632_vm12, %v3642_v36 }
 0x1a0   : > { %v438_v50 = vpop.permute.xlu0 %437  ;;  %599 = vst.msk [vmem:[#allocation2 + $0x90] sm:$0xff] %vm580_vm3, %v557_v51 }
 0x1a1   : > { %479 = vst.msk [vmem:[#allocation2 + $0x98] sm:$0xff] %vm459_vm2, %v438_v50 }
 0x1a2   : > { %1643 = vst.msk [vmem:[#allocation3 + $0x11] sm:$0x1] %vm1632_vm12, %v3642_v36  ;;  %1644 = vst.msk [vmem:[#allocation3 + $0x29] sm:$0x1] %vm1632_vm12, %v3642_v36 }
 0x1a3   : > { %v1039_v53 = vpop.permute.xlu1 %1038  ;;  %v1344_v54 = vld [vmem:[#allocation2 + $0x78] sm:$0xff]  ;;  %1645 = vst.msk [vmem:[#allocation3 + $0x41] sm:$0x1] %vm1632_vm12, %v3642_v36  ;;  %1646 = vst.msk [vmem:[#allocation3 + $0x59] sm:$0x1] %vm1632_vm12, %v3642_v36 }
 0x1a4   : > { %v919_v52 = vpop.permute.xlu0 %918  ;;  %1083 = vst.msk [vmem:[#allocation2 + $0x80] sm:$0xff] %vm1066_vm7, %v1039_v53  ;;  %3379 = vmatmul.mubr.msk.f32.gmra.mrb[14].mxu0 %vm1361_vm10, %v1344_v54 }
 0x1a5   : > { %962 = vst.msk [vmem:[#allocation2 + $0x88] sm:$0xff] %vm944_vm6, %v919_v52 }
 0x1a6   : > { %1647 = vst.msk [vmem:[#allocation3 + $0x71] sm:$0x1] %vm1632_vm12, %v3642_v36  ;;  %1648 = vst.msk [vmem:[#allocation3 + $0x89] sm:$0x1] %vm1632_vm12, %v3642_v36 }
 0x1a7   : > { %v679_v57 = vpop.permute.xlu1 %678  ;;  %1649 = vst.msk [vmem:[#allocation3 + $0xa1] sm:$0x1] %vm1632_vm12, %v3642_v36  ;;  %1650 = vst.msk [vmem:[#allocation3 + $0xb9] sm:$0x1] %vm1632_vm12, %v3642_v36 }
 0x1a8   : > { %v559_v56 = vpop.permute.xlu0 %558  ;;  %721 = vst.msk [vmem:[#allocation2 + $0x90] sm:$0xff] %vm702_vm4, %v679_v57 }
 0x1a9   : > { %600 = vst.msk [vmem:[#allocation2 + $0x98] sm:$0xff] %vm580_vm3, %v559_v56 }
 0x1aa   : > { %1651 = vst.msk [vmem:[#allocation3 + $0xd1] sm:$0x1] %vm1632_vm12, %v3642_v36  ;;  %1652 = vst.msk [vmem:[#allocation3 + $0xe9] sm:$0x1] %vm1632_vm12, %v3642_v36 }
 0x1ab   : > { %v1160_v59 = vpop.permute.xlu1 %1159 }
 0x1ac   : > { %v1041_v58 = vpop.permute.xlu0 %1040  ;;  %1204 = vst.msk [vmem:[#allocation2 + $0x80] sm:$0xff] %vm1187_vm8, %v1160_v59 }
 0x1ad   : > { %1084 = vst.msk [vmem:[#allocation2 + $0x88] sm:$0xff] %vm1066_vm7, %v1041_v58 }
 0x1af   : > { %v800_v61 = vpop.permute.xlu1 %799 }
 0x1b0   : > { %v681_v60 = vpop.permute.xlu0 %680  ;;  %842 = vst.msk [vmem:[#allocation2 + $0x90] sm:$0xff] %vm823_vm5, %v800_v61 }
 0x1b1   : > { %722 = vst.msk [vmem:[#allocation2 + $0x98] sm:$0xff] %vm702_vm4, %v681_v60 }
 0x1b3   : > { %v1281_v39 = vpop.permute.xlu1 %1280 }
 0x1b4   : > { %v1162_v62 = vpop.permute.xlu0 %1161  ;;  %1325 = vst.msk [vmem:[#allocation2 + $0x80] sm:$0xff] %vm1308_vm9, %v1281_v39 }
 0x1b5   : > { %1205 = vst.msk [vmem:[#allocation2 + $0x88] sm:$0xff] %vm1187_vm8, %v1162_v62 }
 0x1b7   : > { %v3362_v0 = vpop.f32.mrb[2].mxu0  ;;  %v921_v2 = vpop.permute.xlu1 %920 }
 0x1b8   : > { %v802_v63 = vpop.permute.xlu0 %801  ;;  %v1508_v1 = vadd.f32 %v3362_v0, %v4224_v37  ;;  %v1502_v3 = vpop.f32.mrb[3].mxu0  ;;  %963 = vst.msk [vmem:[#allocation2 + $0x90] sm:$0xff] %vm944_vm6, %v921_v2 }
 0x1b9   : > { %843 = vst.msk [vmem:[#allocation2 + $0x98] sm:$0xff] %vm823_vm5, %v802_v63  ;;  %v1503_v4 = vadd.f32 %v4224_v37, %v1502_v3 }
 0x1ba   : > { %v1594_v41 = vmax.f32 %v1508_v1, 0.0 }
 0x1bb   : > { %v1593_v5 = vmax.f32 %v1503_v4, 0.0  ;;  %v1345_v7 = vld [vmem:[#allocation2 + $0x80] sm:$0xff]  ;;  %v923_v8 = vpop.permute.xlu1 %922 }
 0x1bc   : > { %v1283_v6 = vpop.permute.xlu0 %1282  ;;  %1615 = vst.msk [vmem:[#allocation3 + $0x21] sm:$0xff] %vm1611_vm11, %v1594_v41  ;;  %3381 = vmatprep.mubr.msk.f32.mxu0 %vm1361_vm10, %v1345_v7  ;;  %v3643_v41 = vmov (!%p3225_p8), 0.0  }
 0x1bd   : > { %1326 = vst.msk [vmem:[#allocation2 + $0x88] sm:$0xff] %vm1308_vm9, %v1283_v6 }
 0x1be   : > { %1614 = vst.msk [vmem:[#allocation3 + $0x19] sm:$0xff] %vm1611_vm11, %v1593_v5  ;;  %1657 = vst.msk [vmem:[#allocation3] sm:$0xff] (!%p3225_p8), %vm1611_vm11, %v3643_v41 }
 0x1bf   : > { %964 = vst.msk [vmem:[#allocation2 + $0x98] sm:$0xff] %vm944_vm6, %v923_v8  ;;  %v1045_v10 = vpop.permute.xlu1 %1044 }
 0x1c0   : > { %v1043_v9 = vpop.permute.xlu0 %1042  ;;  %1086 = vst.msk [vmem:[#allocation2 + $0x98] sm:$0xff] %vm1066_vm7, %v1045_v10 }
 0x1c1   : > { %1085 = vst.msk [vmem:[#allocation2 + $0x90] sm:$0xff] %vm1066_vm7, %v1043_v9 }
 0x1c2   : > { %1658 = vst.msk [vmem:[#allocation3 + $0x8] sm:$0xff] (!%p3225_p8), %vm1611_vm11, %v3643_v41 }
 0x1c3   : > { %v1166_v13 = vpop.permute.xlu1 %1165  ;;  %1660 = vst.msk [vmem:[#allocation3 + $0x10] sm:$0x3] (!%p3225_p8), %vm1659_vm13, %v3643_v41 }
 0x1c4   : > { %v1164_v11 = vpop.permute.xlu0 %1163  ;;  %v1346_v12 = vld [vmem:[#allocation2 + $0x88] sm:$0xff]  ;;  %1207 = vst.msk [vmem:[#allocation2 + $0x98] sm:$0xff] %vm1187_vm8, %v1166_v13 }
 0x1c5   : > { %1206 = vst.msk [vmem:[#allocation2 + $0x90] sm:$0xff] %vm1187_vm8, %v1164_v11  ;;  %3382 = vmatmul.mubr.msk.f32.gmra.mrb[16].mxu0 %vm1361_vm10, %v1346_v12 }
 0x1c7   : > { %v1287_v15 = vpop.permute.xlu1 %1286 }
 0x1c8   : > { %v1285_v14 = vpop.permute.xlu0 %1284  ;;  %1328 = vst.msk [vmem:[#allocation2 + $0x98] sm:$0xff] %vm1308_vm9, %v1287_v15 }
 0x1c9   : > { %1327 = vst.msk [vmem:[#allocation2 + $0x90] sm:$0xff] %vm1308_vm9, %v1285_v14 }
 0x1cf   : > { %v1348_v17 = vld [vmem:[#allocation2 + $0x98] sm:$0xff] }
 0x1d0   : > { %v1347_v16 = vld [vmem:[#allocation2 + $0x90] sm:$0xff] }
 0x1d1   : > { %3384 = vmatprep.mubr.msk.f32.mxu0 %vm1361_vm10, %v1347_v16 }
 0x1d2   : > { %3385 = vmatmul.mubr.msk.f32.gmra.mrb[18].mxu0 %vm1361_vm10, %v1348_v17 }
 0x1d7   : > { %v3365_v18 = vpop.f32.mrb[4].mxu0 }
 0x1d8   : > { %v1518_v49 = vadd.f32 %v3365_v18, %v4224_v37  ;;  %v1512_v19 = vpop.f32.mrb[5].mxu0 }
 0x1d9   : > { %v1513_v20 = vadd.f32 %v4224_v37, %v1512_v19 }
 0x1da   : > { %v1596_v21 = vmax.f32 %v1518_v49, 0.0 }
 0x1db   : > { %v1595_v22 = vmax.f32 %v1513_v20, 0.0 }
 0x1dc   : > { %1617 = vst.msk [vmem:[#allocation3 + $0x39] sm:$0xff] %vm1611_vm11, %v1596_v21 }
 0x1dd   : > { %1616 = vst.msk [vmem:[#allocation3 + $0x31] sm:$0xff] %vm1611_vm11, %v1595_v22 }
 0x1f7   : > { %v3368_v23 = vpop.f32.mrb[6].mxu0 }
 0x1f8   : > { %v1528_v24 = vadd.f32 %v3368_v23, %v4224_v37  ;;  %v1522_v55 = vpop.f32.mrb[7].mxu0 }
 0x1f9   : > { %v1523_v25 = vadd.f32 %v4224_v37, %v1522_v55 }
 0x1fa   : > { %v1598_v26 = vmax.f32 %v1528_v24, 0.0 }
 0x1fb   : > { %v1597_v27 = vmax.f32 %v1523_v25, 0.0 }
 0x1fc   : > { %1619 = vst.msk [vmem:[#allocation3 + $0x51] sm:$0xff] %vm1611_vm11, %v1598_v26 }
 0x1fd   : > { %1618 = vst.msk [vmem:[#allocation3 + $0x49] sm:$0xff] %vm1611_vm11, %v1597_v27 }
 0x217   : > { %v3371_v28 = vpop.f32.mrb[8].mxu0 }
 0x218   : > { %v1538_v29 = vadd.f32 %v3371_v28, %v4224_v37  ;;  %v1532_v30 = vpop.f32.mrb[9].mxu0 }
 0x219   : > { %v1533_v31 = vadd.f32 %v4224_v37, %v1532_v30 }
 0x21a   : > { %v1600_v32 = vmax.f32 %v1538_v29, 0.0 }
 0x21b   : > { %v1599_v34 = vmax.f32 %v1533_v31, 0.0 }
 0x21c   : > { %1621 = vst.msk [vmem:[#allocation3 + $0x69] sm:$0xff] %vm1611_vm11, %v1600_v32 }
 0x21d   : > { %1620 = vst.msk [vmem:[#allocation3 + $0x61] sm:$0xff] %vm1611_vm11, %v1599_v34 }
 0x237   : > { %v3374_v38 = vpop.f32.mrb[10].mxu0 }
 0x238   : > { %v1548_v33 = vadd.f32 %v3374_v38, %v4224_v37  ;;  %v1542_v40 = vpop.f32.mrb[11].mxu0 }
 0x239   : > { %v1543_v42 = vadd.f32 %v4224_v37, %v1542_v40 }
 0x23a   : > { %v1602_v43 = vmax.f32 %v1548_v33, 0.0 }
 0x23b   : > { %v1601_v44 = vmax.f32 %v1543_v42, 0.0 }
 0x23c   : > { %1623 = vst.msk [vmem:[#allocation3 + $0x81] sm:$0xff] %vm1611_vm11, %v1602_v43 }
 0x23d   : > { %1622 = vst.msk [vmem:[#allocation3 + $0x79] sm:$0xff] %vm1611_vm11, %v1601_v44 }
 0x257   : > { %v3377_v45 = vpop.f32.mrb[12].mxu0 }
 0x258   : > { %v1558_v46 = vadd.f32 %v3377_v45, %v4224_v37  ;;  %v1552_v35 = vpop.f32.mrb[13].mxu0 }
 0x259   : > { %v1553_v47 = vadd.f32 %v4224_v37, %v1552_v35 }
 0x25a   : > { %v1604_v48 = vmax.f32 %v1558_v46, 0.0 }
 0x25b   : > { %v1603_v50 = vmax.f32 %v1553_v47, 0.0 }
 0x25c   : > { %1625 = vst.msk [vmem:[#allocation3 + $0x99] sm:$0xff] %vm1611_vm11, %v1604_v48 }
 0x25d   : > { %1624 = vst.msk [vmem:[#allocation3 + $0x91] sm:$0xff] %vm1611_vm11, %v1603_v50 }
 0x277   : > { %v3380_v51 = vpop.f32.mrb[14].mxu0 }
 0x278   : > { %v1568_v52 = vadd.f32 %v3380_v51, %v4224_v37  ;;  %v1562_v53 = vpop.f32.mrb[15].mxu0 }
 0x279   : > { %v1563_v54 = vadd.f32 %v4224_v37, %v1562_v53 }
 0x27a   : > { %v1606_v56 = vmax.f32 %v1568_v52, 0.0 }
 0x27b   : > { %v1605_v57 = vmax.f32 %v1563_v54, 0.0 }
 0x27c   : > { %1627 = vst.msk [vmem:[#allocation3 + $0xb1] sm:$0xff] %vm1611_vm11, %v1606_v56 }
 0x27d   : > { %1626 = vst.msk [vmem:[#allocation3 + $0xa9] sm:$0xff] %vm1611_vm11, %v1605_v57 }
 0x298   : > { %v3383_v58 = vpop.f32.mrb[16].mxu0 }
 0x299   : > { %v1578_v59 = vadd.f32 %v3383_v58, %v4224_v37  ;;  %v1572_v60 = vpop.f32.mrb[17].mxu0 }
 0x29a   : > { %v1573_v61 = vadd.f32 %v4224_v37, %v1572_v60 }
 0x29b   : > { %v1608_v62 = vmax.f32 %v1578_v59, 0.0 }
 0x29c   : > { %v1607_v39 = vmax.f32 %v1573_v61, 0.0 }
 0x29d   : > { %1629 = vst.msk [vmem:[#allocation3 + $0xc9] sm:$0xff] %vm1611_vm11, %v1608_v62 }
 0x29e   : > { %1628 = vst.msk [vmem:[#allocation3 + $0xc1] sm:$0xff] %vm1611_vm11, %v1607_v39 }
 0x2a5   : > { %v3386_v63 = vpop.f32.mrb[18].mxu0  ;;  %1656 = sbr.rel (%p3225_p8) target bundleno = 684 (0x2ac), region = 52 }
 0x2a6   : > { %v1588_v0 = vadd.f32 %v3386_v63, %v4224_v37  ;;  %v1582_v1 = vpop.f32.mrb[19].mxu0 }
 0x2a7   : > { %v1583_v2 = vadd.f32 %v4224_v37, %v1582_v1 }
 0x2a8   : > { %v1610_v3 = vmax.f32 %v1588_v0, 0.0 }
 0x2a9   : > { %v1609_v4 = vmax.f32 %v1583_v2, 0.0 }
 0x2aa   : > { %1631 = vst.msk [vmem:[#allocation3 + $0xe1] sm:$0xff] %vm1611_vm11, %v1610_v3 }
 0x2ab   : > { %1630 = vst.msk [vmem:[#allocation3 + $0xd9] sm:$0xff] %vm1611_vm11, %v1609_v4 }
 0x2ac PF: > { %p3226_p9 = scmp.ne.s32.totalorder %s3616_s24, 1 }
 0x2ad   : > { %vm1668_vm14 = vcmask (!%p3226_p9), 58368   ;;  %v3644_v37 = vmov (!%p3226_p9), 0.0  }
 0x2ae   : > { %1664 = sbr.rel (%p3226_p9) target bundleno = 693 (0x2b5), region = 56  ;;  %1666 = vst.msk [vmem:[#allocation3 + $0xd8] sm:$0xff] (!%p3226_p9), %vm1611_vm11, %v3644_v37  ;;  %1667 = vst.msk [vmem:[#allocation3 + $0xe0] sm:$0xff] (!%p3226_p9), %vm1611_vm11, %v3644_v37 }
 0x2af   : > { %1669 = vst.msk [vmem:[#allocation3 + $0xe8] sm:$0x3] (!%p3226_p9), %vm1668_vm14, %v3644_v37 }
 0x2b5 PF: > { %v4324_v5 = vld [vmem:[#allocation3 + $0x62] sm:$0xff]  ;;  %v4334_v8 = vld [vmem:[#allocation3 + $0x78] sm:$0xff]  ;;  %v4336_v9 = vld [vmem:[#allocation3 + $0x6a] sm:$0xff]  ;;  %s3645_s24 = smov 40   ;;  %s3646_s17 = smov 48   ;;  %vm1782_vm15 = vcmask 130112  }
 0x2b6   : > { %v4326_v6 = vld [vmem:[#allocation3 + $0x61] sm:$0xff]  ;;  %1847 = vrot.lane.b32.xlu1 %v4324_v5, %s3637_s10  ;;  %v4338_v10 = vld [vmem:[#allocation3 + $0x69] sm:$0xff]  ;;  %1696 = vst.msk [vmem:[#allocation4 + $0x50] sm:$0xff] %vm1611_vm11, %v4334_v8  ;;  %v4344_v12 = vld [vmem:[#allocation3 + $0x98] sm:$0xff]  ;;  %s3647_s11 = smov 56   ;;  %s3648_s15 = smov 64  }
 0x2b7   : > { %1750 = vrot.lane.b32.xlu0 %v4326_v6, %s3634_s25  ;;  %v4332_v7 = vld [vmem:[#allocation3 + $0x80] sm:$0xff]  ;;  %v2197_v11 = vld [vmem:[#allocation3 + $0x90] sm:$0xff]  ;;  %v4351_v13 = vld [vmem:[#allocation3 + $0xa8] sm:$0xff]  ;;  %1699 = vst.msk [vmem:[#allocation4 + $0x68] sm:$0xff] %vm1611_vm11, %v4344_v12  ;;  %vm1879_vm2 = vcmask 195712   ;;  %vm1977_vm3 = vcmask 261312  }
 0x2b8   : > { %1697 = vst.msk [vmem:[#allocation4 + $0x58] sm:$0xff] %vm1611_vm11, %v4332_v7  ;;  %1698 = vst.msk [vmem:[#allocation4 + $0x60] sm:$0xff] %vm1611_vm11, %v2197_v11  ;;  %v4355_v14 = vld [vmem:[#allocation3 + $0xb0] sm:$0xff]  ;;  %v4365_v15 = vld [vmem:[#allocation3 + $0x60] sm:$0xff]  ;;  %vm2074_vm4 = vcmask 326912   ;;  %vm2171_vm5 = vcmask 392512  }
 0x2b9   : > { %1700 = vst.msk [vmem:[#allocation4 + $0x70] sm:$0xff] %vm1611_vm11, %v4351_v13  ;;  %1701 = vst.msk [vmem:[#allocation4 + $0x78] sm:$0xff] %vm1611_vm11, %v4355_v14  ;;  %v4367_v16 = vld [vmem:[#allocation3 + $0x79] sm:$0xff]  ;;  %v4371_v17 = vld [vmem:[#allocation3 + $0x68] sm:$0xff]  ;;  %vm2269_vm6 = vcmask 458112   ;;  %vm2366_vm7 = vcmask 523712  }
 0x2ba   : > { %1849 = vrot.lane.b32.xlu1 %v4336_v9, %s3637_s10  ;;  %1694 = vst.msk [vmem:[#allocation4 + $0x40] sm:$0xff] %vm1611_vm11, %v4365_v15  ;;  %1695 = vst.msk [vmem:[#allocation4 + $0x48] sm:$0xff] %vm1611_vm11, %v4371_v17  ;;  %v4379_v18 = vld [vmem:[#allocation3 + $0x20] sm:$0xff]  ;;  %v4381_v49 = vld [vmem:[#allocation3 + $0x18] sm:$0xff]  ;;  %vm2463_vm8 = vcmask 589312   ;;  %vm2512_vm9 = vcmask 588800  }
 0x2bb   : > { %1752 = vrot.lane.b32.xlu0 %v4338_v10, %s3634_s25  ;;  %v4383_v19 = vld [vmem:[#allocation3 + $0x7a] sm:$0xff]  ;;  %1688 = vst.msk [vmem:[#allocation4 + $0x10] sm:$0xff] %vm1611_vm11, %v4381_v49  ;;  %1689 = vst.msk [vmem:[#allocation4 + $0x18] sm:$0xff] %vm1611_vm11, %v4379_v18  ;;  %v4399_v21 = vld [vmem:[#allocation3 + $0x82] sm:$0xff] }
 0x2bc   : > { %v4385_v20 = vld [vmem:[#allocation3 + $0x81] sm:$0xff]  ;;  %v4401_v22 = vld [vmem:[#allocation3 + $0x30] sm:$0xff]  ;;  %v2499_v26 = vld [vmem:[%s4873_s3 + $0x18] sm:$0xff] }
 0x2bd   : > { %v2496_v23 = vld [vmem:[%s4873_s3] sm:$0xff]  ;;  %v2497_v24 = vld [vmem:[%s4873_s3 + $0x8] sm:$0xff]  ;;  %1690 = vst.msk [vmem:[#allocation4 + $0x20] sm:$0xff] %vm1611_vm11, %v4401_v22  ;;  %v2498_v25 = vld [vmem:[%s4873_s3 + $0x10] sm:$0xff] }
 0x2be   : > { %1947 = vrot.lane.b32.xlu1 %v4332_v7, %s3639_s12  ;;  %v3463_v55 = vpack.c.bf16 %v2497_v24, %v2496_v23  ;;  %v3467_v27 = vpack.c.bf16 %v2499_v26, %v2498_v25  ;;  %v2294_v28 = vld [vmem:[#allocation3 + $0x91] sm:$0xff]  ;;  %v2500_v30 = vld [vmem:[%s4873_s3 + $0x20] sm:$0xff]  ;;  %v2501_v31 = vld [vmem:[%s4873_s3 + $0x28] sm:$0xff] }
 0x2bf   : > { %1945 = vrot.lane.b32.xlu0 %v4334_v8, %s3639_s12  ;;  %v4423_v29 = vld [vmem:[#allocation3 + $0x38] sm:$0xff]  ;;  %v3471_v32 = vpack.c.bf16 %v2501_v31, %v2500_v30  ;;  %v2502_v34 = vld [vmem:[%s4873_s3 + $0x30] sm:$0xff]  ;;  %v2504_v42 = vld [vmem:[%s4873_s3 + $0x40] sm:$0xff] }
 0x2c0   : > { %3479 = vmatprep.subr.bf16.mxu1 %v3463_v55  ;;  %3464 = vmatprep.subr.bf16.mxu0 %v3463_v55  ;;  %1691 = vst.msk [vmem:[#allocation4 + $0x28] sm:$0xff] %vm1611_vm11, %v4423_v29  ;;  %v2503_v36 = vld [vmem:[%s4873_s3 + $0x38] sm:$0xff]  ;;  %v4456_v44 = vld [vmem:[#allocation3 + $0x48] sm:$0xff]  ;;  %v4466_v46 = vld [vmem:[#allocation3 + $0x50] sm:$0xff] }
 0x2c1   : > { %3484 = vmatpush3.bf16.msra.mxu1 %v3463_v55  ;;  %3466 = vmatpush3.bf16.msra.mxu0 %v3463_v55  ;;  %v3475_v38 = vpack.c.bf16 %v2503_v36, %v2502_v34  ;;  %v2391_v33 = vld [vmem:[#allocation3 + $0x92] sm:$0xff]  ;;  %v2392_v43 = vld [vmem:[#allocation3 + $0x9a] sm:$0xff]  ;;  %1692 = vst.msk [vmem:[#allocation4 + $0x30] sm:$0xff] %vm1611_vm11, %v4456_v44  ;;  %v2296_v45 = vld [vmem:[#allocation3 + $0xa9] sm:$0xff] }
 0x2c2   : > { %1754 = vrot.lane.b32.xlu1 %v4367_v16, %s3634_s25  ;;  %3480 = vmatprep.subr.bf16.mxu1 %v3467_v27  ;;  %v2295_v40 = vld [vmem:[#allocation3 + $0x99] sm:$0xff]  ;;  %1693 = vst.msk [vmem:[#allocation4 + $0x38] sm:$0xff] %vm1611_vm11, %v4466_v46  ;;  %v2393_v35 = vld [vmem:[#allocation3 + $0xaa] sm:$0xff]  ;;  %v2298_v51 = vld [vmem:[#allocation3 + $0xc1] sm:$0xff] }
 0x2c3   : > { %2042 = vrot.lane.b32.xlu0 %v4367_v16, %s3641_s13  ;;  %3468 = vmatprep.subr.bf16.mxu0 %v3467_v27  ;;  %v2297_v47 = vld [vmem:[#allocation3 + $0xb1] sm:$0xff]  ;;  %v2201_v50 = vld [vmem:[#allocation3 + $0xc0] sm:$0xff]  ;;  %v2202_v52 = vld [vmem:[#allocation3 + $0xc8] sm:$0xff] }
 0x2c4   : > { %v2394_v48 = vld [vmem:[#allocation3 + $0xb2] sm:$0xff]  ;;  %v2395_v53 = vld [vmem:[#allocation3 + $0xc2] sm:$0xff]  ;;  %v2106_v56 = vld [vmem:[#allocation3 + $0xca] sm:$0xff] }
 0x2c5   : > { %3485 = vmatpush3.bf16.msra.mxu1 %v3467_v27  ;;  %3470 = vmatpush3.bf16.msra.mxu0 %v3467_v27  ;;  %v2299_v54 = vld [vmem:[#allocation3 + $0xc9] sm:$0xff]  ;;  %v2204_v57 = vld [vmem:[#allocation3 + $0xe0] sm:$0xff]  ;;  %v2203_v58 = vld [vmem:[#allocation3 + $0xd8] sm:$0xff] }
 0x2c6   : > { %2139 = vrot.lane.b32.xlu1 %v4383_v19, %s3645_s24  ;;  %3481 = vmatprep.subr.bf16.mxu1 %v3471_v32  ;;  %v1670_v59 = vld [vmem:[#allocation3] sm:$0xff]  ;;  %v1671_v62 = vld [vmem:[#allocation3 + $0x8] sm:$0xff] }
 0x2c7   : > { %2044 = vrot.lane.b32.xlu0 %v4385_v20, %s3641_s13  ;;  %3472 = vmatprep.subr.bf16.mxu0 %v3471_v32  ;;  %1686 = vst.msk [vmem:[#allocation4] sm:$0xff] %vm1611_vm11, %v1670_v59  ;;  %1687 = vst.msk [vmem:[#allocation4 + $0x8] sm:$0xff] %vm1611_vm11, %v1671_v62  ;;  %v2301_v39 = vld [vmem:[#allocation3 + $0xe1] sm:$0xff]  ;;  %v2300_v63 = vld [vmem:[#allocation3 + $0xd9] sm:$0xff] }
 0x2c8   : > { %v2398_v2 = vld [vmem:[#allocation3 + $0xe2] sm:$0xff]  ;;  %v2397_v3 = vld [vmem:[#allocation3 + $0xda] sm:$0xff]  ;;  %v1800_v23 = vld [vmem:[#allocation3 + $0xa] sm:$0xff] }
 0x2c9   : > { %3486 = vmatpush3.bf16.msra.mxu1 %v3471_v32  ;;  %3474 = vmatpush3.bf16.msra.mxu0 %v3471_v32  ;;  %v4511_v4 = vld [vmem:[%s4875_s5] sm:$0xf] }
 0x2ca   : > { %1851 = vrot.lane.b32.xlu1 %v4383_v19, %s3637_s10  ;;  %3482 = vmatprep.subr.bf16.mxu1 %v3475_v38  ;;  %v1799_v24 = vld [vmem:[#allocation3 + $0x2] sm:$0xff]  ;;  %v2091_v32 = vld [vmem:[#allocation3 + $0x1a] sm:$0xff] }
 0x2cb   : > { %1756 = vrot.lane.b32.xlu0 %v4385_v20, %s3634_s25  ;;  %3476 = vmatprep.subr.bf16.mxu0 %v3475_v38  ;;  %v1995_v34 = vld [vmem:[#allocation3 + $0x21] sm:$0xff] }
 0x2cd   : > { %3487 = vmatpush3.bf16.msra.mxu1 %v3475_v38  ;;  %3478 = vmatpush3.bf16.msra.mxu0 %v3475_v38 }
 0x2ce   : > { %2237 = vrot.lane.b32.xlu1 %v2197_v11, %s3646_s17  ;;  %3483 = vmatprep.subr.mxu1 %v2504_v42 }
 0x2cf   : > { %2141 = vrot.lane.b32.xlu0 %v4399_v21, %s3645_s24  ;;  %3403 = vmatprep.subr.mxu0 %v2504_v42 }
 0x2d1   : > { %3488 = vmatpush3.msra.mxu1 %v2504_v42  ;;  %3404 = vmatpush3.msra.mxu0 %v2504_v42 }
 0x2d2   : > { %1949 = vrot.lane.b32.xlu1 %v2197_v11, %s3639_s12  ;;  %3429 = vmatprep.subr.msk.mxu1 %vm1422_vm1, %v4511_v4  ;;  %v1703_v11 = vld [vmem:[#allocation3 + $0x9] sm:$0xff] }
 0x2d3   : > { %1853 = vrot.lane.b32.xlu0 %v4399_v21, %s3637_s10 }
 0x2d6   : > { %2334 = vrot.lane.b32.xlu1 %v2294_v28, %s3647_s11 }
 0x2d7   : > { %2239 = vrot.lane.b32.xlu0 %v4344_v12, %s3646_s17 }
 0x2da   : > { %2046 = vrot.lane.b32.xlu1 %v2294_v28, %s3641_s13 }
 0x2db   : > { %1951 = vrot.lane.b32.xlu0 %v4344_v12, %s3639_s12  ;;  %v1702_v12 = vld [vmem:[#allocation3 + $0x1] sm:$0xff] }
 0x2de   : > { %2431 = vrot.lane.b32.xlu1 %v2391_v33, %s3648_s15 }
 0x2df   : > { %2336 = vrot.lane.b32.xlu0 %v2295_v40, %s3647_s11 }
 0x2e2   : > { %2048 = vrot.lane.b32.xlu1 %v2295_v40, %s3641_s13 }
 0x2e3   : > { %1758 = vrot.lane.b32.xlu0 %v2294_v28, %s3634_s25  ;;  %v1704_v28 = vld [vmem:[#allocation3 + $0x19] sm:$0xff] }
 0x2e6   : > { %2433 = vrot.lane.b32.xlu1 %v2392_v43, %s3648_s15 }
 0x2e7   : > { %2143 = vrot.lane.b32.xlu0 %v2391_v33, %s3645_s24 }
 0x2ea   : > { %1855 = vrot.lane.b32.xlu1 %v2391_v33, %s3637_s10  ;;  %v2092_v33 = vld [vmem:[#allocation3 + $0x22] sm:$0xff] }
 0x2eb   : > { %1760 = vrot.lane.b32.xlu0 %v2295_v40, %s3634_s25 }
 0x2ee   : > { %2241 = vrot.lane.b32.xlu1 %v4351_v13, %s3646_s17 }
 0x2ef   : > { %2145 = vrot.lane.b32.xlu0 %v2392_v43, %s3645_s24 }
 0x2f2   : > { %1953 = vrot.lane.b32.xlu1 %v4351_v13, %s3639_s12 }
 0x2f3   : > { %1857 = vrot.lane.b32.xlu0 %v2392_v43, %s3637_s10 }
 0x2f6   : > { %2338 = vrot.lane.b32.xlu1 %v2296_v45, %s3647_s11 }
 0x2f7   : > { %2243 = vrot.lane.b32.xlu0 %v4355_v14, %s3646_s17 }
 0x2fa   : > { %2050 = vrot.lane.b32.xlu1 %v2296_v45, %s3641_s13 }
 0x2fb   : > { %1955 = vrot.lane.b32.xlu0 %v4355_v14, %s3639_s12 }
 0x2fe   : > { %2435 = vrot.lane.b32.xlu1 %v2393_v35, %s3648_s15 }
 0x2ff   : > { %2340 = vrot.lane.b32.xlu0 %v2297_v47, %s3647_s11 }
 0x302   : > { %2052 = vrot.lane.b32.xlu1 %v2297_v47, %s3641_s13 }
 0x303   : > { %1762 = vrot.lane.b32.xlu0 %v2296_v45, %s3634_s25 }
 0x306   : > { %2437 = vrot.lane.b32.xlu1 %v2394_v48, %s3648_s15 }
 0x307   : > { %2147 = vrot.lane.b32.xlu0 %v2393_v35, %s3645_s24 }
 0x30a   : > { %1859 = vrot.lane.b32.xlu1 %v2393_v35, %s3637_s10  ;;  %v2286_v35 = vld [vmem:[#allocation3 + $0x31] sm:$0xff] }
 0x30b   : > { %1764 = vrot.lane.b32.xlu0 %v2297_v47, %s3634_s25 }
 0x30e   : > { %2245 = vrot.lane.b32.xlu1 %v2201_v50, %s3646_s17 }
 0x30f   : > { %2149 = vrot.lane.b32.xlu0 %v2394_v48, %s3645_s24 }
 0x312   : > { %1957 = vrot.lane.b32.xlu1 %v2201_v50, %s3639_s12 }
 0x313   : > { %1861 = vrot.lane.b32.xlu0 %v2394_v48, %s3637_s10 }
 0x316   : > { %2342 = vrot.lane.b32.xlu1 %v2298_v51, %s3647_s11 }
 0x317   : > { %2247 = vrot.lane.b32.xlu0 %v2202_v52, %s3646_s17 }
 0x31a   : > { %2054 = vrot.lane.b32.xlu1 %v2298_v51, %s3641_s13 }
 0x31b   : > { %1959 = vrot.lane.b32.xlu0 %v2202_v52, %s3639_s12 }
 0x31e   : > { %2439 = vrot.lane.b32.xlu1 %v2395_v53, %s3648_s15 }
 0x31f   : > { %2344 = vrot.lane.b32.xlu0 %v2299_v54, %s3647_s11 }
 0x322   : > { %2151 = vrot.lane.b32.xlu1 %v2395_v53, %s3645_s24  ;;  %v2287_v53 = vld [vmem:[#allocation3 + $0x39] sm:$0xff] }
 0x323   : > { %2056 = vrot.lane.b32.xlu0 %v2299_v54, %s3641_s13 }
 0x326   : > { %2153 = vrot.lane.b32.xlu1 %v2106_v56, %s3645_s24 }
 0x327   : > { %2441 = vrot.lane.b32.xlu0 %v2106_v56, %s3648_s15 }
 0x328   : > { %v1848_v60 = vpop.permute.xlu1 %1847 }
 0x329   : > { %v1751_v61 = vpop.permute.xlu0 %1750 }
 0x32a   : > { %1791 = vst.msk [vmem:[#allocation4 + $0x40] sm:$0xff] %vm1782_vm15, %v1751_v61  ;;  %2251 = vrot.lane.b32.xlu1 %v2204_v57, %s3646_s17 }
 0x32b   : > { %2249 = vrot.lane.b32.xlu0 %v2203_v58, %s3646_s17  ;;  %1888 = vst.msk [vmem:[#allocation4 + $0x40] sm:$0xff] %vm1879_vm2, %v1848_v60 }
 0x32c   : > { %v1850_v0 = vpop.permute.xlu1 %1849 }
 0x32d   : > { %v1753_v1 = vpop.permute.xlu0 %1752 }
 0x32e   : > { %1792 = vst.msk [vmem:[#allocation4 + $0x48] sm:$0xff] %vm1782_vm15, %v1753_v1  ;;  %2348 = vrot.lane.b32.xlu1 %v2301_v39, %s3647_s11 }
 0x32f   : > { %2346 = vrot.lane.b32.xlu0 %v2300_v63, %s3647_s11  ;;  %1889 = vst.msk [vmem:[#allocation4 + $0x48] sm:$0xff] %vm1879_vm2, %v1850_v0 }
 0x330   : > { %v1948_v41 = vpop.permute.xlu1 %1947 }
 0x331   : > { %v1946_v37 = vpop.permute.xlu0 %1945  ;;  %1987 = vst.msk [vmem:[#allocation4 + $0x48] sm:$0xff] %vm1977_vm3, %v1948_v41 }
 0x332   : > { %1986 = vst.msk [vmem:[#allocation4 + $0x40] sm:$0xff] %vm1977_vm3, %v1946_v37  ;;  %2445 = vrot.lane.b32.xlu1 %v2398_v2, %s3648_s15 }
 0x333   : > { %2443 = vrot.lane.b32.xlu0 %v2397_v3, %s3648_s15  ;;  %v2288_v3 = vld [vmem:[#allocation3 + $0x49] sm:$0xff] }
 0x334   : > { %v1755_v13 = vpop.permute.xlu1 %1754 }
 0x335   : > { %v2043_v14 = vpop.permute.xlu0 %2042  ;;  %1793 = vst.msk [vmem:[#allocation4 + $0x50] sm:$0xff] %vm1782_vm15, %v1755_v13  ;;  %v2289_v13 = vld [vmem:[#allocation3 + $0x51] sm:$0xff] }
 0x336   : > { %2083 = vst.msk [vmem:[#allocation4 + $0x40] sm:$0xff] %vm2074_vm4, %v2043_v14  ;;  %1736 = vrot.lane.b32.xlu1 %v1703_v11, %s3634_s25 }
 0x337   : > { %1734 = vrot.lane.b32.xlu0 %v1702_v12, %s3634_s25 }
 0x338   : > { %v2140_v55 = vpop.permute.xlu1 %2139 }
 0x339   : > { %v2045_v25 = vpop.permute.xlu0 %2044  ;;  %2180 = vst.msk [vmem:[#allocation4 + $0x40] sm:$0xff] %vm2171_vm5, %v2140_v55 }
 0x33a   : > { %2084 = vst.msk [vmem:[#allocation4 + $0x48] sm:$0xff] %vm2074_vm4, %v2045_v25  ;;  %1833 = vrot.lane.b32.xlu1 %v1800_v23, %s3637_s10 }
 0x33b   : > { %1831 = vrot.lane.b32.xlu0 %v1799_v24, %s3637_s10 }
 0x33c   : > { %v1852_v26 = vpop.permute.xlu1 %1851 }
 0x33d   : > { %v1757_v27 = vpop.permute.xlu0 %1756  ;;  %1890 = vst.msk [vmem:[#allocation4 + $0x50] sm:$0xff] %vm1879_vm2, %v1852_v26 }
 0x33e   : > { %1794 = vst.msk [vmem:[#allocation4 + $0x58] sm:$0xff] %vm1782_vm15, %v1757_v27  ;;  %1931 = vrot.lane.b32.xlu1 %v4379_v18, %s3639_s12 }
 0x33f   : > { %1929 = vrot.lane.b32.xlu0 %v4381_v49, %s3639_s12 }
 0x340   : > { %v2238_v30 = vpop.permute.xlu1 %2237 }
 0x341   : > { %v2142_v31 = vpop.permute.xlu0 %2141  ;;  %2278 = vst.msk [vmem:[#allocation4 + $0x40] sm:$0xff] %vm2269_vm6, %v2238_v30 }
 0x342   : > { %2181 = vst.msk [vmem:[#allocation4 + $0x48] sm:$0xff] %vm2171_vm5, %v2142_v31  ;;  %1738 = vrot.lane.b32.xlu1 %v1704_v28, %s3634_s25 }
 0x343   : > { %2026 = vrot.lane.b32.xlu0 %v1704_v28, %s3641_s13 }
 0x344   : > { %v1950_v36 = vpop.permute.xlu1 %1949 }
 0x345   : > { %v1854_v38 = vpop.permute.xlu0 %1853  ;;  %1988 = vst.msk [vmem:[#allocation4 + $0x50] sm:$0xff] %vm1977_vm3, %v1950_v36 }
 0x346   : > { %1891 = vst.msk [vmem:[#allocation4 + $0x58] sm:$0xff] %vm1879_vm2, %v1854_v38  ;;  %2123 = vrot.lane.b32.xlu1 %v2091_v32, %s3645_s24 }
 0x347   : > { %2028 = vrot.lane.b32.xlu0 %v1995_v34, %s3641_s13 }
 0x348   : > { %v2335_v18 = vpop.permute.xlu1 %2334 }
 0x349   : > { %v2240_v49 = vpop.permute.xlu0 %2239  ;;  %2375 = vst.msk [vmem:[#allocation4 + $0x40] sm:$0xff] %vm2366_vm7, %v2335_v18 }
 0x34a   : > { %2279 = vst.msk [vmem:[#allocation4 + $0x48] sm:$0xff] %vm2269_vm6, %v2240_v49  ;;  %1835 = vrot.lane.b32.xlu1 %v2091_v32, %s3637_s10 }
 0x34b   : > { %1740 = vrot.lane.b32.xlu0 %v1995_v34, %s3634_s25 }
 0x34c   : > { %v2047_v40 = vpop.permute.xlu1 %2046 }
 0x34d   : > { %v1952_v42 = vpop.permute.xlu0 %1951  ;;  %2085 = vst.msk [vmem:[#allocation4 + $0x50] sm:$0xff] %vm2074_vm4, %v2047_v40 }
 0x34e   : > { %1989 = vst.msk [vmem:[#allocation4 + $0x58] sm:$0xff] %vm1977_vm3, %v1952_v42  ;;  %2221 = vrot.lane.b32.xlu1 %v4401_v22, %s3646_s17 }
 0x34f   : > { %2125 = vrot.lane.b32.xlu0 %v2092_v33, %s3645_s24 }
 0x350   : > { %v2432_v43 = vpop.permute.xlu1 %2431 }
 0x351   : > { %v2337_v45 = vpop.permute.xlu0 %2336  ;;  %2472 = vst.msk [vmem:[#allocation4 + $0x40] sm:$0xff] %vm2463_vm8, %v2432_v43 }
 0x352   : > { %2376 = vst.msk [vmem:[#allocation4 + $0x48] sm:$0xff] %vm2366_vm7, %v2337_v45  ;;  %1933 = vrot.lane.b32.xlu1 %v4401_v22, %s3639_s12  ;;  %v2383_v22 = vld [vmem:[#allocation3 + $0x32] sm:$0xff] }
 0x353   : > { %1837 = vrot.lane.b32.xlu0 %v2092_v33, %s3637_s10 }
 0x354   : > { %v2049_v47 = vpop.permute.xlu1 %2048 }
 0x355   : > { %v1759_v48 = vpop.permute.xlu0 %1758  ;;  %2086 = vst.msk [vmem:[#allocation4 + $0x58] sm:$0xff] %vm2074_vm4, %v2049_v47 }
 0x356   : > { %1795 = vst.msk [vmem:[#allocation4 + $0x60] sm:$0xff] %vm1782_vm15, %v1759_v48  ;;  %2318 = vrot.lane.b32.xlu1 %v2286_v35, %s3647_s11 }
 0x357   : > { %2223 = vrot.lane.b32.xlu0 %v4423_v29, %s3646_s17 }
 0x358   : > { %v2434_v50 = vpop.permute.xlu1 %2433  ;;  %v2488_v52 = vld [vmem:[#allocation4 + $0x40] sm:$0xff] }
 0x359   : > { %v2144_v51 = vpop.permute.xlu0 %2143  ;;  %2473 = vst.msk [vmem:[#allocation4 + $0x48] sm:$0xff] %vm2463_vm8, %v2434_v50  ;;  %3417 = vmatprep.mubr.msk.f32.mxu1 %vm2512_vm9, %v2488_v52  ;;  %v3244_v52 = vld [vmem:[%s3727_s18 + $0x31] sm:$0xff] }
 0x35a   : > { %2182 = vst.msk [vmem:[#allocation4 + $0x50] sm:$0xff] %vm2171_vm5, %v2144_v51  ;;  %2030 = vrot.lane.b32.xlu1 %v2286_v35, %s3641_s13 }
 0x35b   : > { %1935 = vrot.lane.b32.xlu0 %v4423_v29, %s3639_s12  ;;  %v2384_v29 = vld [vmem:[#allocation3 + $0x3a] sm:$0xff] }
 0x35c   : > { %v1856_v54 = vpop.permute.xlu1 %1855 }
 0x35d   : > { %v1761_v56 = vpop.permute.xlu0 %1760  ;;  %1892 = vst.msk [vmem:[#allocation4 + $0x60] sm:$0xff] %vm1879_vm2, %v1856_v54  ;;  %v3248_v54 = vld [vmem:[%s3727_s18 + $0x61] sm:$0xff] }
 0x35e   : > { %1796 = vst.msk [vmem:[#allocation4 + $0x68] sm:$0xff] %vm1782_vm15, %v1761_v56  ;;  %2415 = vrot.lane.b32.xlu1 %v2383_v22, %s3648_s15 }
 0x35f   : > { %2320 = vrot.lane.b32.xlu0 %v2287_v53, %s3647_s11 }
 0x360   : > { %v2242_v57 = vpop.permute.xlu1 %2241  ;;  %v2489_v59 = vld [vmem:[#allocation4 + $0x48] sm:$0xff] }
 0x361   : > { %v2146_v58 = vpop.permute.xlu0 %2145  ;;  %2280 = vst.msk [vmem:[#allocation4 + $0x50] sm:$0xff] %vm2269_vm6, %v2242_v57  ;;  %3418 = vmatmul.mubr.msk.f32.vlgmr.msra.gmra.mrb[0].mxu1 %vm2512_vm9, %v2489_v59  ;;  %v3250_v57 = vld [vmem:[%s3727_s18 + $0x79] sm:$0xff] }
 0x362   : > { %2183 = vst.msk [vmem:[#allocation4 + $0x58] sm:$0xff] %vm2171_vm5, %v2146_v58  ;;  %2032 = vrot.lane.b32.xlu1 %v2287_v53, %s3641_s13  ;;  %3430 = vmatpush3.msk.msra.mxu1 %vm1422_vm1, %v4511_v4  ;;  %v3251_v58 = vld [vmem:[%s3727_s18 + $0x81] sm:$0xff] }
 0x363   : > { %1742 = vrot.lane.b32.xlu0 %v2286_v35, %s3634_s25 }
 0x364   : > { %v1954_v60 = vpop.permute.xlu1 %1953 }
 0x365   : > { %v1858_v61 = vpop.permute.xlu0 %1857  ;;  %1990 = vst.msk [vmem:[#allocation4 + $0x60] sm:$0xff] %vm1977_vm3, %v1954_v60  ;;  %v3252_v60 = vld [vmem:[%s3727_s18 + $0x91] sm:$0xff] }
 0x366   : > { %1893 = vst.msk [vmem:[#allocation4 + $0x68] sm:$0xff] %vm1879_vm2, %v1858_v61  ;;  %2417 = vrot.lane.b32.xlu1 %v2384_v29, %s3648_s15  ;;  %v3253_v61 = vld [vmem:[%s3727_s18 + $0x99] sm:$0xff] }
 0x367   : > { %2127 = vrot.lane.b32.xlu0 %v2383_v22, %s3645_s24 }
 0x368   : > { %v2339_v62 = vpop.permute.xlu1 %2338 }
 0x369   : > { %v2244_v39 = vpop.permute.xlu0 %2243  ;;  %2377 = vst.msk [vmem:[#allocation4 + $0x50] sm:$0xff] %vm2366_vm7, %v2339_v62 }
 0x36a   : > { %2281 = vst.msk [vmem:[#allocation4 + $0x58] sm:$0xff] %vm2269_vm6, %v2244_v39  ;;  %1839 = vrot.lane.b32.xlu1 %v2383_v22, %s3637_s10  ;;  %v3246_v22 = vld [vmem:[%s3727_s18 + $0x49] sm:$0xff] }
 0x36b   : > { %1744 = vrot.lane.b32.xlu0 %v2287_v53, %s3634_s25 }
 0x36c   : > { %v2051_v63 = vpop.permute.xlu1 %2050 }
 0x36d   : > { %v1956_v0 = vpop.permute.xlu0 %1955  ;;  %2087 = vst.msk [vmem:[#allocation4 + $0x60] sm:$0xff] %vm2074_vm4, %v2051_v63  ;;  %v3254_v63 = vld [vmem:[%s3727_s18 + $0xa9] sm:$0xff] }
 0x36e   : > { %1991 = vst.msk [vmem:[#allocation4 + $0x68] sm:$0xff] %vm1977_vm3, %v1956_v0  ;;  %2225 = vrot.lane.b32.xlu1 %v4456_v44, %s3646_s17  ;;  %v3255_v0 = vld [vmem:[%s3727_s18 + $0xb1] sm:$0xff] }
 0x36f   : > { %2129 = vrot.lane.b32.xlu0 %v2384_v29, %s3645_s24 }
 0x370   : > { %v2436_v1 = vpop.permute.xlu1 %2435 }
 0x371   : > { %v2341_v2 = vpop.permute.xlu0 %2340  ;;  %2474 = vst.msk [vmem:[#allocation4 + $0x50] sm:$0xff] %vm2463_vm8, %v2436_v1 }
 0x372   : > { %2378 = vst.msk [vmem:[#allocation4 + $0x58] sm:$0xff] %vm2366_vm7, %v2341_v2  ;;  %1937 = vrot.lane.b32.xlu1 %v4456_v44, %s3639_s12  ;;  %v2385_v44 = vld [vmem:[#allocation3 + $0x4a] sm:$0xff] }
 0x373   : > { %1841 = vrot.lane.b32.xlu0 %v2384_v29, %s3637_s10 }
 0x374   : > { %v2053_v4 = vpop.permute.xlu1 %2052 }
 0x375   : > { %v1763_v41 = vpop.permute.xlu0 %1762  ;;  %2088 = vst.msk [vmem:[#allocation4 + $0x68] sm:$0xff] %vm2074_vm4, %v2053_v4  ;;  %v3257_v4 = vld [vmem:[%s3727_s18 + $0xc9] sm:$0xff] }
 0x376   : > { %1797 = vst.msk [vmem:[#allocation4 + $0x70] sm:$0xff] %vm1782_vm15, %v1763_v41  ;;  %2322 = vrot.lane.b32.xlu1 %v2288_v3, %s3647_s11 }
 0x377   : > { %2227 = vrot.lane.b32.xlu0 %v4466_v46, %s3646_s17 }
 0x378   : > { %v2438_v37 = vpop.permute.xlu1 %2437  ;;  %v2490_v12 = vld [vmem:[#allocation4 + $0x50] sm:$0xff] }
 0x379   : > { %v2148_v11 = vpop.permute.xlu0 %2147  ;;  %2475 = vst.msk [vmem:[#allocation4 + $0x58] sm:$0xff] %vm2463_vm8, %v2438_v37  ;;  %3420 = vmatprep.mubr.msk.f32.mxu1 %vm2512_vm9, %v2490_v12  ;;  %v3259_v12 = vld [vmem:[%s3727_s18 + $0xe1] sm:$0xff] }
 0x37a   : > { %2184 = vst.msk [vmem:[#allocation4 + $0x60] sm:$0xff] %vm2171_vm5, %v2148_v11  ;;  %2034 = vrot.lane.b32.xlu1 %v2288_v3, %s3641_s13  ;;  %v3258_v11 = vld [vmem:[%s3727_s18 + $0xd9] sm:$0xff] }
 0x37b   : > { %1939 = vrot.lane.b32.xlu0 %v4466_v46, %s3639_s12  ;;  %v2386_v46 = vld [vmem:[#allocation3 + $0x52] sm:$0xff] }
 0x37c   : > { %v1860_v14 = vpop.permute.xlu1 %1859 }
 0x37d   : > { %v1765_v23 = vpop.permute.xlu0 %1764  ;;  %1894 = vst.msk [vmem:[#allocation4 + $0x70] sm:$0xff] %vm1879_vm2, %v1860_v14 }
 0x37e   : > { %1798 = vst.msk [vmem:[#allocation4 + $0x78] sm:$0xff] %vm1782_vm15, %v1765_v23  ;;  %2419 = vrot.lane.b32.xlu1 %v2385_v44, %s3648_s15 }
 0x37f   : > { %2324 = vrot.lane.b32.xlu0 %v2289_v13, %s3647_s11 }
 0x380   : > { %v2246_v24 = vpop.permute.xlu1 %2245  ;;  %v2491_v25 = vld [vmem:[#allocation4 + $0x58] sm:$0xff] }
 0x381   : > { %v2150_v55 = vpop.permute.xlu0 %2149  ;;  %2282 = vst.msk [vmem:[#allocation4 + $0x60] sm:$0xff] %vm2269_vm6, %v2246_v24  ;;  %3421 = vmatmul.mubr.msk.f32.gmra.mrb[2].mxu1 %vm2512_vm9, %v2491_v25 }
 0x382   : > { %2185 = vst.msk [vmem:[#allocation4 + $0x68] sm:$0xff] %vm2171_vm5, %v2150_v55  ;;  %2036 = vrot.lane.b32.xlu1 %v2289_v13, %s3641_s13 }
 0x383   : > { %1746 = vrot.lane.b32.xlu0 %v2288_v3, %s3634_s25  ;;  %v3256_v3 = vld [vmem:[%s3727_s18 + $0xc1] sm:$0xff] }
 0x384   : > { %v1958_v26 = vpop.permute.xlu1 %1957 }
 0x385   : > { %v1862_v27 = vpop.permute.xlu0 %1861  ;;  %1992 = vst.msk [vmem:[#allocation4 + $0x70] sm:$0xff] %vm1977_vm3, %v1958_v26 }
 0x386   : > { %1895 = vst.msk [vmem:[#allocation4 + $0x78] sm:$0xff] %vm1879_vm2, %v1862_v27  ;;  %2421 = vrot.lane.b32.xlu1 %v2386_v46, %s3648_s15 }
 0x387   : > { %2131 = vrot.lane.b32.xlu0 %v2385_v44, %s3645_s24 }
 0x388   : > { %v2343_v28 = vpop.permute.xlu1 %2342 }
 0x389   : > { %v2248_v30 = vpop.permute.xlu0 %2247  ;;  %2379 = vst.msk [vmem:[#allocation4 + $0x60] sm:$0xff] %vm2366_vm7, %v2343_v28 }
 0x38a   : > { %2283 = vst.msk [vmem:[#allocation4 + $0x68] sm:$0xff] %vm2269_vm6, %v2248_v30  ;;  %1843 = vrot.lane.b32.xlu1 %v2385_v44, %s3637_s10 }
 0x38b   : > { %1748 = vrot.lane.b32.xlu0 %v2289_v13, %s3634_s25 }
 0x38c   : > { %v2055_v31 = vpop.permute.xlu1 %2054 }
 0x38d   : > { %v1960_v32 = vpop.permute.xlu0 %1959  ;;  %2089 = vst.msk [vmem:[#allocation4 + $0x70] sm:$0xff] %vm2074_vm4, %v2055_v31 }
 0x38e   : > { %1993 = vst.msk [vmem:[#allocation4 + $0x78] sm:$0xff] %vm1977_vm3, %v1960_v32  ;;  %2229 = vrot.lane.b32.xlu1 %v4365_v15, %s3646_s17 }
 0x38f   : > { %2133 = vrot.lane.b32.xlu0 %v2386_v46, %s3645_s24 }
 0x390   : > { %v2440_v34 = vpop.permute.xlu1 %2439 }
 0x391   : > { %v2345_v36 = vpop.permute.xlu0 %2344  ;;  %2476 = vst.msk [vmem:[#allocation4 + $0x60] sm:$0xff] %vm2463_vm8, %v2440_v34 }
 0x392   : > { %2380 = vst.msk [vmem:[#allocation4 + $0x68] sm:$0xff] %vm2366_vm7, %v2345_v36  ;;  %1941 = vrot.lane.b32.xlu1 %v4365_v15, %s3639_s12 }
 0x393   : > { %1845 = vrot.lane.b32.xlu0 %v2386_v46, %s3637_s10 }
 0x394   : > { %v2152_v38 = vpop.permute.xlu1 %2151 }
 0x395   : > { %v2057_v18 = vpop.permute.xlu0 %2056  ;;  %2186 = vst.msk [vmem:[#allocation4 + $0x70] sm:$0xff] %vm2171_vm5, %v2152_v38 }
 0x396   : > { %2090 = vst.msk [vmem:[#allocation4 + $0x78] sm:$0xff] %vm2074_vm4, %v2057_v18  ;;  %2326 = vrot.lane.b32.xlu1 %v4326_v6, %s3647_s11 }
 0x397   : > { %2231 = vrot.lane.b32.xlu0 %v4371_v17, %s3646_s17 }
 0x398   : > { %v2154_v49 = vpop.permute.xlu1 %2153  ;;  %v2492_v40 = vld [vmem:[#allocation4 + $0x60] sm:$0xff] }
 0x399   : > { %v2442_v33 = vpop.permute.xlu0 %2441  ;;  %2187 = vst.msk [vmem:[#allocation4 + $0x78] sm:$0xff] %vm2171_vm5, %v2154_v49  ;;  %3423 = vmatprep.mubr.msk.f32.mxu1 %vm2512_vm9, %v2492_v40 }
 0x39a   : > { %2477 = vst.msk [vmem:[#allocation4 + $0x68] sm:$0xff] %vm2463_vm8, %v2442_v33  ;;  %2038 = vrot.lane.b32.xlu1 %v4326_v6, %s3641_s13 }
 0x39b   : > { %1943 = vrot.lane.b32.xlu0 %v4371_v17, %s3639_s12 }
 0x39c   : > { %v2252_v15 = vpop.permute.xlu1 %2251 }
 0x39d   : > { %v2250_v42 = vpop.permute.xlu0 %2249  ;;  %2285 = vst.msk [vmem:[#allocation4 + $0x78] sm:$0xff] %vm2269_vm6, %v2252_v15 }
 0x39e   : > { %2284 = vst.msk [vmem:[#allocation4 + $0x70] sm:$0xff] %vm2269_vm6, %v2250_v42  ;;  %2423 = vrot.lane.b32.xlu1 %v4324_v5, %s3648_s15 }
 0x39f   : > { %2328 = vrot.lane.b32.xlu0 %v4338_v10, %s3647_s11 }
 0x3a0   : > { %v2349_v43 = vpop.permute.xlu1 %2348 }
 0x3a1   : > { %v2347_v45 = vpop.permute.xlu0 %2346  ;;  %v2493_v35 = vld [vmem:[#allocation4 + $0x68] sm:$0xff]  ;;  %2382 = vst.msk [vmem:[#allocation4 + $0x78] sm:$0xff] %vm2366_vm7, %v2349_v43 }
 0x3a2   : > { %2381 = vst.msk [vmem:[#allocation4 + $0x70] sm:$0xff] %vm2366_vm7, %v2347_v45  ;;  %3424 = vmatmul.mubr.msk.f32.gmra.mrb[4].mxu1 %vm2512_vm9, %v2493_v35  ;;  %2135 = vrot.lane.b32.xlu1 %v4324_v5, %s3645_s24 }
 0x3a3   : > { %2040 = vrot.lane.b32.xlu0 %v4338_v10, %s3641_s13 }
 0x3a4   : > { %v2446_v6 = vpop.permute.xlu1 %2445 }
 0x3a5   : > { %v2444_v17 = vpop.permute.xlu0 %2443  ;;  %2479 = vst.msk [vmem:[#allocation4 + $0x78] sm:$0xff] %vm2463_vm8, %v2446_v6 }
 0x3a6   : > { %2478 = vst.msk [vmem:[#allocation4 + $0x70] sm:$0xff] %vm2463_vm8, %v2444_v17  ;;  %2137 = vrot.lane.b32.xlu1 %v4336_v9, %s3645_s24 }
 0x3a7   : > { %2425 = vrot.lane.b32.xlu0 %v4336_v9, %s3648_s15 }
 0x3a8   : > { %v1737_v47 = vpop.permute.xlu1 %1736 }
 0x3a9   : > { %v1735_v48 = vpop.permute.xlu0 %1734  ;;  %1784 = vst.msk [vmem:[#allocation4 + $0x8] sm:$0xff] %vm1782_vm15, %v1737_v47 }
 0x3aa   : > { %1783 = vst.msk [vmem:[#allocation4] sm:$0xff] %vm1782_vm15, %v1735_v48  ;;  %2235 = vrot.lane.b32.xlu1 %v4332_v7, %s3646_s17  ;;  %v3245_v7 = vld [vmem:[%s3727_s18 + $0x39] sm:$0xff] }
 0x3ab   : > { %2233 = vrot.lane.b32.xlu0 %v4334_v8, %s3646_s17 }
 0x3ac   : > { %v1834_v5 = vpop.permute.xlu1 %1833  ;;  %v2495_v51 = vld [vmem:[#allocation4 + $0x78] sm:$0xff] }
 0x3ad   : > { %v1832_v10 = vpop.permute.xlu0 %1831  ;;  %v2494_v50 = vld [vmem:[#allocation4 + $0x70] sm:$0xff]  ;;  %1881 = vst.msk [vmem:[#allocation4 + $0x8] sm:$0xff] %vm1879_vm2, %v1834_v5 }
 0x3ae   : > { %1880 = vst.msk [vmem:[#allocation4] sm:$0xff] %vm1879_vm2, %v1832_v10  ;;  %3426 = vmatprep.mubr.msk.f32.mxu1 %vm2512_vm9, %v2494_v50  ;;  %2332 = vrot.lane.b32.xlu1 %v4385_v20, %s3647_s11 }
 0x3af   : > { %2330 = vrot.lane.b32.xlu0 %v4367_v16, %s3647_s11  ;;  %3427 = vmatmul.mubr.msk.f32.gmra.mrb[6].mxu1 %vm2512_vm9, %v2495_v51  ;;  %v3247_v16 = vld [vmem:[%s3727_s18 + $0x51] sm:$0xff] }
 0x3b0   : > { %3431 = vmatprep.mubr.msk.f32.mxu1 %vm338_vm0, %v3244_v52  ;;  %v1932_v8 = vpop.permute.xlu1 %1931 }
 0x3b1   : > { %v1930_v9 = vpop.permute.xlu0 %1929  ;;  %1979 = vst.msk [vmem:[#allocation4 + $0x8] sm:$0xff] %vm1977_vm3, %v1932_v8 }
 0x3b2   : > { %1978 = vst.msk [vmem:[#allocation4] sm:$0xff] %vm1977_vm3, %v1930_v9  ;;  %2429 = vrot.lane.b32.xlu1 %v4399_v21, %s3648_s15 }
 0x3b3   : > { %2427 = vrot.lane.b32.xlu0 %v4383_v19, %s3648_s15  ;;  %3432 = vmatmul.mubr.msk.f32.vlgmr.msra.gmra.mrb[8].mxu1 %vm338_vm0, %v3245_v7  ;;  %v3249_v19 = vld [vmem:[%s3727_s18 + $0x69] sm:$0xff] }
 0x3b4   : > { %3434 = vmatprep.mubr.msk.f32.mxu1 %vm338_vm0, %v3246_v22  ;;  %v1739_v20 = vpop.permute.xlu1 %1738 }
 0x3b5   : > { %v2027_v53 = vpop.permute.xlu0 %2026  ;;  %1785 = vst.msk [vmem:[#allocation4 + $0x10] sm:$0xff] %vm1782_vm15, %v1739_v20 }
 0x3b6   : > { %2075 = vst.msk [vmem:[#allocation4] sm:$0xff] %vm2074_vm4, %v2027_v53 }
 0x3b7   : > { %3435 = vmatmul.mubr.msk.f32.gmra.mrb[10].mxu1 %vm338_vm0, %v3247_v16 }
 0x3b8   : > { %3437 = vmatprep.mubr.msk.f32.mxu1 %vm338_vm0, %v3248_v54  ;;  %v2124_v56 = vpop.permute.xlu1 %2123 }
 0x3b9   : > { %v2029_v21 = vpop.permute.xlu0 %2028  ;;  %2172 = vst.msk [vmem:[#allocation4] sm:$0xff] %vm2171_vm5, %v2124_v56 }
 0x3ba   : > { %2076 = vst.msk [vmem:[#allocation4 + $0x8] sm:$0xff] %vm2074_vm4, %v2029_v21 }
 0x3bb   : > { %3438 = vmatmul.mubr.msk.f32.gmra.mrb[12].mxu1 %vm338_vm0, %v3249_v19 }
 0x3bc   : > { %3440 = vmatprep.mubr.msk.f32.mxu1 %vm338_vm0, %v3250_v57  ;;  %v1836_v59 = vpop.permute.xlu1 %1835 }
 0x3bd   : > { %v1741_v29 = vpop.permute.xlu0 %1740  ;;  %1882 = vst.msk [vmem:[#allocation4 + $0x10] sm:$0xff] %vm1879_vm2, %v1836_v59 }
 0x3be   : > { %1786 = vst.msk [vmem:[#allocation4 + $0x18] sm:$0xff] %vm1782_vm15, %v1741_v29 }
 0x3bf   : > { %3441 = vmatmul.mubr.msk.f32.gmra.mrb[14].mxu1 %vm338_vm0, %v3251_v58 }
 0x3c0   : > { %3443 = vmatprep.mubr.msk.f32.mxu1 %vm338_vm0, %v3252_v60  ;;  %v2222_v62 = vpop.permute.xlu1 %2221 }
 0x3c1   : > { %v2126_v39 = vpop.permute.xlu0 %2125  ;;  %2270 = vst.msk [vmem:[#allocation4] sm:$0xff] %vm2269_vm6, %v2222_v62 }
 0x3c2   : > { %2173 = vst.msk [vmem:[#allocation4 + $0x8] sm:$0xff] %vm2171_vm5, %v2126_v39 }
 0x3c3   : > { %3444 = vmatmul.mubr.msk.f32.gmra.mrb[0].mxu1 %vm338_vm0, %v3253_v61 }
 0x3c4   : > { %3446 = vmatprep.mubr.msk.f32.mxu1 %vm338_vm0, %v3254_v63  ;;  %v1934_v1 = vpop.permute.xlu1 %1933 }
 0x3c5   : > { %v1838_v2 = vpop.permute.xlu0 %1837  ;;  %1980 = vst.msk [vmem:[#allocation4 + $0x10] sm:$0xff] %vm1977_vm3, %v1934_v1 }
 0x3c6   : > { %1883 = vst.msk [vmem:[#allocation4 + $0x18] sm:$0xff] %vm1879_vm2, %v1838_v2 }
 0x3c7   : > { %3447 = vmatmul.mubr.msk.f32.gmra.mrb[2].mxu1 %vm338_vm0, %v3255_v0 }
 0x3c8   : > { %3449 = vmatprep.mubr.msk.f32.mxu1 %vm338_vm0, %v3256_v3  ;;  %v2319_v41 = vpop.permute.xlu1 %2318 }
 0x3c9   : > { %v2224_v37 = vpop.permute.xlu0 %2223  ;;  %2367 = vst.msk [vmem:[#allocation4] sm:$0xff] %vm2366_vm7, %v2319_v41  ;;  %v4790_v41 = vld [vmem:[%s4874_s4] ss:$0 sm:$0xff] }
 0x3ca   : > { %2271 = vst.msk [vmem:[#allocation4 + $0x8] sm:$0xff] %vm2269_vm6, %v2224_v37  ;;  %v4795_v37 = vld [vmem:[%s4876_s6] ss:$0 sm:$0xff] }
 0x3cb   : > { %3450 = vmatmul.mubr.msk.f32.gmra.mrb[4].mxu1 %vm338_vm0, %v3257_v4 }
 0x3cc   : > { %3452 = vmatprep.mubr.msk.f32.mxu1 %vm338_vm0, %v3258_v11  ;;  %v2031_v44 = vpop.permute.xlu1 %2030 }
 0x3cd   : > { %v1936_v13 = vpop.permute.xlu0 %1935  ;;  %2077 = vst.msk [vmem:[#allocation4 + $0x10] sm:$0xff] %vm2074_vm4, %v2031_v44  ;;  %v3515_v44 = vadd.f32 %v4795_v37, %v4790_v41 }
 0x3ce   : > { %1981 = vst.msk [vmem:[#allocation4 + $0x18] sm:$0xff] %vm1977_vm3, %v1936_v13 }
 0x3cf   : > { %3453 = vmatmul.mubr.msk.f32.gmra.mrb[6].mxu1 %vm338_vm0, %v3259_v12 }
 0x3d0   : > { %v2416_v14 = vpop.permute.xlu1 %2415 }
 0x3d1   : > { %v2321_v23 = vpop.permute.xlu0 %2320  ;;  %2464 = vst.msk [vmem:[#allocation4] sm:$0xff] %vm2463_vm8, %v2416_v14 }
 0x3d2   : > { %2368 = vst.msk [vmem:[#allocation4 + $0x8] sm:$0xff] %vm2366_vm7, %v2321_v23 }
 0x3d4   : > { %v2033_v24 = vpop.permute.xlu1 %2032 }
 0x3d5   : > { %v1743_v55 = vpop.permute.xlu0 %1742  ;;  %2078 = vst.msk [vmem:[#allocation4 + $0x18] sm:$0xff] %vm2074_vm4, %v2033_v24 }
 0x3d6   : > { %1787 = vst.msk [vmem:[#allocation4 + $0x20] sm:$0xff] %vm1782_vm15, %v1743_v55 }
 0x3d8   : > { %v2418_v25 = vpop.permute.xlu1 %2417  ;;  %v2480_v26 = vld [vmem:[#allocation4] sm:$0xff] }
 0x3d9   : > { %v2128_v46 = vpop.permute.xlu0 %2127  ;;  %2465 = vst.msk [vmem:[#allocation4 + $0x8] sm:$0xff] %vm2463_vm8, %v2418_v25  ;;  %3405 = vmatprep.mubr.msk.f32.mxu0 %vm2512_vm9, %v2480_v26 }
 0x3da   : > { %2174 = vst.msk [vmem:[#allocation4 + $0x10] sm:$0xff] %vm2171_vm5, %v2128_v46 }
 0x3dc   : > { %v1840_v27 = vpop.permute.xlu1 %1839 }
 0x3dd   : > { %v1745_v28 = vpop.permute.xlu0 %1744  ;;  %1884 = vst.msk [vmem:[#allocation4 + $0x20] sm:$0xff] %vm1879_vm2, %v1840_v27 }
 0x3de   : > { %1788 = vst.msk [vmem:[#allocation4 + $0x28] sm:$0xff] %vm1782_vm15, %v1745_v28 }
 0x3e0   : > { %v2226_v30 = vpop.permute.xlu1 %2225  ;;  %v2481_v32 = vld [vmem:[#allocation4 + $0x8] sm:$0xff] }
 0x3e1   : > { %v2130_v31 = vpop.permute.xlu0 %2129  ;;  %2272 = vst.msk [vmem:[#allocation4 + $0x10] sm:$0xff] %vm2269_vm6, %v2226_v30  ;;  %3406 = vmatmul.mubr.msk.f32.vlgmr.msra.gmra.mrb[20].mxu0 %vm2512_vm9, %v2481_v32 }
 0x3e2   : > { %2175 = vst.msk [vmem:[#allocation4 + $0x18] sm:$0xff] %vm2171_vm5, %v2130_v31 }
 0x3e4   : > { %v1938_v34 = vpop.permute.xlu1 %1937 }
 0x3e5   : > { %v1842_v36 = vpop.permute.xlu0 %1841  ;;  %1982 = vst.msk [vmem:[#allocation4 + $0x20] sm:$0xff] %vm1977_vm3, %v1938_v34 }
 0x3e6   : > { %1885 = vst.msk [vmem:[#allocation4 + $0x28] sm:$0xff] %vm1879_vm2, %v1842_v36 }
 0x3e8   : > { %v2323_v38 = vpop.permute.xlu1 %2322 }
 0x3e9   : > { %v2228_v18 = vpop.permute.xlu0 %2227  ;;  %2369 = vst.msk [vmem:[#allocation4 + $0x10] sm:$0xff] %vm2366_vm7, %v2323_v38 }
 0x3ea   : > { %2273 = vst.msk [vmem:[#allocation4 + $0x18] sm:$0xff] %vm2269_vm6, %v2228_v18 }
 0x3ec   : > { %v2035_v49 = vpop.permute.xlu1 %2034 }
 0x3ed   : > { %v1940_v33 = vpop.permute.xlu0 %1939  ;;  %2079 = vst.msk [vmem:[#allocation4 + $0x20] sm:$0xff] %vm2074_vm4, %v2035_v49 }
 0x3ee   : > { %1983 = vst.msk [vmem:[#allocation4 + $0x28] sm:$0xff] %vm1977_vm3, %v1940_v33 }
 0x3f0   : > { %v2420_v40 = vpop.permute.xlu1 %2419 }
 0x3f1   : > { %v2325_v15 = vpop.permute.xlu0 %2324  ;;  %2466 = vst.msk [vmem:[#allocation4 + $0x10] sm:$0xff] %vm2463_vm8, %v2420_v40 }
 0x3f2   : > { %2370 = vst.msk [vmem:[#allocation4 + $0x18] sm:$0xff] %vm2366_vm7, %v2325_v15 }
 0x3f4   : > { %v2037_v42 = vpop.permute.xlu1 %2036 }
 0x3f5   : > { %v1747_v43 = vpop.permute.xlu0 %1746  ;;  %2080 = vst.msk [vmem:[#allocation4 + $0x28] sm:$0xff] %vm2074_vm4, %v2037_v42 }
 0x3f6   : > { %1789 = vst.msk [vmem:[#allocation4 + $0x30] sm:$0xff] %vm1782_vm15, %v1747_v43 }
 0x3f8   : > { %v2422_v45 = vpop.permute.xlu1 %2421  ;;  %v2482_v6 = vld [vmem:[#allocation4 + $0x10] sm:$0xff] }
 0x3f9   : > { %v2132_v35 = vpop.permute.xlu0 %2131  ;;  %2467 = vst.msk [vmem:[#allocation4 + $0x18] sm:$0xff] %vm2463_vm8, %v2422_v45  ;;  %3408 = vmatprep.mubr.msk.f32.mxu0 %vm2512_vm9, %v2482_v6 }
 0x3fa   : > { %2176 = vst.msk [vmem:[#allocation4 + $0x20] sm:$0xff] %vm2171_vm5, %v2132_v35 }
 0x3fc   : > { %v1844_v47 = vpop.permute.xlu1 %1843 }
 0x3fd   : > { %v1749_v17 = vpop.permute.xlu0 %1748  ;;  %1886 = vst.msk [vmem:[#allocation4 + $0x30] sm:$0xff] %vm1879_vm2, %v1844_v47 }
 0x3fe   : > { %1790 = vst.msk [vmem:[#allocation4 + $0x38] sm:$0xff] %vm1782_vm15, %v1749_v17 }
 0x400   : > { %v2230_v5 = vpop.permute.xlu1 %2229  ;;  %v2483_v10 = vld [vmem:[#allocation4 + $0x18] sm:$0xff] }
 0x401   : > { %v2134_v48 = vpop.permute.xlu0 %2133  ;;  %2274 = vst.msk [vmem:[#allocation4 + $0x20] sm:$0xff] %vm2269_vm6, %v2230_v5  ;;  %3409 = vmatmul.mubr.msk.f32.gmra.mrb[22].mxu0 %vm2512_vm9, %v2483_v10 }
 0x402   : > { %2177 = vst.msk [vmem:[#allocation4 + $0x28] sm:$0xff] %vm2171_vm5, %v2134_v48 }
 0x404   : > { %v1942_v51 = vpop.permute.xlu1 %1941 }
 0x405   : > { %v1846_v50 = vpop.permute.xlu0 %1845  ;;  %1984 = vst.msk [vmem:[#allocation4 + $0x30] sm:$0xff] %vm1977_vm3, %v1942_v51 }
 0x406   : > { %1887 = vst.msk [vmem:[#allocation4 + $0x38] sm:$0xff] %vm1879_vm2, %v1846_v50 }
 0x408   : > { %v2327_v7 = vpop.permute.xlu1 %2326 }
 0x409   : > { %v2232_v52 = vpop.permute.xlu0 %2231  ;;  %2371 = vst.msk [vmem:[#allocation4 + $0x20] sm:$0xff] %vm2366_vm7, %v2327_v7 }
 0x40a   : > { %2275 = vst.msk [vmem:[#allocation4 + $0x28] sm:$0xff] %vm2269_vm6, %v2232_v52 }
 0x40c   : > { %v2039_v9 = vpop.permute.xlu1 %2038 }
 0x40d   : > { %v1944_v8 = vpop.permute.xlu0 %1943  ;;  %2081 = vst.msk [vmem:[#allocation4 + $0x30] sm:$0xff] %vm2074_vm4, %v2039_v9 }
 0x40e   : > { %1985 = vst.msk [vmem:[#allocation4 + $0x38] sm:$0xff] %vm1977_vm3, %v1944_v8 }
 0x410   : > { %v2424_v16 = vpop.permute.xlu1 %2423 }
 0x411   : > { %v2329_v22 = vpop.permute.xlu0 %2328  ;;  %2468 = vst.msk [vmem:[#allocation4 + $0x20] sm:$0xff] %vm2463_vm8, %v2424_v16 }
 0x412   : > { %2372 = vst.msk [vmem:[#allocation4 + $0x28] sm:$0xff] %vm2366_vm7, %v2329_v22 }
 0x414   : > { %v2136_v53 = vpop.permute.xlu1 %2135 }
 0x415   : > { %v2041_v20 = vpop.permute.xlu0 %2040  ;;  %2178 = vst.msk [vmem:[#allocation4 + $0x30] sm:$0xff] %vm2171_vm5, %v2136_v53 }
 0x416   : > { %2082 = vst.msk [vmem:[#allocation4 + $0x38] sm:$0xff] %vm2074_vm4, %v2041_v20 }
 0x418   : > { %v2138_v19 = vpop.permute.xlu1 %2137  ;;  %v2484_v56 = vld [vmem:[#allocation4 + $0x20] sm:$0xff] }
 0x419   : > { %v2426_v54 = vpop.permute.xlu0 %2425  ;;  %2179 = vst.msk [vmem:[#allocation4 + $0x38] sm:$0xff] %vm2171_vm5, %v2138_v19  ;;  %3411 = vmatprep.mubr.msk.f32.mxu0 %vm2512_vm9, %v2484_v56 }
 0x41a   : > { %2469 = vst.msk [vmem:[#allocation4 + $0x28] sm:$0xff] %vm2463_vm8, %v2426_v54 }
 0x41c   : > { %v2236_v57 = vpop.permute.xlu1 %2235 }
 0x41d   : > { %v2234_v21 = vpop.permute.xlu0 %2233  ;;  %2277 = vst.msk [vmem:[#allocation4 + $0x38] sm:$0xff] %vm2269_vm6, %v2236_v57 }
 0x41e   : > { %2276 = vst.msk [vmem:[#allocation4 + $0x30] sm:$0xff] %vm2269_vm6, %v2234_v21 }
 0x420   : > { %v2333_v29 = vpop.permute.xlu1 %2332 }
 0x421   : > { %v2331_v58 = vpop.permute.xlu0 %2330  ;;  %v2485_v59 = vld [vmem:[#allocation4 + $0x28] sm:$0xff]  ;;  %2374 = vst.msk [vmem:[#allocation4 + $0x38] sm:$0xff] %vm2366_vm7, %v2333_v29 }
 0x422   : > { %2373 = vst.msk [vmem:[#allocation4 + $0x30] sm:$0xff] %vm2366_vm7, %v2331_v58  ;;  %3412 = vmatmul.mubr.msk.f32.gmra.mrb[24].mxu0 %vm2512_vm9, %v2485_v59 }
 0x424   : > { %v2430_v61 = vpop.permute.xlu1 %2429 }
 0x425   : > { %v2428_v60 = vpop.permute.xlu0 %2427  ;;  %2471 = vst.msk [vmem:[#allocation4 + $0x38] sm:$0xff] %vm2463_vm8, %v2430_v61 }
 0x426   : > { %2470 = vst.msk [vmem:[#allocation4 + $0x30] sm:$0xff] %vm2463_vm8, %v2428_v60 }
 0x42c   : > { %v2487_v39 = vld [vmem:[#allocation4 + $0x38] sm:$0xff] }
 0x42d   : > { %v2486_v62 = vld [vmem:[#allocation4 + $0x30] sm:$0xff] }
 0x42e   : > { %3414 = vmatprep.mubr.msk.f32.mxu0 %vm2512_vm9, %v2486_v62 }
 0x42f   : > { %3415 = vmatmul.mubr.msk.f32.gmra.mrb[26].mxu0 %vm2512_vm9, %v2487_v39 }
 0x486   : > { %v3433_v63 = vpop.f32.mrb[8].mxu1 }
 0x487   : > { %v2847_v0 = vpop.f32.mrb[9].mxu1 }
 0x48a   : > { %v3436_v1 = vpop.f32.mrb[10].mxu1 }
 0x48b   : > { %v2857_v2 = vpop.f32.mrb[11].mxu1 }
 0x48e   : > { %v4783_v3 = vpop.f32.mrb[12].mxu1 }
 0x48f   : > { %v4785_v4 = vpop.f32.mrb[13].mxu1 }
 0x492   : > { %v4797_v11 = vpop.f32.mrb[14].mxu1 }
 0x493   : > { %v4799_v12 = vpop.f32.mrb[15].mxu1 }
 0x496   : > { %v3445_v13 = vpop.f32.mrb[0].mxu1 }
 0x497   : > { %v3514_v14 = vadd.f32 %v3515_v44, %v3445_v13  ;;  %v2887_v23 = vpop.f32.mrb[1].mxu1 }
 0x498   : > { %v3516_v24 = vadd.f32 %v3515_v44, %v2887_v23 }
 0x499   : > { %v2951_v55 = vmax.f32 %v3514_v14, 0.0 }
 0x49a   : > { %v2950_v25 = vmax.f32 %v3516_v24, 0.0  ;;  %v3448_v46 = vpop.f32.mrb[2].mxu1 }
 0x49b   : > { %2967 = vst.msk [vmem:[%s3734_s23 + $0x48] sm:$0xff] %vm1611_vm11, %v2951_v55  ;;  %v3518_v26 = vadd.f32 %v3515_v44, %v3448_v46  ;;  %v2897_v27 = vpop.f32.mrb[3].mxu1 }
 0x49c   : > { %2966 = vst.msk [vmem:[%s3734_s23 + $0x40] sm:$0xff] %vm1611_vm11, %v2950_v25  ;;  %v3520_v28 = vadd.f32 %v3515_v44, %v2897_v27 }
 0x49d   : > { %v2953_v30 = vmax.f32 %v3518_v26, 0.0 }
 0x49e   : > { %v2952_v31 = vmax.f32 %v3520_v28, 0.0  ;;  %v3451_v32 = vpop.f32.mrb[4].mxu1 }
 0x49f   : > { %2969 = vst.msk [vmem:[%s3734_s23 + $0x58] sm:$0xff] %vm1611_vm11, %v2953_v30  ;;  %v3522_v34 = vadd.f32 %v3515_v44, %v3451_v32  ;;  %v2907_v36 = vpop.f32.mrb[5].mxu1 }
 0x4a0   : > { %2968 = vst.msk [vmem:[%s3734_s23 + $0x50] sm:$0xff] %vm1611_vm11, %v2952_v31  ;;  %v3524_v38 = vadd.f32 %v3515_v44, %v2907_v36 }
 0x4a1   : > { %v2955_v18 = vmax.f32 %v3522_v34, 0.0 }
 0x4a2   : > { %v2954_v49 = vmax.f32 %v3524_v38, 0.0  ;;  %v3454_v33 = vpop.f32.mrb[6].mxu1 }
 0x4a3   : > { %2971 = vst.msk [vmem:[%s3734_s23 + $0x68] sm:$0xff] %vm1611_vm11, %v2955_v18  ;;  %v3526_v40 = vadd.f32 %v3515_v44, %v3454_v33  ;;  %v2917_v15 = vpop.f32.mrb[7].mxu1 }
 0x4a4   : > { %2970 = vst.msk [vmem:[%s3734_s23 + $0x60] sm:$0xff] %vm1611_vm11, %v2954_v49  ;;  %v3528_v42 = vadd.f32 %v3515_v44, %v2917_v15 }
 0x4a5   : > { %v2957_v43 = vmax.f32 %v3526_v40, 0.0 }
 0x4a6   : > { %v2956_v45 = vmax.f32 %v3528_v42, 0.0 }
 0x4a7   : > { %2973 = vst.msk [vmem:[%s3734_s23 + $0x78] sm:$0xff] %vm1611_vm11, %v2957_v43 }
 0x4a8   : > { %2972 = vst.msk [vmem:[%s3734_s23 + $0x70] sm:$0xff] %vm1611_vm11, %v2956_v45 }
 0x4b4   : > { %v3407_v35 = vpop.f32.mrb[20].mxu0 }
 0x4b5   : > { %v2633_v6 = vadd.f32 %v3407_v35, %v4790_v41  ;;  %v2627_v17 = vpop.f32.mrb[21].mxu0 }
 0x4b6   : > { %v2628_v47 = vadd.f32 %v4790_v41, %v2627_v17 }
 0x4b7   : > { %v3490_v48 = vadd.f32 %v3433_v63, %v2633_v6 }
 0x4b8   : > { %v3493_v5 = vadd.f32 %v2847_v0, %v2628_v47 }
 0x4b9   : > { %v3491_v10 = vadd.f32 %v3490_v48, %v4795_v37 }
 0x4ba   : > { %v3494_v50 = vadd.f32 %v3493_v5, %v4795_v37 }
 0x4bb   : > { %v2943_v51 = vmax.f32 %v3491_v10, 0.0 }
 0x4bc   : > { %v2942_v52 = vmax.f32 %v3494_v50, 0.0 }
 0x4bd   : > { %2959 = vst.msk [vmem:[%s3734_s23 + $0x8] sm:$0xff] %vm1611_vm11, %v2943_v51 }
 0x4be   : > { %2958 = vst.msk [vmem:[%s3734_s23] sm:$0xff] %vm1611_vm11, %v2942_v52 }
 0x4d4   : > { %v3410_v7 = vpop.f32.mrb[22].mxu0 }
 0x4d5   : > { %v2643_v8 = vadd.f32 %v3410_v7, %v4790_v41  ;;  %v2637_v9 = vpop.f32.mrb[23].mxu0 }
 0x4d6   : > { %v2638_v22 = vadd.f32 %v4790_v41, %v2637_v9 }
 0x4d7   : > { %v3496_v16 = vadd.f32 %v4795_v37, %v2643_v8 }
 0x4d8   : > { %v3499_v20 = vadd.f32 %v4795_v37, %v2638_v22 }
 0x4d9   : > { %v3497_v53 = vadd.f32 %v3496_v16, %v3436_v1 }
 0x4da   : > { %v3500_v54 = vadd.f32 %v3499_v20, %v2857_v2 }
 0x4db   : > { %v2945_v19 = vmax.f32 %v3497_v53, 0.0 }
 0x4dc   : > { %v2944_v56 = vmax.f32 %v3500_v54, 0.0 }
 0x4dd   : > { %2961 = vst.msk [vmem:[%s3734_s23 + $0x18] sm:$0xff] %vm1611_vm11, %v2945_v19 }
 0x4de   : > { %2960 = vst.msk [vmem:[%s3734_s23 + $0x10] sm:$0xff] %vm1611_vm11, %v2944_v56 }
 0x4f5   : > { %v3413_v21 = vpop.f32.mrb[24].mxu0 }
 0x4f6   : > { %v2653_v57 = vadd.f32 %v3413_v21, %v4790_v41  ;;  %v2647_v58 = vpop.f32.mrb[25].mxu0 }
 0x4f7   : > { %v2648_v59 = vadd.f32 %v4790_v41, %v2647_v58 }
 0x4f8   : > { %v3502_v29 = vadd.f32 %v4795_v37, %v2653_v57 }
 0x4f9   : > { %v3505_v60 = vadd.f32 %v4795_v37, %v2648_v59 }
 0x4fa   : > { %v3503_v61 = vadd.f32 %v3502_v29, %v4783_v3 }
 0x4fb   : > { %v3506_v62 = vadd.f32 %v3505_v60, %v4785_v4 }
 0x4fc   : > { %v2947_v39 = vmax.f32 %v3503_v61, 0.0 }
 0x4fd   : > { %v2946_v63 = vmax.f32 %v3506_v62, 0.0 }
 0x4fe   : > { %2963 = vst.msk [vmem:[%s3734_s23 + $0x28] sm:$0xff] %vm1611_vm11, %v2947_v39 }
 0x4ff   : > { %2962 = vst.msk [vmem:[%s3734_s23 + $0x20] sm:$0xff] %vm1611_vm11, %v2946_v63 }
 0x502   : > { %v3416_v0 = vpop.f32.mrb[26].mxu0 }
 0x503   : > { %v2663_v1 = vadd.f32 %v3416_v0, %v4790_v41  ;;  %v2657_v2 = vpop.f32.mrb[27].mxu0 }
 0x504   : > { %v2658_v44 = vadd.f32 %v4790_v41, %v2657_v2 }
 0x505   : > { %v3508_v13 = vadd.f32 %v4795_v37, %v2663_v1 }
 0x506   : > { %v3511_v3 = vadd.f32 %v4795_v37, %v2658_v44 }
 0x507   : > { %v3509_v14 = vadd.f32 %v3508_v13, %v4797_v11 }
 0x508   : > { %v3512_v4 = vadd.f32 %v3511_v3, %v4799_v12 }
 0x509   : > { %v2949_v23 = vmax.f32 %v3509_v14, 0.0 }
 0x50a   : > { %v2948_v24 = vmax.f32 %v3512_v4, 0.0 }
 0x50b   : > { %2965 = vst.msk [vmem:[%s3734_s23 + $0x38] sm:$0xff] %vm1611_vm11, %v2949_v23 }
 0x50c   : > { %2964 = vst.msk [vmem:[%s3734_s23 + $0x30] sm:$0xff] %vm1611_vm11, %v2948_v24 }
 0x50d PF: > { %s17_s28 = sadd.s32 1, %s3632_s28   ;;  %s4878_s24 = smov %s3624_s26 }
 0x50e   : > { %p14_p10 = scmp.ge.s32.totalorder %s17_s28, 6   ;;  %s4879_s25 = smov %s3628_s27 }
 0x50f   : > { %s4880_s26 = smov %s4883_s29  ;;  %s4881_s27 = smov %s4887_s30 }
 0x510   :  { %16 = sbr.rel (!%p14_p10) target bundleno = 3 (0x3), region = 91 }

</bundles_post_ra>
